<compile_context>
chip_gen: v7x
topology: tpu7x:2x2x1
jax: 0.10.0
libtpu: 0.0.40
codegen_flags: <defaults>
</compile_context>

<pallas_src>
import functools
import numpy as np
import jax
import jax.numpy as jnp
from jax.experimental import pallas as pl
from jax.experimental.pallas import tpu as pltpu


# ----------------------------- "params" --------------------------------------
class Params:
    sample_rate = 16000
    n_mels = 8
    stft_scales = (64, 128)
    log_epsilon = 1e-7


LANE = 128
MAX_BLOCK_ROWS = 256        # 256 block rows x 4 frames/row = 1024 frames per tile


def _round_up(x, m):
    return (x + m - 1) // m * m


# ----------------------- constants (numpy, built once) ------------------------
def _hz_to_mel(f):
    return 2595.0 * np.log10(1.0 + f / 700.0)


def _mel_to_hz(m):
    return 700.0 * (10.0 ** (m / 2595.0) - 1.0)


def _mel_filterbank_np(n_freqs, n_mels, sample_rate):
    # torchaudio.functional.melscale_fbanks (htk scale, norm=None)
    all_freqs = np.linspace(0, sample_rate // 2, n_freqs)
    m_pts = np.linspace(_hz_to_mel(0.0), _hz_to_mel(sample_rate / 2.0), n_mels + 2)
    f_pts = _mel_to_hz(m_pts)
    f_diff = f_pts[1:] - f_pts[:-1]
    slopes = f_pts[None, :] - all_freqs[:, None]
    down = -slopes[:, :-2] / f_diff[:-1]
    up = slopes[:, 2:] / f_diff[1:]
    return np.maximum(0.0, np.minimum(down, up)).astype(np.float32)  # (n_freqs, n_mels)


def build_scale_consts(n_fft, sample_rate, n_mels):
    """Phase-shifted, window-folded DFT basis + mel filterbank for one scale."""
    hop = n_fft // 4
    Q = n_fft // 2 + 1
    pq = _round_up(Q, LANE)
    pm = _round_up(n_mels, LANE)
    n = np.arange(n_fft)
    win = 0.5 - 0.5 * np.cos(2.0 * np.pi * n / n_fft)          # periodic Hann
    ang = 2.0 * np.pi * np.outer(n, np.arange(Q)) / n_fft
    wincos = win[:, None] * np.cos(ang)                         # window folded in
    winsin = win[:, None] * np.sin(ang)
    # A maps a 2*n_fft-sample row (stride n_fft) to the [cos|sin] DFT of the
    # 4 hop-phase frames starting in that row.  Phase p lives at lane offset
    # 2*pq*p and reads samples [p*hop, p*hop + n_fft) of the row.
    A = np.zeros((2 * n_fft, 4 * 2 * pq), np.float32)
    for p in range(4):
        off = 2 * pq * p
        A[p * hop:p * hop + n_fft, off:off + Q] = wincos
        A[p * hop:p * hop + n_fft, off + pq:off + pq + Q] = winsin
    fb = np.zeros((pq, pm), np.float32)
    fb[:Q, :n_mels] = _mel_filterbank_np(Q, n_mels, sample_rate)
    return {
        "n_fft": n_fft, "hop": hop, "n_mels": n_mels, "pq": pq, "pm": pm,
        "A": jnp.asarray(A, jnp.bfloat16),
        "fb": jnp.asarray(fb, jnp.bfloat16),
    }


# ----------------------------- fused Pallas kernel ----------------------------
def _mel_dist_kernel(yx_ref, yy_ref, a_ref, fb_ref, o_ref, *,
                     pq, n_frames, tiles_per_ch, log_eps):
    tk = yx_ref.shape[0]                                   # block rows per tile
    a = a_ref[...]                                         # (2*n_fft, 8*pq) bf16
    fb = fb_ref[...]                                       # (pq, 128) bf16
    # one MXU matmul per signal -> windowed DFT (cos|sin) of all 4 hop phases
    rx = jnp.dot(yx_ref[...], a, preferred_element_type=jnp.float32)   # (tk, 8*pq)
    ry = jnp.dot(yy_ref[...], a, preferred_element_type=jnp.float32)

    row0 = (pl.program_id(0) % tiles_per_ch) * tk          # row index within channel
    rows = row0 + jax.lax.broadcasted_iota(jnp.int32, (tk, 1), 0)

    lin_acc = jnp.zeros((1, LANE), jnp.float32)
    log_acc = jnp.zeros((1, LANE), jnp.float32)
    for p in range(4):                                     # 4 hop phases, unrolled
        off = 2 * pq * p
        cx, sx = rx[:, off:off + pq], rx[:, off + pq:off + 2 * pq]
        cy, sy = ry[:, off:off + pq], ry[:, off + pq:off + 2 * pq]
        # TODO(synk): sqrt at exactly 0 has an inf/NaN gradient; add a tiny eps
        # inside the sqrt (or mask) before differentiating this loss.
        magx = jnp.sqrt(cx * cx + sx * sx)
        magy = jnp.sqrt(cy * cy + sy * sy)
        melx = jnp.dot(magx.astype(jnp.bfloat16), fb,
                       preferred_element_type=jnp.float32)             # (tk, 128)
        mely = jnp.dot(magy.astype(jnp.bfloat16), fb,
                       preferred_element_type=jnp.float32)
        valid = (4 * rows + p) < n_frames                  # mask fake tail frames
        d = jnp.where(valid, melx - mely, 0.0)
        # single log: |log(a+eps) - log(b+eps)| == |log((a+eps)/(b+eps))|
        dl = jnp.where(valid,
                       jnp.abs(jnp.log((melx + log_eps) / (mely + log_eps))),
                       0.0)
        lin_acc = lin_acc + jnp.sum(d * d, axis=0, keepdims=True)
        log_acc = log_acc + jnp.sum(dl, axis=0, keepdims=True)

    # lane-dense (8,128) output tile: row 0 = MSE lane partials, row 1 = log-L1
    o_ref[...] = jnp.zeros_like(o_ref)
    o_ref[0:1, :] = lin_acc
    o_ref[1:2, :] = log_acc


# ----------------------------- per-scale wrapper ------------------------------
def _scale_distance(x2, y2, consts, log_eps):
    n_fft, hop, pq = consts["n_fft"], consts["hop"], consts["pq"]
    BC, T = x2.shape
    pad = n_fft // 2
    Tp0 = T + 2 * pad
    n_frames = 1 + (Tp0 - n_fft) // hop                    # torch.stft center=True
    n_rows = -(-n_frames // 4)                             # 4 frames per block row
    tk = min(MAX_BLOCK_ROWS, _round_up(n_rows, 8))
    n_rows_p = _round_up(n_rows, tk)
    tiles_per_ch = n_rows_p // tk
    need = (n_rows_p + 1) * n_fft

    def to_rows(sig):
        # reflect-pad, zero-pad, re-block into 2*n_fft-sample rows at stride
        # n_fft (pure slices + one concat; no gather, bf16, ~2x duplication)
        sp = jnp.pad(sig, ((0, 0), (pad, pad)), mode="reflect")
        sp = jnp.pad(sp, ((0, 0), (0, need - Tp0)))
        X = sp.reshape(BC, n_rows_p + 1, n_fft)
        Y = jnp.concatenate([X[:, :-1, :], X[:, 1:, :]], axis=-1)
        return Y.astype(jnp.bfloat16).reshape(BC * n_rows_p, 2 * n_fft)

    Yx = to_rows(x2)
    Yy = to_rows(y2)
    n_tiles = BC * tiles_per_ch

    kernel = functools.partial(_mel_dist_kernel, pq=pq, n_frames=n_frames,
                               tiles_per_ch=tiles_per_ch, log_eps=log_eps)
    out = pl.pallas_call(
        kernel,
        out_shape=jax.ShapeDtypeStruct((n_tiles * 8, LANE), jnp.float32),
        grid=(n_tiles,),
        in_specs=[
            pl.BlockSpec((tk, 2 * n_fft), lambda t: (t, 0)),
            pl.BlockSpec((tk, 2 * n_fft), lambda t: (t, 0)),
            pl.BlockSpec((2 * n_fft, 4 * 2 * pq), lambda t: (0, 0)),
            pl.BlockSpec((pq, consts["pm"]), lambda t: (0, 0)),
        ],
        out_specs=pl.BlockSpec((8, LANE), lambda t: (t, 0)),
        compiler_params=pltpu.CompilerParams(
            dimension_semantics=("parallel",),
            vmem_limit_bytes=32 * 1024 * 1024,
        ),
    )(Yx, Yy, consts["A"], consts["fb"])

    # padding / masked frames / padded mel lanes contribute exactly zero
    count = jnp.float32(BC * n_frames * consts["n_mels"])
    return (jnp.sum(out[0::8, :]) + jnp.sum(out[1::8, :])) / count


def audio_distance(x, y, *, scale_consts, log_eps):
    b, c, t = x.shape
    x2 = x.reshape(b * c, t)
    y2 = y.reshape(b * c, t)
    dist = jnp.float32(0.0)
    for consts in scale_consts:
        dist = dist + _scale_distance(x2, y2, consts, log_eps)
    return dist


# ----------------------------- pure-JAX f32 reference -------------------------
def _frame(x2d, n_fft, hop):
    BC, T = x2d.shape
    pad = n_fft // 2
    xp = jnp.pad(x2d, ((0, 0), (pad, pad)), mode="reflect")   # center=True
    n_frames = 1 + (T + 2 * pad - n_fft) // hop
    idx = jnp.arange(n_frames)[:, None] * hop + jnp.arange(n_fft)[None, :]
    return xp[:, idx].reshape(BC * n_frames, n_fft)            # (M, n_fft)


def audio_distance_ref(x, y, p):
    hi = jax.lax.Precision.HIGHEST
    b, c, t = x.shape
    x2, y2 = x.reshape(b * c, t), y.reshape(b * c, t)
    dist = jnp.float32(0.0)
    for n_fft in p.stft_scales:
        hop = n_fft // 4
        Q = n_fft // 2 + 1
        n = np.arange(n_fft)
        ang = 2.0 * np.pi * np.outer(n, np.arange(Q)) / n_fft
        cos = jnp.asarray(np.cos(ang), jnp.float32)
        sin = jnp.asarray(np.sin(ang), jnp.float32)
        win = jnp.asarray(0.5 - 0.5 * np.cos(2.0 * np.pi * n / n_fft), jnp.float32)
        fb = jnp.asarray(_mel_filterbank_np(Q, p.n_mels, p.sample_rate))
        fx = _frame(x2, n_fft, hop) * win
        fy = _frame(y2, n_fft, hop) * win
        mx = jnp.dot(jnp.sqrt(jnp.dot(fx, cos, precision=hi) ** 2
                              + jnp.dot(fx, sin, precision=hi) ** 2), fb, precision=hi)
        my = jnp.dot(jnp.sqrt(jnp.dot(fy, cos, precision=hi) ** 2
                              + jnp.dot(fy, sin, precision=hi) ** 2), fb, precision=hi)
        dist = dist + jnp.mean((mx - my) ** 2)
        dist = dist + jnp.mean(jnp.abs(jnp.log(mx + p.log_epsilon)
                                       - jnp.log(my + p.log_epsilon)))
    return dist


# ----------------------------- main --------------------------------------------
if __name__ == "__main__":
    p = Params()
    key = jax.random.PRNGKey(0)
    kx, ky = jax.random.split(key)
    x = jax.random.normal(kx, (2, 2, 1024), jnp.float32)   # (B, C, T) audio
    y = jax.random.normal(ky, (2, 2, 1024), jnp.float32)

    scale_consts = tuple(build_scale_consts(s, p.sample_rate, p.n_mels)
                         for s in p.stft_scales)
    fwd = jax.jit(functools.partial(audio_distance,
                                    scale_consts=scale_consts,
                                    log_eps=p.log_epsilon))
    dist = fwd(x, y)
    jax.block_until_ready(dist)

    ref = audio_distance_ref(x, y, p)
    assert bool(jnp.isfinite(dist)), dist
    rel_err = abs(float(dist) - float(ref)) / max(abs(float(ref)), 1e-6)
    assert rel_err < 0.1, (float(dist), float(ref), rel_err)
    print("KERNEL_OK")
</pallas_src>

<mosaic_0001>
module attributes {stable_mosaic.version = 11 : i64} {
  func.func @_mel_dist_kernel(%arg0: i32, %arg1: memref<24x128xbf16, #tpu.memory_space<vmem>>, %arg2: memref<24x128xbf16, #tpu.memory_space<vmem>>, %arg3: memref<128x1024xbf16, #tpu.memory_space<vmem>>, %arg4: memref<128x128xbf16, #tpu.memory_space<vmem>>, %arg5: memref<8x128xf32, #tpu.memory_space<vmem>>) attributes {dimension_semantics = [#tpu.dimension_semantics<parallel>], iteration_bounds = array<i64: 4>, scalar_prefetch = 0 : i64, scratch_operands = 0 : i64, tpu.core_type = #tpu.core_type<tc>, window_params = [{transform_indices = @transform_0, window_bounds = array<i64: 24, 128>}, {transform_indices = @transform_1, window_bounds = array<i64: 24, 128>}, {pipeline_mode = #tpu.pipeline_mode<synchronous>, transform_indices = @transform_2, window_bounds = array<i64: 128, 1024>}, {pipeline_mode = #tpu.pipeline_mode<synchronous>, transform_indices = @transform_3, window_bounds = array<i64: 128, 128>}, {transform_indices = @transform_4, window_bounds = array<i64: 8, 128>}]} {
    %c0 = arith.constant 0 : index
    %c0_0 = arith.constant 0 : index
    %0 = vector.load %arg3[%c0, %c0_0] : memref<128x1024xbf16, #tpu.memory_space<vmem>>, vector<128x1024xbf16>
    %c0_1 = arith.constant 0 : index
    %c0_2 = arith.constant 0 : index
    %1 = vector.load %arg4[%c0_1, %c0_2] : memref<128x128xbf16, #tpu.memory_space<vmem>>, vector<128x128xbf16>
    %c0_3 = arith.constant 0 : index
    %c0_4 = arith.constant 0 : index
    %2 = vector.load %arg1[%c0_3, %c0_4] : memref<24x128xbf16, #tpu.memory_space<vmem>>, vector<24x128xbf16>
    %cst = arith.constant dense<0.000000e+00> : vector<24x1024xf32>
    %3 = tpu.matmul %2, %0, %cst {dimension_numbers = #tpu.dot_dimension_numbers<[1], [0], [0], [1], [0, 0, 1, 1], [], []>} : vector<24x128xbf16>, vector<128x1024xbf16>, vector<24x1024xf32> -> vector<24x1024xf32>
    %c0_5 = arith.constant 0 : index
    %c0_6 = arith.constant 0 : index
    %4 = vector.load %arg2[%c0_5, %c0_6] : memref<24x128xbf16, #tpu.memory_space<vmem>>, vector<24x128xbf16>
    %cst_7 = arith.constant dense<0.000000e+00> : vector<24x1024xf32>
    %5 = tpu.matmul %4, %0, %cst_7 {dimension_numbers = #tpu.dot_dimension_numbers<[1], [0], [0], [1], [0, 0, 1, 1], [], []>} : vector<24x128xbf16>, vector<128x1024xbf16>, vector<24x1024xf32> -> vector<24x1024xf32>
    %c1_i32 = arith.constant 1 : i32
    %c0_i32 = arith.constant 0 : i32
    %6 = arith.cmpi eq, %c1_i32, %c0_i32 : i32
    %c1_i32_8 = arith.constant 1 : i32
    %7 = arith.select %6, %c1_i32_8, %c1_i32 : i32
    %8 = arith.remsi %arg0, %7 : i32
    %c0_i32_9 = arith.constant 0 : i32
    %9 = arith.cmpi ne, %8, %c0_i32_9 : i32
    %c0_i32_10 = arith.constant 0 : i32
    %10 = arith.cmpi slt, %8, %c0_i32_10 : i32
    %c0_i32_11 = arith.constant 0 : i32
    %11 = arith.cmpi slt, %7, %c0_i32_11 : i32
    %12 = arith.xori %10, %11 : i1
    %13 = arith.andi %12, %9 : i1
    %14 = arith.addi %8, %7 : i32
    %15 = arith.select %13, %14, %8 : i32
    %c24_i32 = arith.constant 24 : i32
    %16 = arith.muli %15, %c24_i32 : i32
    %17 = tpu.iota {dimensions = array<i32: 0>} : vector<24x1xi32>
    %18 = vector.broadcast %16 : i32 to vector<24x1xi32>
    %19 = arith.addi %18, %17 : vector<24x1xi32>
    %cst_12 = arith.constant 0.000000e+00 : f32
    %20 = vector.broadcast %cst_12 : f32 to vector<1x128xf32>
    %cst_13 = arith.constant 0.000000e+00 : f32
    %21 = vector.broadcast %cst_13 : f32 to vector<1x128xf32>
    %22 = vector.extract_strided_slice %3 {offsets = [0, 0], sizes = [24, 128], strides = [1, 1]} : vector<24x1024xf32> to vector<24x128xf32>
    %23 = vector.extract_strided_slice %3 {offsets = [0, 128], sizes = [24, 128], strides = [1, 1]} : vector<24x1024xf32> to vector<24x128xf32>
    %24 = vector.extract_strided_slice %5 {offsets = [0, 0], sizes = [24, 128], strides = [1, 1]} : vector<24x1024xf32> to vector<24x128xf32>
    %25 = vector.extract_strided_slice %5 {offsets = [0, 128], sizes = [24, 128], strides = [1, 1]} : vector<24x1024xf32> to vector<24x128xf32>
    %26 = arith.mulf %22, %22 : vector<24x128xf32>
    %27 = arith.mulf %23, %23 : vector<24x128xf32>
    %28 = arith.addf %26, %27 : vector<24x128xf32>
    %29 = math.sqrt %28 : vector<24x128xf32>
    %30 = arith.mulf %24, %24 : vector<24x128xf32>
    %31 = arith.mulf %25, %25 : vector<24x128xf32>
    %32 = arith.addf %30, %31 : vector<24x128xf32>
    %33 = math.sqrt %32 : vector<24x128xf32>
    %34 = arith.truncf %29 : vector<24x128xf32> to vector<24x128xbf16>
    %cst_14 = arith.constant dense<0.000000e+00> : vector<24x128xf32>
    %35 = tpu.matmul %34, %1, %cst_14 {dimension_numbers = #tpu.dot_dimension_numbers<[1], [0], [0], [1], [0, 0, 1, 1], [], []>} : vector<24x128xbf16>, vector<128x128xbf16>, vector<24x128xf32> -> vector<24x128xf32>
    %36 = arith.truncf %33 : vector<24x128xf32> to vector<24x128xbf16>
    %cst_15 = arith.constant dense<0.000000e+00> : vector<24x128xf32>
    %37 = tpu.matmul %36, %1, %cst_15 {dimension_numbers = #tpu.dot_dimension_numbers<[1], [0], [0], [1], [0, 0, 1, 1], [], []>} : vector<24x128xbf16>, vector<128x128xbf16>, vector<24x128xf32> -> vector<24x128xf32>
    %c4_i32 = arith.constant 4 : i32
    %38 = vector.broadcast %c4_i32 : i32 to vector<24x1xi32>
    %39 = arith.muli %38, %19 : vector<24x1xi32>
    %c0_i32_16 = arith.constant 0 : i32
    %40 = vector.broadcast %c0_i32_16 : i32 to vector<24x1xi32>
    %41 = arith.addi %39, %40 : vector<24x1xi32>
    %c65_i32 = arith.constant 65 : i32
    %42 = vector.broadcast %c65_i32 : i32 to vector<24x1xi32>
    %43 = arith.cmpi slt, %41, %42 : vector<24x1xi32>
    %44 = arith.subf %35, %37 : vector<24x128xf32>
    %cst_17 = arith.constant 0.000000e+00 : f32
    %45 = vector.shape_cast %43 : vector<24x1xi1> to vector<24x1xi1>
    %46 = vector.broadcast %45 : vector<24x1xi1> to vector<24x128xi1>
    %47 = vector.broadcast %cst_17 : f32 to vector<24x128xf32>
    %48 = arith.select %46, %44, %47 : vector<24x128xi1>, vector<24x128xf32>
    %cst_18 = arith.constant 1.000000e-07 : f32
    %49 = vector.broadcast %cst_18 : f32 to vector<24x128xf32>
    %50 = arith.addf %35, %49 : vector<24x128xf32>
    %cst_19 = arith.constant 1.000000e-07 : f32
    %51 = vector.broadcast %cst_19 : f32 to vector<24x128xf32>
    %52 = arith.addf %37, %51 : vector<24x128xf32>
    %53 = arith.divf %50, %52 : vector<24x128xf32>
    %54 = math.log %53 : vector<24x128xf32>
    %55 = math.absf %54 : vector<24x128xf32>
    %cst_20 = arith.constant 0.000000e+00 : f32
    %56 = vector.shape_cast %43 : vector<24x1xi1> to vector<24x1xi1>
    %57 = vector.broadcast %56 : vector<24x1xi1> to vector<24x128xi1>
    %58 = vector.broadcast %cst_20 : f32 to vector<24x128xf32>
    %59 = arith.select %57, %55, %58 : vector<24x128xi1>, vector<24x128xf32>
    %60 = arith.mulf %48, %48 : vector<24x128xf32>
    %cst_21 = arith.constant dense<0.000000e+00> : vector<128xf32>
    %61 = vector.multi_reduction <add>, %60, %cst_21 [0] : vector<24x128xf32> to vector<128xf32>
    %62 = vector.shape_cast %61 : vector<128xf32> to vector<1x128xf32>
    %63 = arith.addf %20, %62 : vector<1x128xf32>
    %cst_22 = arith.constant dense<0.000000e+00> : vector<128xf32>
    %64 = vector.multi_reduction <add>, %59, %cst_22 [0] : vector<24x128xf32> to vector<128xf32>
    %65 = vector.shape_cast %64 : vector<128xf32> to vector<1x128xf32>
    %66 = arith.addf %21, %65 : vector<1x128xf32>
    %67 = vector.extract_strided_slice %3 {offsets = [0, 256], sizes = [24, 128], strides = [1, 1]} : vector<24x1024xf32> to vector<24x128xf32>
    %68 = vector.extract_strided_slice %3 {offsets = [0, 384], sizes = [24, 128], strides = [1, 1]} : vector<24x1024xf32> to vector<24x128xf32>
    %69 = vector.extract_strided_slice %5 {offsets = [0, 256], sizes = [24, 128], strides = [1, 1]} : vector<24x1024xf32> to vector<24x128xf32>
    %70 = vector.extract_strided_slice %5 {offsets = [0, 384], sizes = [24, 128], strides = [1, 1]} : vector<24x1024xf32> to vector<24x128xf32>
    %71 = arith.mulf %67, %67 : vector<24x128xf32>
    %72 = arith.mulf %68, %68 : vector<24x128xf32>
    %73 = arith.addf %71, %72 : vector<24x128xf32>
    %74 = math.sqrt %73 : vector<24x128xf32>
    %75 = arith.mulf %69, %69 : vector<24x128xf32>
    %76 = arith.mulf %70, %70 : vector<24x128xf32>
    %77 = arith.addf %75, %76 : vector<24x128xf32>
    %78 = math.sqrt %77 : vector<24x128xf32>
    %79 = arith.truncf %74 : vector<24x128xf32> to vector<24x128xbf16>
    %cst_23 = arith.constant dense<0.000000e+00> : vector<24x128xf32>
    %80 = tpu.matmul %79, %1, %cst_23 {dimension_numbers = #tpu.dot_dimension_numbers<[1], [0], [0], [1], [0, 0, 1, 1], [], []>} : vector<24x128xbf16>, vector<128x128xbf16>, vector<24x128xf32> -> vector<24x128xf32>
    %81 = arith.truncf %78 : vector<24x128xf32> to vector<24x128xbf16>
    %cst_24 = arith.constant dense<0.000000e+00> : vector<24x128xf32>
    %82 = tpu.matmul %81, %1, %cst_24 {dimension_numbers = #tpu.dot_dimension_numbers<[1], [0], [0], [1], [0, 0, 1, 1], [], []>} : vector<24x128xbf16>, vector<128x128xbf16>, vector<24x128xf32> -> vector<24x128xf32>
    %c4_i32_25 = arith.constant 4 : i32
    %83 = vector.broadcast %c4_i32_25 : i32 to vector<24x1xi32>
    %84 = arith.muli %83, %19 : vector<24x1xi32>
    %c1_i32_26 = arith.constant 1 : i32
    %85 = vector.broadcast %c1_i32_26 : i32 to vector<24x1xi32>
    %86 = arith.addi %84, %85 : vector<24x1xi32>
    %c65_i32_27 = arith.constant 65 : i32
    %87 = vector.broadcast %c65_i32_27 : i32 to vector<24x1xi32>
    %88 = arith.cmpi slt, %86, %87 : vector<24x1xi32>
    %89 = arith.subf %80, %82 : vector<24x128xf32>
    %cst_28 = arith.constant 0.000000e+00 : f32
    %90 = vector.shape_cast %88 : vector<24x1xi1> to vector<24x1xi1>
    %91 = vector.broadcast %90 : vector<24x1xi1> to vector<24x128xi1>
    %92 = vector.broadcast %cst_28 : f32 to vector<24x128xf32>
    %93 = arith.select %91, %89, %92 : vector<24x128xi1>, vector<24x128xf32>
    %cst_29 = arith.constant 1.000000e-07 : f32
    %94 = vector.broadcast %cst_29 : f32 to vector<24x128xf32>
    %95 = arith.addf %80, %94 : vector<24x128xf32>
    %cst_30 = arith.constant 1.000000e-07 : f32
    %96 = vector.broadcast %cst_30 : f32 to vector<24x128xf32>
    %97 = arith.addf %82, %96 : vector<24x128xf32>
    %98 = arith.divf %95, %97 : vector<24x128xf32>
    %99 = math.log %98 : vector<24x128xf32>
    %100 = math.absf %99 : vector<24x128xf32>
    %cst_31 = arith.constant 0.000000e+00 : f32
    %101 = vector.shape_cast %88 : vector<24x1xi1> to vector<24x1xi1>
    %102 = vector.broadcast %101 : vector<24x1xi1> to vector<24x128xi1>
    %103 = vector.broadcast %cst_31 : f32 to vector<24x128xf32>
    %104 = arith.select %102, %100, %103 : vector<24x128xi1>, vector<24x128xf32>
    %105 = arith.mulf %93, %93 : vector<24x128xf32>
    %cst_32 = arith.constant dense<0.000000e+00> : vector<128xf32>
    %106 = vector.multi_reduction <add>, %105, %cst_32 [0] : vector<24x128xf32> to vector<128xf32>
    %107 = vector.shape_cast %106 : vector<128xf32> to vector<1x128xf32>
    %108 = arith.addf %63, %107 : vector<1x128xf32>
    %cst_33 = arith.constant dense<0.000000e+00> : vector<128xf32>
    %109 = vector.multi_reduction <add>, %104, %cst_33 [0] : vector<24x128xf32> to vector<128xf32>
    %110 = vector.shape_cast %109 : vector<128xf32> to vector<1x128xf32>
    %111 = arith.addf %66, %110 : vector<1x128xf32>
    %112 = vector.extract_strided_slice %3 {offsets = [0, 512], sizes = [24, 128], strides = [1, 1]} : vector<24x1024xf32> to vector<24x128xf32>
    %113 = vector.extract_strided_slice %3 {offsets = [0, 640], sizes = [24, 128], strides = [1, 1]} : vector<24x1024xf32> to vector<24x128xf32>
    %114 = vector.extract_strided_slice %5 {offsets = [0, 512], sizes = [24, 128], strides = [1, 1]} : vector<24x1024xf32> to vector<24x128xf32>
    %115 = vector.extract_strided_slice %5 {offsets = [0, 640], sizes = [24, 128], strides = [1, 1]} : vector<24x1024xf32> to vector<24x128xf32>
    %116 = arith.mulf %112, %112 : vector<24x128xf32>
    %117 = arith.mulf %113, %113 : vector<24x128xf32>
    %118 = arith.addf %116, %117 : vector<24x128xf32>
    %119 = math.sqrt %118 : vector<24x128xf32>
    %120 = arith.mulf %114, %114 : vector<24x128xf32>
    %121 = arith.mulf %115, %115 : vector<24x128xf32>
    %122 = arith.addf %120, %121 : vector<24x128xf32>
    %123 = math.sqrt %122 : vector<24x128xf32>
    %124 = arith.truncf %119 : vector<24x128xf32> to vector<24x128xbf16>
    %cst_34 = arith.constant dense<0.000000e+00> : vector<24x128xf32>
    %125 = tpu.matmul %124, %1, %cst_34 {dimension_numbers = #tpu.dot_dimension_numbers<[1], [0], [0], [1], [0, 0, 1, 1], [], []>} : vector<24x128xbf16>, vector<128x128xbf16>, vector<24x128xf32> -> vector<24x128xf32>
    %126 = arith.truncf %123 : vector<24x128xf32> to vector<24x128xbf16>
    %cst_35 = arith.constant dense<0.000000e+00> : vector<24x128xf32>
    %127 = tpu.matmul %126, %1, %cst_35 {dimension_numbers = #tpu.dot_dimension_numbers<[1], [0], [0], [1], [0, 0, 1, 1], [], []>} : vector<24x128xbf16>, vector<128x128xbf16>, vector<24x128xf32> -> vector<24x128xf32>
    %c4_i32_36 = arith.constant 4 : i32
    %128 = vector.broadcast %c4_i32_36 : i32 to vector<24x1xi32>
    %129 = arith.muli %128, %19 : vector<24x1xi32>
    %c2_i32 = arith.constant 2 : i32
    %130 = vector.broadcast %c2_i32 : i32 to vector<24x1xi32>
    %131 = arith.addi %129, %130 : vector<24x1xi32>
    %c65_i32_37 = arith.constant 65 : i32
    %132 = vector.broadcast %c65_i32_37 : i32 to vector<24x1xi32>
    %133 = arith.cmpi slt, %131, %132 : vector<24x1xi32>
    %134 = arith.subf %125, %127 : vector<24x128xf32>
    %cst_38 = arith.constant 0.000000e+00 : f32
    %135 = vector.shape_cast %133 : vector<24x1xi1> to vector<24x1xi1>
    %136 = vector.broadcast %135 : vector<24x1xi1> to vector<24x128xi1>
    %137 = vector.broadcast %cst_38 : f32 to vector<24x128xf32>
    %138 = arith.select %136, %134, %137 : vector<24x128xi1>, vector<24x128xf32>
    %cst_39 = arith.constant 1.000000e-07 : f32
    %139 = vector.broadcast %cst_39 : f32 to vector<24x128xf32>
    %140 = arith.addf %125, %139 : vector<24x128xf32>
    %cst_40 = arith.constant 1.000000e-07 : f32
    %141 = vector.broadcast %cst_40 : f32 to vector<24x128xf32>
    %142 = arith.addf %127, %141 : vector<24x128xf32>
    %143 = arith.divf %140, %142 : vector<24x128xf32>
    %144 = math.log %143 : vector<24x128xf32>
    %145 = math.absf %144 : vector<24x128xf32>
    %cst_41 = arith.constant 0.000000e+00 : f32
    %146 = vector.shape_cast %133 : vector<24x1xi1> to vector<24x1xi1>
    %147 = vector.broadcast %146 : vector<24x1xi1> to vector<24x128xi1>
    %148 = vector.broadcast %cst_41 : f32 to vector<24x128xf32>
    %149 = arith.select %147, %145, %148 : vector<24x128xi1>, vector<24x128xf32>
    %150 = arith.mulf %138, %138 : vector<24x128xf32>
    %cst_42 = arith.constant dense<0.000000e+00> : vector<128xf32>
    %151 = vector.multi_reduction <add>, %150, %cst_42 [0] : vector<24x128xf32> to vector<128xf32>
    %152 = vector.shape_cast %151 : vector<128xf32> to vector<1x128xf32>
    %153 = arith.addf %108, %152 : vector<1x128xf32>
    %cst_43 = arith.constant dense<0.000000e+00> : vector<128xf32>
    %154 = vector.multi_reduction <add>, %149, %cst_43 [0] : vector<24x128xf32> to vector<128xf32>
    %155 = vector.shape_cast %154 : vector<128xf32> to vector<1x128xf32>
    %156 = arith.addf %111, %155 : vector<1x128xf32>
    %157 = vector.extract_strided_slice %3 {offsets = [0, 768], sizes = [24, 128], strides = [1, 1]} : vector<24x1024xf32> to vector<24x128xf32>
    %158 = vector.extract_strided_slice %3 {offsets = [0, 896], sizes = [24, 128], strides = [1, 1]} : vector<24x1024xf32> to vector<24x128xf32>
    %159 = vector.extract_strided_slice %5 {offsets = [0, 768], sizes = [24, 128], strides = [1, 1]} : vector<24x1024xf32> to vector<24x128xf32>
    %160 = vector.extract_strided_slice %5 {offsets = [0, 896], sizes = [24, 128], strides = [1, 1]} : vector<24x1024xf32> to vector<24x128xf32>
    %161 = arith.mulf %157, %157 : vector<24x128xf32>
    %162 = arith.mulf %158, %158 : vector<24x128xf32>
    %163 = arith.addf %161, %162 : vector<24x128xf32>
    %164 = math.sqrt %163 : vector<24x128xf32>
    %165 = arith.mulf %159, %159 : vector<24x128xf32>
    %166 = arith.mulf %160, %160 : vector<24x128xf32>
    %167 = arith.addf %165, %166 : vector<24x128xf32>
    %168 = math.sqrt %167 : vector<24x128xf32>
    %169 = arith.truncf %164 : vector<24x128xf32> to vector<24x128xbf16>
    %cst_44 = arith.constant dense<0.000000e+00> : vector<24x128xf32>
    %170 = tpu.matmul %169, %1, %cst_44 {dimension_numbers = #tpu.dot_dimension_numbers<[1], [0], [0], [1], [0, 0, 1, 1], [], []>} : vector<24x128xbf16>, vector<128x128xbf16>, vector<24x128xf32> -> vector<24x128xf32>
    %171 = arith.truncf %168 : vector<24x128xf32> to vector<24x128xbf16>
    %cst_45 = arith.constant dense<0.000000e+00> : vector<24x128xf32>
    %172 = tpu.matmul %171, %1, %cst_45 {dimension_numbers = #tpu.dot_dimension_numbers<[1], [0], [0], [1], [0, 0, 1, 1], [], []>} : vector<24x128xbf16>, vector<128x128xbf16>, vector<24x128xf32> -> vector<24x128xf32>
    %c4_i32_46 = arith.constant 4 : i32
    %173 = vector.broadcast %c4_i32_46 : i32 to vector<24x1xi32>
    %174 = arith.muli %173, %19 : vector<24x1xi32>
    %c3_i32 = arith.constant 3 : i32
    %175 = vector.broadcast %c3_i32 : i32 to vector<24x1xi32>
    %176 = arith.addi %174, %175 : vector<24x1xi32>
    %c65_i32_47 = arith.constant 65 : i32
    %177 = vector.broadcast %c65_i32_47 : i32 to vector<24x1xi32>
    %178 = arith.cmpi slt, %176, %177 : vector<24x1xi32>
    %179 = arith.subf %170, %172 : vector<24x128xf32>
    %cst_48 = arith.constant 0.000000e+00 : f32
    %180 = vector.shape_cast %178 : vector<24x1xi1> to vector<24x1xi1>
    %181 = vector.broadcast %180 : vector<24x1xi1> to vector<24x128xi1>
    %182 = vector.broadcast %cst_48 : f32 to vector<24x128xf32>
    %183 = arith.select %181, %179, %182 : vector<24x128xi1>, vector<24x128xf32>
    %cst_49 = arith.constant 1.000000e-07 : f32
    %184 = vector.broadcast %cst_49 : f32 to vector<24x128xf32>
    %185 = arith.addf %170, %184 : vector<24x128xf32>
    %cst_50 = arith.constant 1.000000e-07 : f32
    %186 = vector.broadcast %cst_50 : f32 to vector<24x128xf32>
    %187 = arith.addf %172, %186 : vector<24x128xf32>
    %188 = arith.divf %185, %187 : vector<24x128xf32>
    %189 = math.log %188 : vector<24x128xf32>
    %190 = math.absf %189 : vector<24x128xf32>
    %cst_51 = arith.constant 0.000000e+00 : f32
    %191 = vector.shape_cast %178 : vector<24x1xi1> to vector<24x1xi1>
    %192 = vector.broadcast %191 : vector<24x1xi1> to vector<24x128xi1>
    %193 = vector.broadcast %cst_51 : f32 to vector<24x128xf32>
    %194 = arith.select %192, %190, %193 : vector<24x128xi1>, vector<24x128xf32>
    %195 = arith.mulf %183, %183 : vector<24x128xf32>
    %cst_52 = arith.constant dense<0.000000e+00> : vector<128xf32>
    %196 = vector.multi_reduction <add>, %195, %cst_52 [0] : vector<24x128xf32> to vector<128xf32>
    %197 = vector.shape_cast %196 : vector<128xf32> to vector<1x128xf32>
    %198 = arith.addf %153, %197 : vector<1x128xf32>
    %cst_53 = arith.constant dense<0.000000e+00> : vector<128xf32>
    %199 = vector.multi_reduction <add>, %194, %cst_53 [0] : vector<24x128xf32> to vector<128xf32>
    %200 = vector.shape_cast %199 : vector<128xf32> to vector<1x128xf32>
    %201 = arith.addf %156, %200 : vector<1x128xf32>
    %cst_54 = arith.constant 0.000000e+00 : f32
    %202 = vector.broadcast %cst_54 : f32 to vector<8x128xf32>
    %c0_55 = arith.constant 0 : index
    %c0_56 = arith.constant 0 : index
    %203 = vector.load %arg5[%c0_55, %c0_56] : memref<8x128xf32, #tpu.memory_space<vmem>>, vector<8x128xf32>
    tpu.vector_store %arg5[%c0_55, %c0_56], %202 {strides = array<i32>} : memref<8x128xf32, #tpu.memory_space<vmem>>, vector<8x128xf32>,
    %c0_57 = arith.constant 0 : index
    %c0_58 = arith.constant 0 : index
    %204 = vector.load %arg5[%c0_57, %c0_58] : memref<8x128xf32, #tpu.memory_space<vmem>>, vector<1x128xf32>
    tpu.vector_store %arg5[%c0_57, %c0_58], %198 {strides = array<i32>} : memref<8x128xf32, #tpu.memory_space<vmem>>, vector<1x128xf32>,
    %c1 = arith.constant 1 : index
    %c0_59 = arith.constant 0 : index
    %205 = vector.load %arg5[%c1, %c0_59] : memref<8x128xf32, #tpu.memory_space<vmem>>, vector<1x128xf32>
    tpu.vector_store %arg5[%c1, %c0_59], %201 {strides = array<i32>} : memref<8x128xf32, #tpu.memory_space<vmem>>, vector<1x128xf32>,
    return
  }
  func.func @transform_0(%arg0: i32) -> (i32, i32) {
    %c0_i32 = arith.constant 0 : i32
    %c0_i32_0 = arith.constant 0 : i32
    return %arg0, %c0_i32 : i32, i32
  }
  func.func @transform_1(%arg0: i32) -> (i32, i32) {
    %c0_i32 = arith.constant 0 : i32
    %c0_i32_0 = arith.constant 0 : i32
    return %arg0, %c0_i32 : i32, i32
  }
  func.func @transform_2(%arg0: i32) -> (i32, i32) {
    %c0_i32 = arith.constant 0 : i32
    %c0_i32_0 = arith.constant 0 : i32
    %c0_i32_1 = arith.constant 0 : i32
    return %c0_i32, %c0_i32_0 : i32, i32
  }
  func.func @transform_3(%arg0: i32) -> (i32, i32) {
    %c0_i32 = arith.constant 0 : i32
    %c0_i32_0 = arith.constant 0 : i32
    %c0_i32_1 = arith.constant 0 : i32
    return %c0_i32, %c0_i32_0 : i32, i32
  }
  func.func @transform_4(%arg0: i32) -> (i32, i32) {
    %c0_i32 = arith.constant 0 : i32
    %c0_i32_0 = arith.constant 0 : i32
    return %arg0, %c0_i32 : i32, i32
  }
}

module attributes {stable_mosaic.version = 11 : i64} {
  func.func @_mel_dist_kernel(%arg0: i32, %arg1: memref<16x256xbf16, #tpu.memory_space<vmem>>, %arg2: memref<16x256xbf16, #tpu.memory_space<vmem>>, %arg3: memref<256x1024xbf16, #tpu.memory_space<vmem>>, %arg4: memref<128x128xbf16, #tpu.memory_space<vmem>>, %arg5: memref<8x128xf32, #tpu.memory_space<vmem>>) attributes {dimension_semantics = [#tpu.dimension_semantics<parallel>], iteration_bounds = array<i64: 4>, scalar_prefetch = 0 : i64, scratch_operands = 0 : i64, tpu.core_type = #tpu.core_type<tc>, window_params = [{transform_indices = @transform_0, window_bounds = array<i64: 16, 256>}, {transform_indices = @transform_1, window_bounds = array<i64: 16, 256>}, {pipeline_mode = #tpu.pipeline_mode<synchronous>, transform_indices = @transform_2, window_bounds = array<i64: 256, 1024>}, {pipeline_mode = #tpu.pipeline_mode<synchronous>, transform_indices = @transform_3, window_bounds = array<i64: 128, 128>}, {transform_indices = @transform_4, window_bounds = array<i64: 8, 128>}]} {
    %c0 = arith.constant 0 : index
    %c0_0 = arith.constant 0 : index
    %0 = vector.load %arg3[%c0, %c0_0] : memref<256x1024xbf16, #tpu.memory_space<vmem>>, vector<256x1024xbf16>
    %c0_1 = arith.constant 0 : index
    %c0_2 = arith.constant 0 : index
    %1 = vector.load %arg4[%c0_1, %c0_2] : memref<128x128xbf16, #tpu.memory_space<vmem>>, vector<128x128xbf16>
    %c0_3 = arith.constant 0 : index
    %c0_4 = arith.constant 0 : index
    %2 = vector.load %arg1[%c0_3, %c0_4] : memref<16x256xbf16, #tpu.memory_space<vmem>>, vector<16x256xbf16>
    %cst = arith.constant dense<0.000000e+00> : vector<16x1024xf32>
    %3 = tpu.matmul %2, %0, %cst {dimension_numbers = #tpu.dot_dimension_numbers<[1], [0], [0], [1], [0, 0, 1, 1], [], []>} : vector<16x256xbf16>, vector<256x1024xbf16>, vector<16x1024xf32> -> vector<16x1024xf32>
    %c0_5 = arith.constant 0 : index
    %c0_6 = arith.constant 0 : index
    %4 = vector.load %arg2[%c0_5, %c0_6] : memref<16x256xbf16, #tpu.memory_space<vmem>>, vector<16x256xbf16>
    %cst_7 = arith.constant dense<0.000000e+00> : vector<16x1024xf32>
    %5 = tpu.matmul %4, %0, %cst_7 {dimension_numbers = #tpu.dot_dimension_numbers<[1], [0], [0], [1], [0, 0, 1, 1], [], []>} : vector<16x256xbf16>, vector<256x1024xbf16>, vector<16x1024xf32> -> vector<16x1024xf32>
    %c1_i32 = arith.constant 1 : i32
    %c0_i32 = arith.constant 0 : i32
    %6 = arith.cmpi eq, %c1_i32, %c0_i32 : i32
    %c1_i32_8 = arith.constant 1 : i32
    %7 = arith.select %6, %c1_i32_8, %c1_i32 : i32
    %8 = arith.remsi %arg0, %7 : i32
    %c0_i32_9 = arith.constant 0 : i32
    %9 = arith.cmpi ne, %8, %c0_i32_9 : i32
    %c0_i32_10 = arith.constant 0 : i32
    %10 = arith.cmpi slt, %8, %c0_i32_10 : i32
    %c0_i32_11 = arith.constant 0 : i32
    %11 = arith.cmpi slt, %7, %c0_i32_11 : i32
    %12 = arith.xori %10, %11 : i1
    %13 = arith.andi %12, %9 : i1
    %14 = arith.addi %8, %7 : i32
    %15 = arith.select %13, %14, %8 : i32
    %c16_i32 = arith.constant 16 : i32
    %16 = arith.muli %15, %c16_i32 : i32
    %17 = tpu.iota {dimensions = array<i32: 0>} : vector<16x1xi32>
    %18 = vector.broadcast %16 : i32 to vector<16x1xi32>
    %19 = arith.addi %18, %17 : vector<16x1xi32>
    %cst_12 = arith.constant 0.000000e+00 : f32
    %20 = vector.broadcast %cst_12 : f32 to vector<1x128xf32>
    %cst_13 = arith.constant 0.000000e+00 : f32
    %21 = vector.broadcast %cst_13 : f32 to vector<1x128xf32>
    %22 = vector.extract_strided_slice %3 {offsets = [0, 0], sizes = [16, 128], strides = [1, 1]} : vector<16x1024xf32> to vector<16x128xf32>
    %23 = vector.extract_strided_slice %3 {offsets = [0, 128], sizes = [16, 128], strides = [1, 1]} : vector<16x1024xf32> to vector<16x128xf32>
    %24 = vector.extract_strided_slice %5 {offsets = [0, 0], sizes = [16, 128], strides = [1, 1]} : vector<16x1024xf32> to vector<16x128xf32>
    %25 = vector.extract_strided_slice %5 {offsets = [0, 128], sizes = [16, 128], strides = [1, 1]} : vector<16x1024xf32> to vector<16x128xf32>
    %26 = arith.mulf %22, %22 : vector<16x128xf32>
    %27 = arith.mulf %23, %23 : vector<16x128xf32>
    %28 = arith.addf %26, %27 : vector<16x128xf32>
    %29 = math.sqrt %28 : vector<16x128xf32>
    %30 = arith.mulf %24, %24 : vector<16x128xf32>
    %31 = arith.mulf %25, %25 : vector<16x128xf32>
    %32 = arith.addf %30, %31 : vector<16x128xf32>
    %33 = math.sqrt %32 : vector<16x128xf32>
    %34 = arith.truncf %29 : vector<16x128xf32> to vector<16x128xbf16>
    %cst_14 = arith.constant dense<0.000000e+00> : vector<16x128xf32>
    %35 = tpu.matmul %34, %1, %cst_14 {dimension_numbers = #tpu.dot_dimension_numbers<[1], [0], [0], [1], [0, 0, 1, 1], [], []>} : vector<16x128xbf16>, vector<128x128xbf16>, vector<16x128xf32> -> vector<16x128xf32>
    %36 = arith.truncf %33 : vector<16x128xf32> to vector<16x128xbf16>
    %cst_15 = arith.constant dense<0.000000e+00> : vector<16x128xf32>
    %37 = tpu.matmul %36, %1, %cst_15 {dimension_numbers = #tpu.dot_dimension_numbers<[1], [0], [0], [1], [0, 0, 1, 1], [], []>} : vector<16x128xbf16>, vector<128x128xbf16>, vector<16x128xf32> -> vector<16x128xf32>
    %c4_i32 = arith.constant 4 : i32
    %38 = vector.broadcast %c4_i32 : i32 to vector<16x1xi32>
    %39 = arith.muli %38, %19 : vector<16x1xi32>
    %c0_i32_16 = arith.constant 0 : i32
    %40 = vector.broadcast %c0_i32_16 : i32 to vector<16x1xi32>
    %41 = arith.addi %39, %40 : vector<16x1xi32>
    %c33_i32 = arith.constant 33 : i32
    %42 = vector.broadcast %c33_i32 : i32 to vector<16x1xi32>
    %43 = arith.cmpi slt, %41, %42 : vector<16x1xi32>
    %44 = arith.subf %35, %37 : vector<16x128xf32>
    %cst_17 = arith.constant 0.000000e+00 : f32
    %45 = vector.shape_cast %43 : vector<16x1xi1> to vector<16x1xi1>
    %46 = vector.broadcast %45 : vector<16x1xi1> to vector<16x128xi1>
    %47 = vector.broadcast %cst_17 : f32 to vector<16x128xf32>
    %48 = arith.select %46, %44, %47 : vector<16x128xi1>, vector<16x128xf32>
    %cst_18 = arith.constant 1.000000e-07 : f32
    %49 = vector.broadcast %cst_18 : f32 to vector<16x128xf32>
    %50 = arith.addf %35, %49 : vector<16x128xf32>
    %cst_19 = arith.constant 1.000000e-07 : f32
    %51 = vector.broadcast %cst_19 : f32 to vector<16x128xf32>
    %52 = arith.addf %37, %51 : vector<16x128xf32>
    %53 = arith.divf %50, %52 : vector<16x128xf32>
    %54 = math.log %53 : vector<16x128xf32>
    %55 = math.absf %54 : vector<16x128xf32>
    %cst_20 = arith.constant 0.000000e+00 : f32
    %56 = vector.shape_cast %43 : vector<16x1xi1> to vector<16x1xi1>
    %57 = vector.broadcast %56 : vector<16x1xi1> to vector<16x128xi1>
    %58 = vector.broadcast %cst_20 : f32 to vector<16x128xf32>
    %59 = arith.select %57, %55, %58 : vector<16x128xi1>, vector<16x128xf32>
    %60 = arith.mulf %48, %48 : vector<16x128xf32>
    %cst_21 = arith.constant dense<0.000000e+00> : vector<128xf32>
    %61 = vector.multi_reduction <add>, %60, %cst_21 [0] : vector<16x128xf32> to vector<128xf32>
    %62 = vector.shape_cast %61 : vector<128xf32> to vector<1x128xf32>
    %63 = arith.addf %20, %62 : vector<1x128xf32>
    %cst_22 = arith.constant dense<0.000000e+00> : vector<128xf32>
    %64 = vector.multi_reduction <add>, %59, %cst_22 [0] : vector<16x128xf32> to vector<128xf32>
    %65 = vector.shape_cast %64 : vector<128xf32> to vector<1x128xf32>
    %66 = arith.addf %21, %65 : vector<1x128xf32>
    %67 = vector.extract_strided_slice %3 {offsets = [0, 256], sizes = [16, 128], strides = [1, 1]} : vector<16x1024xf32> to vector<16x128xf32>
    %68 = vector.extract_strided_slice %3 {offsets = [0, 384], sizes = [16, 128], strides = [1, 1]} : vector<16x1024xf32> to vector<16x128xf32>
    %69 = vector.extract_strided_slice %5 {offsets = [0, 256], sizes = [16, 128], strides = [1, 1]} : vector<16x1024xf32> to vector<16x128xf32>
    %70 = vector.extract_strided_slice %5 {offsets = [0, 384], sizes = [16, 128], strides = [1, 1]} : vector<16x1024xf32> to vector<16x128xf32>
    %71 = arith.mulf %67, %67 : vector<16x128xf32>
    %72 = arith.mulf %68, %68 : vector<16x128xf32>
    %73 = arith.addf %71, %72 : vector<16x128xf32>
    %74 = math.sqrt %73 : vector<16x128xf32>
    %75 = arith.mulf %69, %69 : vector<16x128xf32>
    %76 = arith.mulf %70, %70 : vector<16x128xf32>
    %77 = arith.addf %75, %76 : vector<16x128xf32>
    %78 = math.sqrt %77 : vector<16x128xf32>
    %79 = arith.truncf %74 : vector<16x128xf32> to vector<16x128xbf16>
    %cst_23 = arith.constant dense<0.000000e+00> : vector<16x128xf32>
    %80 = tpu.matmul %79, %1, %cst_23 {dimension_numbers = #tpu.dot_dimension_numbers<[1], [0], [0], [1], [0, 0, 1, 1], [], []>} : vector<16x128xbf16>, vector<128x128xbf16>, vector<16x128xf32> -> vector<16x128xf32>
    %81 = arith.truncf %78 : vector<16x128xf32> to vector<16x128xbf16>
    %cst_24 = arith.constant dense<0.000000e+00> : vector<16x128xf32>
    %82 = tpu.matmul %81, %1, %cst_24 {dimension_numbers = #tpu.dot_dimension_numbers<[1], [0], [0], [1], [0, 0, 1, 1], [], []>} : vector<16x128xbf16>, vector<128x128xbf16>, vector<16x128xf32> -> vector<16x128xf32>
    %c4_i32_25 = arith.constant 4 : i32
    %83 = vector.broadcast %c4_i32_25 : i32 to vector<16x1xi32>
    %84 = arith.muli %83, %19 : vector<16x1xi32>
    %c1_i32_26 = arith.constant 1 : i32
    %85 = vector.broadcast %c1_i32_26 : i32 to vector<16x1xi32>
    %86 = arith.addi %84, %85 : vector<16x1xi32>
    %c33_i32_27 = arith.constant 33 : i32
    %87 = vector.broadcast %c33_i32_27 : i32 to vector<16x1xi32>
    %88 = arith.cmpi slt, %86, %87 : vector<16x1xi32>
    %89 = arith.subf %80, %82 : vector<16x128xf32>
    %cst_28 = arith.constant 0.000000e+00 : f32
    %90 = vector.shape_cast %88 : vector<16x1xi1> to vector<16x1xi1>
    %91 = vector.broadcast %90 : vector<16x1xi1> to vector<16x128xi1>
    %92 = vector.broadcast %cst_28 : f32 to vector<16x128xf32>
    %93 = arith.select %91, %89, %92 : vector<16x128xi1>, vector<16x128xf32>
    %cst_29 = arith.constant 1.000000e-07 : f32
    %94 = vector.broadcast %cst_29 : f32 to vector<16x128xf32>
    %95 = arith.addf %80, %94 : vector<16x128xf32>
    %cst_30 = arith.constant 1.000000e-07 : f32
    %96 = vector.broadcast %cst_30 : f32 to vector<16x128xf32>
    %97 = arith.addf %82, %96 : vector<16x128xf32>
    %98 = arith.divf %95, %97 : vector<16x128xf32>
    %99 = math.log %98 : vector<16x128xf32>
    %100 = math.absf %99 : vector<16x128xf32>
    %cst_31 = arith.constant 0.000000e+00 : f32
    %101 = vector.shape_cast %88 : vector<16x1xi1> to vector<16x1xi1>
    %102 = vector.broadcast %101 : vector<16x1xi1> to vector<16x128xi1>
    %103 = vector.broadcast %cst_31 : f32 to vector<16x128xf32>
    %104 = arith.select %102, %100, %103 : vector<16x128xi1>, vector<16x128xf32>
    %105 = arith.mulf %93, %93 : vector<16x128xf32>
    %cst_32 = arith.constant dense<0.000000e+00> : vector<128xf32>
    %106 = vector.multi_reduction <add>, %105, %cst_32 [0] : vector<16x128xf32> to vector<128xf32>
    %107 = vector.shape_cast %106 : vector<128xf32> to vector<1x128xf32>
    %108 = arith.addf %63, %107 : vector<1x128xf32>
    %cst_33 = arith.constant dense<0.000000e+00> : vector<128xf32>
    %109 = vector.multi_reduction <add>, %104, %cst_33 [0] : vector<16x128xf32> to vector<128xf32>
    %110 = vector.shape_cast %109 : vector<128xf32> to vector<1x128xf32>
    %111 = arith.addf %66, %110 : vector<1x128xf32>
    %112 = vector.extract_strided_slice %3 {offsets = [0, 512], sizes = [16, 128], strides = [1, 1]} : vector<16x1024xf32> to vector<16x128xf32>
    %113 = vector.extract_strided_slice %3 {offsets = [0, 640], sizes = [16, 128], strides = [1, 1]} : vector<16x1024xf32> to vector<16x128xf32>
    %114 = vector.extract_strided_slice %5 {offsets = [0, 512], sizes = [16, 128], strides = [1, 1]} : vector<16x1024xf32> to vector<16x128xf32>
    %115 = vector.extract_strided_slice %5 {offsets = [0, 640], sizes = [16, 128], strides = [1, 1]} : vector<16x1024xf32> to vector<16x128xf32>
    %116 = arith.mulf %112, %112 : vector<16x128xf32>
    %117 = arith.mulf %113, %113 : vector<16x128xf32>
    %118 = arith.addf %116, %117 : vector<16x128xf32>
    %119 = math.sqrt %118 : vector<16x128xf32>
    %120 = arith.mulf %114, %114 : vector<16x128xf32>
    %121 = arith.mulf %115, %115 : vector<16x128xf32>
    %122 = arith.addf %120, %121 : vector<16x128xf32>
    %123 = math.sqrt %122 : vector<16x128xf32>
    %124 = arith.truncf %119 : vector<16x128xf32> to vector<16x128xbf16>
    %cst_34 = arith.constant dense<0.000000e+00> : vector<16x128xf32>
    %125 = tpu.matmul %124, %1, %cst_34 {dimension_numbers = #tpu.dot_dimension_numbers<[1], [0], [0], [1], [0, 0, 1, 1], [], []>} : vector<16x128xbf16>, vector<128x128xbf16>, vector<16x128xf32> -> vector<16x128xf32>
    %126 = arith.truncf %123 : vector<16x128xf32> to vector<16x128xbf16>
    %cst_35 = arith.constant dense<0.000000e+00> : vector<16x128xf32>
    %127 = tpu.matmul %126, %1, %cst_35 {dimension_numbers = #tpu.dot_dimension_numbers<[1], [0], [0], [1], [0, 0, 1, 1], [], []>} : vector<16x128xbf16>, vector<128x128xbf16>, vector<16x128xf32> -> vector<16x128xf32>
    %c4_i32_36 = arith.constant 4 : i32
    %128 = vector.broadcast %c4_i32_36 : i32 to vector<16x1xi32>
    %129 = arith.muli %128, %19 : vector<16x1xi32>
    %c2_i32 = arith.constant 2 : i32
    %130 = vector.broadcast %c2_i32 : i32 to vector<16x1xi32>
    %131 = arith.addi %129, %130 : vector<16x1xi32>
    %c33_i32_37 = arith.constant 33 : i32
    %132 = vector.broadcast %c33_i32_37 : i32 to vector<16x1xi32>
    %133 = arith.cmpi slt, %131, %132 : vector<16x1xi32>
    %134 = arith.subf %125, %127 : vector<16x128xf32>
    %cst_38 = arith.constant 0.000000e+00 : f32
    %135 = vector.shape_cast %133 : vector<16x1xi1> to vector<16x1xi1>
    %136 = vector.broadcast %135 : vector<16x1xi1> to vector<16x128xi1>
    %137 = vector.broadcast %cst_38 : f32 to vector<16x128xf32>
    %138 = arith.select %136, %134, %137 : vector<16x128xi1>, vector<16x128xf32>
    %cst_39 = arith.constant 1.000000e-07 : f32
    %139 = vector.broadcast %cst_39 : f32 to vector<16x128xf32>
    %140 = arith.addf %125, %139 : vector<16x128xf32>
    %cst_40 = arith.constant 1.000000e-07 : f32
    %141 = vector.broadcast %cst_40 : f32 to vector<16x128xf32>
    %142 = arith.addf %127, %141 : vector<16x128xf32>
    %143 = arith.divf %140, %142 : vector<16x128xf32>
    %144 = math.log %143 : vector<16x128xf32>
    %145 = math.absf %144 : vector<16x128xf32>
    %cst_41 = arith.constant 0.000000e+00 : f32
    %146 = vector.shape_cast %133 : vector<16x1xi1> to vector<16x1xi1>
    %147 = vector.broadcast %146 : vector<16x1xi1> to vector<16x128xi1>
    %148 = vector.broadcast %cst_41 : f32 to vector<16x128xf32>
    %149 = arith.select %147, %145, %148 : vector<16x128xi1>, vector<16x128xf32>
    %150 = arith.mulf %138, %138 : vector<16x128xf32>
    %cst_42 = arith.constant dense<0.000000e+00> : vector<128xf32>
    %151 = vector.multi_reduction <add>, %150, %cst_42 [0] : vector<16x128xf32> to vector<128xf32>
    %152 = vector.shape_cast %151 : vector<128xf32> to vector<1x128xf32>
    %153 = arith.addf %108, %152 : vector<1x128xf32>
    %cst_43 = arith.constant dense<0.000000e+00> : vector<128xf32>
    %154 = vector.multi_reduction <add>, %149, %cst_43 [0] : vector<16x128xf32> to vector<128xf32>
    %155 = vector.shape_cast %154 : vector<128xf32> to vector<1x128xf32>
    %156 = arith.addf %111, %155 : vector<1x128xf32>
    %157 = vector.extract_strided_slice %3 {offsets = [0, 768], sizes = [16, 128], strides = [1, 1]} : vector<16x1024xf32> to vector<16x128xf32>
    %158 = vector.extract_strided_slice %3 {offsets = [0, 896], sizes = [16, 128], strides = [1, 1]} : vector<16x1024xf32> to vector<16x128xf32>
    %159 = vector.extract_strided_slice %5 {offsets = [0, 768], sizes = [16, 128], strides = [1, 1]} : vector<16x1024xf32> to vector<16x128xf32>
    %160 = vector.extract_strided_slice %5 {offsets = [0, 896], sizes = [16, 128], strides = [1, 1]} : vector<16x1024xf32> to vector<16x128xf32>
    %161 = arith.mulf %157, %157 : vector<16x128xf32>
    %162 = arith.mulf %158, %158 : vector<16x128xf32>
    %163 = arith.addf %161, %162 : vector<16x128xf32>
    %164 = math.sqrt %163 : vector<16x128xf32>
    %165 = arith.mulf %159, %159 : vector<16x128xf32>
    %166 = arith.mulf %160, %160 : vector<16x128xf32>
    %167 = arith.addf %165, %166 : vector<16x128xf32>
    %168 = math.sqrt %167 : vector<16x128xf32>
    %169 = arith.truncf %164 : vector<16x128xf32> to vector<16x128xbf16>
    %cst_44 = arith.constant dense<0.000000e+00> : vector<16x128xf32>
    %170 = tpu.matmul %169, %1, %cst_44 {dimension_numbers = #tpu.dot_dimension_numbers<[1], [0], [0], [1], [0, 0, 1, 1], [], []>} : vector<16x128xbf16>, vector<128x128xbf16>, vector<16x128xf32> -> vector<16x128xf32>
    %171 = arith.truncf %168 : vector<16x128xf32> to vector<16x128xbf16>
    %cst_45 = arith.constant dense<0.000000e+00> : vector<16x128xf32>
    %172 = tpu.matmul %171, %1, %cst_45 {dimension_numbers = #tpu.dot_dimension_numbers<[1], [0], [0], [1], [0, 0, 1, 1], [], []>} : vector<16x128xbf16>, vector<128x128xbf16>, vector<16x128xf32> -> vector<16x128xf32>
    %c4_i32_46 = arith.constant 4 : i32
    %173 = vector.broadcast %c4_i32_46 : i32 to vector<16x1xi32>
    %174 = arith.muli %173, %19 : vector<16x1xi32>
    %c3_i32 = arith.constant 3 : i32
    %175 = vector.broadcast %c3_i32 : i32 to vector<16x1xi32>
    %176 = arith.addi %174, %175 : vector<16x1xi32>
    %c33_i32_47 = arith.constant 33 : i32
    %177 = vector.broadcast %c33_i32_47 : i32 to vector<16x1xi32>
    %178 = arith.cmpi slt, %176, %177 : vector<16x1xi32>
    %179 = arith.subf %170, %172 : vector<16x128xf32>
    %cst_48 = arith.constant 0.000000e+00 : f32
    %180 = vector.shape_cast %178 : vector<16x1xi1> to vector<16x1xi1>
    %181 = vector.broadcast %180 : vector<16x1xi1> to vector<16x128xi1>
    %182 = vector.broadcast %cst_48 : f32 to vector<16x128xf32>
    %183 = arith.select %181, %179, %182 : vector<16x128xi1>, vector<16x128xf32>
    %cst_49 = arith.constant 1.000000e-07 : f32
    %184 = vector.broadcast %cst_49 : f32 to vector<16x128xf32>
    %185 = arith.addf %170, %184 : vector<16x128xf32>
    %cst_50 = arith.constant 1.000000e-07 : f32
    %186 = vector.broadcast %cst_50 : f32 to vector<16x128xf32>
    %187 = arith.addf %172, %186 : vector<16x128xf32>
    %188 = arith.divf %185, %187 : vector<16x128xf32>
    %189 = math.log %188 : vector<16x128xf32>
    %190 = math.absf %189 : vector<16x128xf32>
    %cst_51 = arith.constant 0.000000e+00 : f32
    %191 = vector.shape_cast %178 : vector<16x1xi1> to vector<16x1xi1>
    %192 = vector.broadcast %191 : vector<16x1xi1> to vector<16x128xi1>
    %193 = vector.broadcast %cst_51 : f32 to vector<16x128xf32>
    %194 = arith.select %192, %190, %193 : vector<16x128xi1>, vector<16x128xf32>
    %195 = arith.mulf %183, %183 : vector<16x128xf32>
    %cst_52 = arith.constant dense<0.000000e+00> : vector<128xf32>
    %196 = vector.multi_reduction <add>, %195, %cst_52 [0] : vector<16x128xf32> to vector<128xf32>
    %197 = vector.shape_cast %196 : vector<128xf32> to vector<1x128xf32>
    %198 = arith.addf %153, %197 : vector<1x128xf32>
    %cst_53 = arith.constant dense<0.000000e+00> : vector<128xf32>
    %199 = vector.multi_reduction <add>, %194, %cst_53 [0] : vector<16x128xf32> to vector<128xf32>
    %200 = vector.shape_cast %199 : vector<128xf32> to vector<1x128xf32>
    %201 = arith.addf %156, %200 : vector<1x128xf32>
    %cst_54 = arith.constant 0.000000e+00 : f32
    %202 = vector.broadcast %cst_54 : f32 to vector<8x128xf32>
    %c0_55 = arith.constant 0 : index
    %c0_56 = arith.constant 0 : index
    %203 = vector.load %arg5[%c0_55, %c0_56] : memref<8x128xf32, #tpu.memory_space<vmem>>, vector<8x128xf32>
    tpu.vector_store %arg5[%c0_55, %c0_56], %202 {strides = array<i32>} : memref<8x128xf32, #tpu.memory_space<vmem>>, vector<8x128xf32>,
    %c0_57 = arith.constant 0 : index
    %c0_58 = arith.constant 0 : index
    %204 = vector.load %arg5[%c0_57, %c0_58] : memref<8x128xf32, #tpu.memory_space<vmem>>, vector<1x128xf32>
    tpu.vector_store %arg5[%c0_57, %c0_58], %198 {strides = array<i32>} : memref<8x128xf32, #tpu.memory_space<vmem>>, vector<1x128xf32>,
    %c1 = arith.constant 1 : index
    %c0_59 = arith.constant 0 : index
    %205 = vector.load %arg5[%c1, %c0_59] : memref<8x128xf32, #tpu.memory_space<vmem>>, vector<1x128xf32>
    tpu.vector_store %arg5[%c1, %c0_59], %201 {strides = array<i32>} : memref<8x128xf32, #tpu.memory_space<vmem>>, vector<1x128xf32>,
    return
  }
  func.func @transform_0(%arg0: i32) -> (i32, i32) {
    %c0_i32 = arith.constant 0 : i32
    %c0_i32_0 = arith.constant 0 : i32
    return %arg0, %c0_i32 : i32, i32
  }
  func.func @transform_1(%arg0: i32) -> (i32, i32) {
    %c0_i32 = arith.constant 0 : i32
    %c0_i32_0 = arith.constant 0 : i32
    return %arg0, %c0_i32 : i32, i32
  }
  func.func @transform_2(%arg0: i32) -> (i32, i32) {
    %c0_i32 = arith.constant 0 : i32
    %c0_i32_0 = arith.constant 0 : i32
    %c0_i32_1 = arith.constant 0 : i32
    return %c0_i32, %c0_i32_0 : i32, i32
  }
  func.func @transform_3(%arg0: i32) -> (i32, i32) {
    %c0_i32 = arith.constant 0 : i32
    %c0_i32_0 = arith.constant 0 : i32
    %c0_i32_1 = arith.constant 0 : i32
    return %c0_i32, %c0_i32_0 : i32, i32
  }
  func.func @transform_4(%arg0: i32) -> (i32, i32) {
    %c0_i32 = arith.constant 0 : i32
    %c0_i32_0 = arith.constant 0 : i32
    return %arg0, %c0_i32 : i32, i32
  }
}

</mosaic_0001>

<bundles_post_ra>
// kernel: audio_distance.2
= control target key start
LH: loop header
LB: loop body
LE: loop exit
PB: predicated region body
PF: predicated region fallthrough
CT: control target
= control target key end

     0   :  { %s2546_s15 = smov 0   ;;  %s3512_s0 = inlined_call_operand.vmem [shape: bf16[96,128], index: 0, kind: input, shape index: {}]   ;;  %s3513_s1 = inlined_call_operand.vmem [shape: bf16[96,128], index: 1, kind: input, shape index: {}]   ;;  %s3514_s2 = inlined_call_operand.vmem [shape: bf16[128,1024], index: 2, kind: input, shape index: {}]   ;;  %s3515_s3 = inlined_call_operand.vmem [shape: bf16[128,128], index: 3, kind: input, shape index: {}]   ;;  %s3516_s4 = inlined_call_operand.vmem [shape: f32[32,128], index: 4, kind: output, shape index: {}]  }
   0x1 LB: > { %s2552_s16 = sadd.s32 4294967295, %s2517_s15   ;;  %p2071_p0 = scmp.ge.s32.totalorder %s2517_s15, 1  ;;  %s2517_s15 = sphi %s2546_s15, %s14_s15  }
   0x2   : > { %p174_p1 = scmp.lt.s32.totalorder %s2517_s15, 5 }
   0x4   : > { %p175_p2 = pnand %p2071_p0, %p174_p1 }
   0x6   : > { %178 = sbr.rel (%p175_p2) target bundleno = 716 (0x2cc), region = 36 }
   0xd   : > { %v221_v0 = vld [vmem:[%s3514_s2] sm:$0xff]  ;;  %s204_s23 = smul.u32 3, %s2552_s16  ;;  %v3517_v6 = vmov 0   ;;  %v222_v10 = vld [vmem:[%s3514_s2 + $0x8] sm:$0xff]  ;;  %v223_v57 = vld [vmem:[%s3514_s2 + $0x10] sm:$0xff]  ;;  %p216_p4 = scmp.lt.s32.totalorder %s2552_s16, 3 }
   0xe   : > { %v225_v1 = vld [vmem:[%s3514_s2 + $0x20] sm:$0xff]  ;;  %666 = vmatprep.mubr.bf16.mxu0 %v3517_v6  ;;  %717 = vmatprep.mubr.bf16.mxu1 %v3517_v6  ;;  %v226_v11 = vld [vmem:[%s3514_s2 + $0x28] sm:$0xff]  ;;  %v227_v58 = vld [vmem:[%s3514_s2 + $0x30] sm:$0xff] }
   0xf   : > { %v229_v2 = vld [vmem:[%s3514_s2 + $0x40] sm:$0xff]  ;;  %v2566_v3 = vcombine.high %v221_v0, %v225_v1  ;;  %v2568_v4 = vcombine.low %v221_v0, %v225_v1  ;;  %p205_p3 = scmp.lt.s32.totalorder %s204_s23, 11  ;;  %v2593_v13 = vcombine.high %v222_v10, %v226_v11  ;;  %v2595_v14 = vcombine.low %v222_v10, %v226_v11  ;;  %v230_v15 = vld [vmem:[%s3514_s2 + $0x48] sm:$0xff]  ;;  %v231_v1 = vld [vmem:[%s3514_s2 + $0x50] sm:$0xff]  ;;  %s3547_s16 = smov (!%p216_p4, %s2552_s16), 3 }
  0x10   : > { %v233_v5 = vld [vmem:[%s3514_s2 + $0x60] sm:$0xff]  ;;  %v234_v18 = vld [vmem:[%s3514_s2 + $0x68] sm:$0xff]  ;;  %v228_v10 = vld [vmem:[%s3514_s2 + $0x38] sm:$0xff]  ;;  %s2074_s6 = sshll.u32 %s3547_s16, 3 }
  0x11   : > { %v2575_v7 = vcombine.high %v229_v2, %v233_v5  ;;  %v237_v8 = vld [vmem:[%s3514_s2 + $0x80] sm:$0xff]  ;;  %634 = vmatprep.subr.bf16.mxu0 %v2566_v3  ;;  %v2591_v12 = vcombine.low %v229_v2, %v233_v5  ;;  %s3545_s23 = smov (!%p205_p3, %s204_s23), 11  ;;  %685 = vmatprep.subr.bf16.mxu1 %v2593_v13  ;;  %v2615_v20 = vcombine.high %v230_v15, %v234_v18  ;;  %v238_v21 = vld [vmem:[%s3514_s2 + $0x88] sm:$0xff]  ;;  %v235_v2 = vld [vmem:[%s3514_s2 + $0x70] sm:$0xff]  ;;  %s3372_s9 = scalar_lea.vmem %s3516_s4, %s2074_s6 }
  0x12   : > { %v241_v9 = vld [vmem:[%s3514_s2 + $0xa0] sm:$0xff]  ;;  %635 = vmatpush1.bf16.msra.mxu0 %v2568_v4  ;;  %v242_v22 = vld [vmem:[%s3514_s2 + $0xa8] sm:$0xff]  ;;  %s2072_s22 = sshll.u32 %s3545_s23, 2  ;;  %686 = vmatpush1.bf16.msra.mxu1 %v2595_v14  ;;  %v2625_v23 = vcombine.low %v230_v15, %v234_v18  ;;  %v2793_v18 = vcombine.high %v231_v1, %v235_v2 }
  0x13   : > { %636 = vmatprep.subr.bf16.mxu0 %v2575_v7  ;;  %v2603_v16 = vcombine.high %v237_v8, %v241_v9  ;;  %v245_v17 = vld [vmem:[%s3514_s2 + $0xc0] sm:$0xff]  ;;  %s2632_s26 = scalar_lea.vmem %s3512_s0, %s2072_s22  ;;  %v2635_v24 = vcombine.low %v237_v8, %v241_v9  ;;  %687 = vmatprep.subr.bf16.mxu1 %v2615_v20  ;;  %v2638_v25 = vcombine.high %v238_v21, %v242_v22  ;;  %v246_v27 = vld [vmem:[%s3514_s2 + $0xc8] sm:$0xff]  ;;  %s2732_s14 = scalar_lea.vmem %s3513_s1, %s2072_s22  ;;  %v224_v9 = vld [vmem:[%s3514_s2 + $0x18] sm:$0xff] }
  0x14   : > { %v249_v19 = vld [vmem:[%s3514_s2 + $0xe0] sm:$0xff]  ;;  %v250_v28 = vld [vmem:[%s3514_s2 + $0xe8] sm:$0xff]  ;;  %v2656_v31 = vcombine.low %v238_v21, %v242_v22  ;;  %v2774_v8 = vcombine.high %v223_v57, %v227_v58  ;;  %v232_v21 = vld [vmem:[%s3514_s2 + $0x58] sm:$0xff] }
  0x15   : > { %v2641_v26 = vcombine.high %v245_v17, %v249_v19  ;;  %v253_v29 = vld [vmem:[%s3514_s2 + $0x100] sm:$0xff]  ;;  %v2659_v32 = vcombine.low %v245_v17, %v249_v19  ;;  %v2662_v33 = vcombine.high %v246_v27, %v250_v28  ;;  %v254_v35 = vld [vmem:[%s3514_s2 + $0x108] sm:$0xff]  ;;  %v2680_v39 = vcombine.low %v246_v27, %v250_v28  ;;  %v236_v22 = vld [vmem:[%s3514_s2 + $0x78] sm:$0xff] }
  0x16   : > { %637 = vmatpush1.bf16.msra.mxu0 %v2591_v12  ;;  %v257_v30 = vld [vmem:[%s3514_s2 + $0x120] sm:$0xff]  ;;  %688 = vmatpush1.bf16.msra.mxu1 %v2625_v23  ;;  %v258_v36 = vld [vmem:[%s3514_s2 + $0x128] sm:$0xff]  ;;  %v2789_v17 = vcombine.low %v223_v57, %v227_v58  ;;  %v2795_v19 = vcombine.high %v224_v9, %v228_v10  ;;  %v239_v27 = vld [vmem:[%s3514_s2 + $0x90] sm:$0xff] }
  0x17   : > { %638 = vmatprep.subr.bf16.mxu0 %v2603_v16  ;;  %689 = vmatprep.subr.bf16.mxu1 %v2638_v25  ;;  %v2665_v34 = vcombine.high %v253_v29, %v257_v30  ;;  %v261_v37 = vld [vmem:[%s3514_s2 + $0x140] sm:$0xff]  ;;  %v2683_v40 = vcombine.low %v253_v29, %v257_v30  ;;  %v2686_v41 = vcombine.high %v254_v35, %v258_v36  ;;  %v262_v43 = vld [vmem:[%s3514_s2 + $0x148] sm:$0xff]  ;;  %v243_v28 = vld [vmem:[%s3514_s2 + $0xb0] sm:$0xff] }
  0x18   : > { %v265_v38 = vld [vmem:[%s3514_s2 + $0x160] sm:$0xff]  ;;  %v266_v44 = vld [vmem:[%s3514_s2 + $0x168] sm:$0xff]  ;;  %v2704_v47 = vcombine.low %v254_v35, %v258_v36  ;;  %v2811_v29 = vcombine.low %v224_v9, %v228_v10  ;;  %v2814_v30 = vcombine.low %v231_v1, %v235_v2  ;;  %v2817_v35 = vcombine.high %v232_v21, %v236_v22  ;;  %v252_v57 = vld [vmem:[%s3514_s2 + $0xf8] sm:$0xff] }
  0x19   : > { %v2689_v42 = vcombine.high %v261_v37, %v265_v38  ;;  %v269_v45 = vld [vmem:[%s3514_s2 + $0x180] sm:$0xff]  ;;  %v2707_v48 = vcombine.low %v261_v37, %v265_v38  ;;  %v2710_v49 = vcombine.high %v262_v43, %v266_v44  ;;  %v270_v51 = vld [vmem:[%s3514_s2 + $0x188] sm:$0xff]  ;;  %v2735_v55 = vcombine.low %v262_v43, %v266_v44  ;;  %v240_v37 = vld [vmem:[%s3514_s2 + $0x98] sm:$0xff] }
  0x1a   : > { %639 = vmatpush1.bf16.msra.mxu0 %v2635_v24  ;;  %690 = vmatpush1.bf16.msra.mxu1 %v2656_v31  ;;  %v273_v46 = vld [vmem:[%s3514_s2 + $0x1a0] sm:$0xff]  ;;  %v274_v52 = vld [vmem:[%s3514_s2 + $0x1a8] sm:$0xff]  ;;  %v2820_v36 = vcombine.high %v239_v27, %v243_v28  ;;  %v244_v38 = vld [vmem:[%s3514_s2 + $0xb8] sm:$0xff] }
  0x1b   : > { %640 = vmatprep.subr.bf16.mxu0 %v2641_v26  ;;  %691 = vmatprep.subr.bf16.mxu1 %v2662_v33  ;;  %v2713_v50 = vcombine.high %v269_v45, %v273_v46  ;;  %v277_v53 = vld [vmem:[%s3514_s2 + $0x1c0] sm:$0xff]  ;;  %v2738_v56 = vcombine.low %v269_v45, %v273_v46  ;;  %v2747_v59 = vcombine.high %v270_v51, %v274_v52  ;;  %v278_v60 = vld [vmem:[%s3514_s2 + $0x1c8] sm:$0xff]  ;;  %v247_v43 = vld [vmem:[%s3514_s2 + $0xd0] sm:$0xff] }
  0x1c   : > { %v281_v54 = vld [vmem:[%s3514_s2 + $0x1e0] sm:$0xff]  ;;  %v282_v62 = vld [vmem:[%s3514_s2 + $0x1e8] sm:$0xff]  ;;  %v2759_v63 = vcombine.low %v270_v51, %v274_v52  ;;  %v251_v44 = vld [vmem:[%s3514_s2 + $0xf0] sm:$0xff]  ;;  %v2840_v46 = vcombine.low %v232_v21, %v236_v22  ;;  %v2844_v51 = vcombine.low %v239_v27, %v243_v28  ;;  %v2847_v52 = vcombine.high %v240_v37, %v244_v38 }
  0x1d   : > { %v2753_v61 = vcombine.high %v277_v53, %v281_v54  ;;  %v2762_v0 = vcombine.low %v277_v53, %v281_v54  ;;  %v2771_v5 = vcombine.high %v278_v60, %v282_v62  ;;  %v2783_v11 = vld [vmem:[%s2632_s26] sm:$0xff]   ;;  %v2786_v15 = vcombine.low %v278_v60, %v282_v62  ;;  %v2837_v45 = vld [vmem:[%s2632_s26 + $0x8] ss:$0 sps:$4 sm:$0xff]   ;;  %v248_v54 = vld [vmem:[%s3514_s2 + $0xd8] sm:$0xff] }
  0x1e   : > { %641 = vmatpush1.bf16.msra.mxu0 %v2659_v32  ;;  %692 = vmatpush1.bf16.msra.mxu1 %v2680_v39  ;;  %v2850_v53 = vcombine.high %v247_v43, %v251_v44  ;;  %v255_v58 = vld [vmem:[%s3514_s2 + $0x110] sm:$0xff]  ;;  %v2866_v62 = vcombine.low %v240_v37, %v244_v38  ;;  %v2869_v1 = vcombine.low %v247_v43, %v251_v44  ;;  %v256_v10 = vld [vmem:[%s3514_s2 + $0x118] sm:$0xff] }
  0x1f   : > { %642 = vmatprep.subr.bf16.mxu0 %v2665_v34  ;;  %693 = vmatprep.subr.bf16.mxu1 %v2686_v41  ;;  %v259_v60 = vld [vmem:[%s3514_s2 + $0x130] sm:$0xff]  ;;  %v2872_v2 = vcombine.high %v248_v54, %v252_v57  ;;  %v260_v21 = vld [vmem:[%s3514_s2 + $0x138] sm:$0xff]  ;;  %v2892_v28 = vcombine.low %v248_v54, %v252_v57 }
  0x20   : > { %3527 = vst [vmem:[#allocation2_spill] sm:$0xff] %v2869_v1  ;;  %v2875_v9 = vcombine.high %v255_v58, %v259_v60  ;;  %v263_v22 = vld [vmem:[%s3514_s2 + $0x150] sm:$0xff]  ;;  %v2896_v37 = vcombine.low %v255_v58, %v259_v60  ;;  %v2899_v38 = vcombine.high %v256_v10, %v260_v21  ;;  %v264_v44 = vld [vmem:[%s3514_s2 + $0x158] sm:$0xff]  ;;  %v2917_v60 = vcombine.low %v256_v10, %v260_v21 }
  0x21   : > { %3528 = vst [vmem:[#allocation3_spill] sm:$0xff] %v2872_v2  ;;  %v267_v27 = vld [vmem:[%s3514_s2 + $0x170] sm:$0xff]  ;;  %3530 = vst [vmem:[#allocation5_spill] sm:$0xff] %v2892_v28  ;;  %v268_v54 = vld [vmem:[%s3514_s2 + $0x178] sm:$0xff] }
  0x22   : > { %643 = vmatpush1.bf16.msra.mxu0 %v2683_v40  ;;  %694 = vmatpush1.bf16.msra.mxu1 %v2704_v47  ;;  %3529 = vst [vmem:[#allocation4_spill] sm:$0xff] %v2875_v9  ;;  %3531 = vst [vmem:[#allocation6_spill] sm:$0xff] %v2896_v37  ;;  %v2902_v43 = vcombine.high %v263_v22, %v267_v27  ;;  %v271_v57 = vld [vmem:[%s3514_s2 + $0x190] sm:$0xff]  ;;  %v276_v10 = vld [vmem:[%s3514_s2 + $0x1b8] sm:$0xff] }
  0x23   : > { %644 = vmatprep.subr.bf16.mxu0 %v2689_v42  ;;  %695 = vmatprep.subr.bf16.mxu1 %v2710_v49  ;;  %3532 = vst [vmem:[#allocation7_spill] sm:$0xff] %v2899_v38  ;;  %v275_v58 = vld [vmem:[%s3514_s2 + $0x1b0] sm:$0xff] }
  0x24   : > { %3533 = vst [vmem:[#allocation8_spill] sm:$0xff] %v2902_v43  ;;  %v279_v21 = vld [vmem:[%s3514_s2 + $0x1d0] sm:$0xff] }
  0x26   : > { %645 = vmatpush1.bf16.msra.mxu0 %v2707_v48  ;;  %696 = vmatpush1.bf16.msra.mxu1 %v2735_v55 }
  0x27   : > { %646 = vmatprep.subr.bf16.mxu0 %v2713_v50  ;;  %697 = vmatprep.subr.bf16.mxu1 %v2747_v59 }
  0x2a   : > { %647 = vmatpush1.bf16.msra.mxu0 %v2738_v56  ;;  %698 = vmatpush1.bf16.msra.mxu1 %v2759_v63 }
  0x2b   : > { %648 = vmatprep.subr.bf16.mxu0 %v2753_v61  ;;  %699 = vmatprep.subr.bf16.mxu1 %v2771_v5 }
  0x2e   : > { %649 = vmatpush1.bf16.msra.mxu0 %v2762_v0  ;;  %700 = vmatpush1.bf16.msra.mxu1 %v2786_v15 }
  0x2f   : > { %736 = vmatprep.subr.bf16.mxu0 %v2774_v8  ;;  %787 = vmatprep.subr.bf16.mxu1 %v2795_v19 }
  0x31   : > { %667 = vmatmul.mubr.bf16.vlgmr.msra.gmra.mrb[0].mxu0 %v2783_v11  ;;  %718 = vmatmul.mubr.bf16.vlgmr.msra.gmra.mrb[0].mxu1 %v2783_v11 }
  0x32   : > { %737 = vmatpush1.bf16.msra.mxu0 %v2789_v17  ;;  %676 = vmatprep.mubr.bf16.mxu0 %v3517_v6 }
  0x33   : > { %738 = vmatprep.subr.bf16.mxu0 %v2793_v18  ;;  %788 = vmatpush1.bf16.msra.mxu1 %v2811_v29 }
  0x34   : > { %727 = vmatprep.mubr.bf16.mxu1 %v3517_v6  ;;  %789 = vmatprep.subr.bf16.mxu1 %v2817_v35 }
  0x36   : > { %739 = vmatpush1.bf16.msra.mxu0 %v2814_v30 }
  0x37   : > { %740 = vmatprep.subr.bf16.mxu0 %v2820_v36  ;;  %790 = vmatpush1.bf16.msra.mxu1 %v2840_v46 }
  0x38   : > { %791 = vmatprep.subr.bf16.mxu1 %v2847_v52 }
  0x39   : > { %677 = vmatmul.mubr.bf16.gmra.mrb[4].mxu0 %v2837_v45  ;;  %728 = vmatmul.mubr.bf16.gmra.mrb[4].mxu1 %v2837_v45 }
  0x3a   : > { %741 = vmatpush1.bf16.msra.mxu0 %v2844_v51  ;;  %768 = vmatprep.mubr.bf16.mxu0 %v3517_v6 }
  0x3b   : > { %742 = vmatprep.subr.bf16.mxu0 %v2850_v53  ;;  %792 = vmatpush1.bf16.msra.mxu1 %v2866_v62 }
  0x3c   : > { %819 = vmatprep.mubr.bf16.mxu1 %v3517_v6  ;;  %793 = vmatprep.subr.bf16.mxu1 %v2872_v2  ;;  %v2920_v6 = vcombine.low %v263_v22, %v267_v27  ;;  %v2926_v2 = vcombine.high %v271_v57, %v275_v58  ;;  %v283_v22 = vld [vmem:[%s3514_s2 + $0x1f0] sm:$0xff]  ;;  %v2941_v27 = vcombine.low %v264_v44, %v268_v54 }
  0x3e   : > { %743 = vmatpush1.bf16.msra.mxu0 %v2869_v1  ;;  %3534 = vst [vmem:[#allocation9_spill] sm:$0xff] %v2926_v2  ;;  %v272_v1 = vld [vmem:[%s3514_s2 + $0x198] sm:$0xff] }
  0x3f   : > { %744 = vmatprep.subr.bf16.mxu0 %v2875_v9  ;;  %794 = vmatpush1.bf16.msra.mxu1 %v2892_v28  ;;  %v2923_v9 = vcombine.high %v264_v44, %v268_v54  ;;  %v280_v28 = vld [vmem:[%s3514_s2 + $0x1d8] sm:$0xff]  ;;  %v2959_v54 = vcombine.low %v272_v1, %v276_v10 }
  0x40   : > { %795 = vmatprep.subr.bf16.mxu1 %v2899_v38  ;;  %v2947_v38 = vcombine.high %v272_v1, %v276_v10  ;;  %v284_v44 = vld [vmem:[%s3514_s2 + $0x1f8] sm:$0xff]  ;;  %v3535_v1 = vmov 0  }
  0x42   : > { %745 = vmatpush1.bf16.msra.mxu0 %v2896_v37  ;;  %v2950_v37 = vcombine.high %v279_v21, %v283_v22 }
  0x43   : > { %746 = vmatprep.subr.bf16.mxu0 %v2902_v43  ;;  %796 = vmatpush1.bf16.msra.mxu1 %v2917_v60  ;;  %v2944_v43 = vcombine.low %v271_v57, %v275_v58  ;;  %v2962_v57 = vcombine.low %v279_v21, %v283_v22  ;;  %v2965_v58 = vcombine.high %v280_v28, %v284_v44 }
  0x44   : > { %797 = vmatprep.subr.bf16.mxu1 %v2923_v9 }
  0x46   : > { %747 = vmatpush1.bf16.msra.mxu0 %v2920_v6 }
  0x47   : > { %748 = vmatprep.subr.bf16.mxu0 %v2926_v2  ;;  %798 = vmatpush1.bf16.msra.mxu1 %v2941_v27  ;;  %v2969_v2 = vcombine.low %v280_v28, %v284_v44 }
  0x48   : > { %799 = vmatprep.subr.bf16.mxu1 %v2947_v38 }
  0x4a   : > { %749 = vmatpush1.bf16.msra.mxu0 %v2944_v43 }
  0x4b   : > { %750 = vmatprep.subr.bf16.mxu0 %v2950_v37  ;;  %800 = vmatpush1.bf16.msra.mxu1 %v2959_v54 }
  0x4c   : > { %801 = vmatprep.subr.bf16.mxu1 %v2965_v58 }
  0x4e   : > { %751 = vmatpush1.bf16.msra.mxu0 %v2962_v57 }
  0x4f   : > { %851 = vmatprep.subr.bf16.mxu0 %v2566_v3  ;;  %802 = vmatpush1.bf16.msra.mxu1 %v2969_v2  ;;  %v2405_v3 = vld [vmem:[%s2732_s14] sm:$0xff]  }
  0x50   : > { %902 = vmatprep.subr.bf16.mxu1 %v2593_v13  ;;  %v3538_v13 = vld [vmem:[#allocation4_spill] sm:$0xff] }
  0x51   : > { %769 = vmatmul.mubr.bf16.vlgmr.msra.gmra.mrb[8].mxu0 %v2783_v11 }
  0x52   : > { %852 = vmatpush1.bf16.msra.mxu0 %v2568_v4  ;;  %778 = vmatprep.mubr.bf16.mxu0 %v3535_v1  ;;  %v2406_v4 = vld [vmem:[%s2732_s14 + $0x8] ss:$0 sps:$4 sm:$0xff]  }
  0x53   : > { %853 = vmatprep.subr.bf16.mxu0 %v2575_v7  ;;  %820 = vmatmul.mubr.bf16.vlgmr.msra.gmra.mrb[8].mxu1 %v2783_v11  ;;  %v3536_v7 = vld [vmem:[#allocation2_spill] sm:$0xff] }
  0x54   : > { %903 = vmatpush1.bf16.msra.mxu1 %v2595_v14  ;;  %829 = vmatprep.mubr.bf16.mxu1 %v3535_v1  ;;  %v3539_v14 = vld [vmem:[#allocation5_spill] sm:$0xff] }
  0x55   : > { %904 = vmatprep.subr.bf16.mxu1 %v2615_v20  ;;  %v3541_v20 = vld [vmem:[#allocation7_spill] sm:$0xff] }
  0x56   : > { %854 = vmatpush1.bf16.msra.mxu0 %v2591_v12  ;;  %v3537_v12 = vld [vmem:[#allocation3_spill] sm:$0xff] }
  0x57   : > { %855 = vmatprep.subr.bf16.mxu0 %v2603_v16  ;;  %v3540_v16 = vld [vmem:[#allocation6_spill] sm:$0xff] }
  0x58   : > { %905 = vmatpush1.bf16.msra.mxu1 %v2625_v23  ;;  %v3542_v23 = vld [vmem:[#allocation8_spill] sm:$0xff] }
  0x59   : > { %779 = vmatmul.mubr.bf16.gmra.mrb[12].mxu0 %v2837_v45  ;;  %906 = vmatprep.subr.bf16.mxu1 %v2638_v25  ;;  %v3051_v25 = vld [vmem:[%s3515_s3] sm:$0xff]  }
  0x5a   : > { %856 = vmatpush1.bf16.msra.mxu0 %v2635_v24  ;;  %883 = vmatprep.mubr.bf16.mxu0 %v3535_v1  ;;  %v3543_v24 = vld [vmem:[#allocation9_spill] sm:$0xff] }
  0x5b   : > { %857 = vmatprep.subr.bf16.mxu0 %v2641_v26  ;;  %830 = vmatmul.mubr.bf16.gmra.mrb[12].mxu1 %v2837_v45  ;;  %v3069_v26 = vld [vmem:[%s3515_s3 + $0x10] sm:$0xff]  }
  0x5c   : > { %907 = vmatpush1.bf16.msra.mxu1 %v2656_v31  ;;  %934 = vmatprep.mubr.bf16.mxu1 %v3535_v1  ;;  %v3080_v31 = vld [vmem:[%s3515_s3 + $0x18] sm:$0xff]  }
  0x5d   : > { %908 = vmatprep.subr.bf16.mxu1 %v2662_v33  ;;  %v3098_v33 = vld [vmem:[%s3515_s3 + $0x28] sm:$0xff]  }
  0x5e   : > { %858 = vmatpush1.bf16.msra.mxu0 %v2659_v32  ;;  %v3089_v32 = vld [vmem:[%s3515_s3 + $0x20] sm:$0xff]  }
  0x5f   : > { %859 = vmatprep.subr.bf16.mxu0 %v2665_v34  ;;  %v3107_v34 = vld [vmem:[%s3515_s3 + $0x30] sm:$0xff]  }
  0x60   : > { %909 = vmatpush1.bf16.msra.mxu1 %v2680_v39  ;;  %v3116_v39 = vld [vmem:[%s3515_s3 + $0x38] sm:$0xff]  }
  0x61   : > { %910 = vmatprep.subr.bf16.mxu1 %v2686_v41 }
  0x62   : > { %860 = vmatpush1.bf16.msra.mxu0 %v2683_v40 }
  0x63   : > { %861 = vmatprep.subr.bf16.mxu0 %v2689_v42 }
  0x64   : > { %911 = vmatpush1.bf16.msra.mxu1 %v2704_v47 }
  0x65   : > { %912 = vmatprep.subr.bf16.mxu1 %v2710_v49 }
  0x66   : > { %862 = vmatpush1.bf16.msra.mxu0 %v2707_v48 }
  0x67   : > { %863 = vmatprep.subr.bf16.mxu0 %v2713_v50 }
  0x68   : > { %913 = vmatpush1.bf16.msra.mxu1 %v2735_v55 }
  0x69   : > { %914 = vmatprep.subr.bf16.mxu1 %v2747_v59 }
  0x6a   : > { %864 = vmatpush1.bf16.msra.mxu0 %v2738_v56 }
  0x6b   : > { %865 = vmatprep.subr.bf16.mxu0 %v2753_v61 }
  0x6c   : > { %915 = vmatpush1.bf16.msra.mxu1 %v2759_v63 }
  0x6d   : > { %916 = vmatprep.subr.bf16.mxu1 %v2771_v5 }
  0x6e   : > { %866 = vmatpush1.bf16.msra.mxu0 %v2762_v0 }
  0x6f   : > { %953 = vmatprep.subr.bf16.mxu0 %v2774_v8 }
  0x70   : > { %917 = vmatpush1.bf16.msra.mxu1 %v2786_v15 }
  0x71   : > { %884 = vmatmul.mubr.bf16.vlgmr.msra.gmra.mrb[16].mxu0 %v2405_v3  ;;  %1004 = vmatprep.subr.bf16.mxu1 %v2795_v19 }
  0x72   : > { %893 = vmatprep.mubr.bf16.mxu0 %v3535_v1  ;;  %954 = vmatpush1.bf16.msra.mxu0 %v2789_v17 }
  0x73   : > { %955 = vmatprep.subr.bf16.mxu0 %v2793_v18  ;;  %935 = vmatmul.mubr.bf16.vlgmr.msra.gmra.mrb[16].mxu1 %v2405_v3 }
  0x74   : > { %944 = vmatprep.mubr.bf16.mxu1 %v3535_v1  ;;  %1005 = vmatpush1.bf16.msra.mxu1 %v2811_v29 }
  0x75   : > { %1006 = vmatprep.subr.bf16.mxu1 %v2817_v35 }
  0x76   : > { %956 = vmatpush1.bf16.msra.mxu0 %v2814_v30 }
  0x77   : > { %957 = vmatprep.subr.bf16.mxu0 %v2820_v36 }
  0x78   : > { %1007 = vmatpush1.bf16.msra.mxu1 %v2840_v46 }
  0x79   : > { %894 = vmatmul.mubr.bf16.gmra.mrb[20].mxu0 %v2406_v4  ;;  %1008 = vmatprep.subr.bf16.mxu1 %v2847_v52 }
  0x7a   : > { %958 = vmatpush1.bf16.msra.mxu0 %v2844_v51  ;;  %985 = vmatprep.mubr.bf16.mxu0 %v3535_v1 }
  0x7b   : > { %959 = vmatprep.subr.bf16.mxu0 %v2850_v53  ;;  %945 = vmatmul.mubr.bf16.gmra.mrb[20].mxu1 %v2406_v4 }
  0x7c   : > { %1009 = vmatpush1.bf16.msra.mxu1 %v2866_v62  ;;  %1036 = vmatprep.mubr.bf16.mxu1 %v3535_v1 }
  0x7d   : > { %1010 = vmatprep.subr.bf16.mxu1 %v3537_v12 }
  0x7e   : > { %960 = vmatpush1.bf16.msra.mxu0 %v3536_v7 }
  0x7f   : > { %961 = vmatprep.subr.bf16.mxu0 %v3538_v13 }
  0x80   : > { %1011 = vmatpush1.bf16.msra.mxu1 %v3539_v14 }
  0x81   : > { %1012 = vmatprep.subr.bf16.mxu1 %v3541_v20 }
  0x82   : > { %962 = vmatpush1.bf16.msra.mxu0 %v3540_v16 }
  0x83   : > { %963 = vmatprep.subr.bf16.mxu0 %v3542_v23 }
  0x84   : > { %1013 = vmatpush1.bf16.msra.mxu1 %v2917_v60 }
  0x85   : > { %1014 = vmatprep.subr.bf16.mxu1 %v2923_v9 }
  0x86   : > { %964 = vmatpush1.bf16.msra.mxu0 %v2920_v6  ;;  %v3060_v6 = vld [vmem:[%s3515_s3 + $0x8] sm:$0xff]  }
  0x87   : > { %965 = vmatprep.subr.bf16.mxu0 %v3543_v24 }
  0x88   : > { %1015 = vmatpush1.bf16.msra.mxu1 %v2941_v27 }
  0x89   : > { %1016 = vmatprep.subr.bf16.mxu1 %v2947_v38 }
  0x8a   : > { %966 = vmatpush1.bf16.msra.mxu0 %v2944_v43 }
  0x8b   : > { %967 = vmatprep.subr.bf16.mxu0 %v2950_v37 }
  0x8c   : > { %1017 = vmatpush1.bf16.msra.mxu1 %v2959_v54 }
  0x8d   : > { %1018 = vmatprep.subr.bf16.mxu1 %v2965_v58 }
  0x8e   : > { %968 = vmatpush1.bf16.msra.mxu0 %v2962_v57 }
  0x8f   : > { %2233 = vmatprep.subr.bf16.mxu0 %v3051_v25 }
  0x90   : > { %1019 = vmatpush1.bf16.msra.mxu1 %v2969_v2 }
  0x91   : > { %986 = vmatmul.mubr.bf16.vlgmr.msra.gmra.mrb[24].mxu0 %v2405_v3  ;;  %2253 = vmatprep.subr.bf16.mxu1 %v3051_v25 }
  0x92   : > { %995 = vmatprep.mubr.bf16.mxu0 %v3535_v1  ;;  %2234 = vmatpush3.bf16.msra.mxu0 %v3051_v25 }
  0x93   : > { %2235 = vmatprep.subr.bf16.mxu0 %v3060_v6  ;;  %1037 = vmatmul.mubr.bf16.vlgmr.msra.gmra.mrb[24].mxu1 %v2405_v3 }
  0x94   : > { %1046 = vmatprep.mubr.bf16.mxu1 %v3535_v1  ;;  %2254 = vmatpush3.bf16.msra.mxu1 %v3051_v25 }
  0x95   : > { %2255 = vmatprep.subr.bf16.mxu1 %v3060_v6 }
  0x96   : > { %2236 = vmatpush3.bf16.msra.mxu0 %v3060_v6 }
  0x97   : > { %2237 = vmatprep.subr.bf16.mxu0 %v3069_v26 }
  0x98   : > { %2256 = vmatpush3.bf16.msra.mxu1 %v3060_v6 }
  0x99   : > { %996 = vmatmul.mubr.bf16.gmra.mrb[28].mxu0 %v2406_v4  ;;  %2257 = vmatprep.subr.bf16.mxu1 %v3069_v26 }
  0x9a   : > { %2238 = vmatpush3.bf16.msra.mxu0 %v3069_v26 }
  0x9b   : > { %2239 = vmatprep.subr.bf16.mxu0 %v3080_v31  ;;  %1047 = vmatmul.mubr.bf16.gmra.mrb[28].mxu1 %v2406_v4 }
  0x9c   : > { %2258 = vmatpush3.bf16.msra.mxu1 %v3069_v26 }
  0x9d   : > { %2259 = vmatprep.subr.bf16.mxu1 %v3080_v31 }
  0x9e   : > { %2240 = vmatpush3.bf16.msra.mxu0 %v3080_v31 }
  0x9f   : > { %2241 = vmatprep.subr.bf16.mxu0 %v3089_v32 }
  0xa0   : > { %2260 = vmatpush3.bf16.msra.mxu1 %v3080_v31 }
  0xa1   : > { %2261 = vmatprep.subr.bf16.mxu1 %v3089_v32 }
  0xa2   : > { %2242 = vmatpush3.bf16.msra.mxu0 %v3089_v32 }
  0xa3   : > { %2243 = vmatprep.subr.bf16.mxu0 %v3098_v33 }
  0xa4   : > { %2262 = vmatpush3.bf16.msra.mxu1 %v3089_v32 }
  0xa5   : > { %2263 = vmatprep.subr.bf16.mxu1 %v3098_v33 }
  0xa6   : > { %2244 = vmatpush3.bf16.msra.mxu0 %v3098_v33 }
  0xa7   : > { %2245 = vmatprep.subr.bf16.mxu0 %v3107_v34 }
  0xa8   : > { %2264 = vmatpush3.bf16.msra.mxu1 %v3098_v33 }
  0xa9   : > { %2265 = vmatprep.subr.bf16.mxu1 %v3107_v34 }
  0xaa   : > { %2246 = vmatpush3.bf16.msra.mxu0 %v3107_v34 }
  0xab   : > { %2247 = vmatprep.subr.bf16.mxu0 %v3116_v39 }
  0xac   : > { %2266 = vmatpush3.bf16.msra.mxu1 %v3107_v34 }
  0xad   : > { %2267 = vmatprep.subr.bf16.mxu1 %v3116_v39 }
  0xae   : > { %2248 = vmatpush3.bf16.msra.mxu0 %v3116_v39 }
  0xaf   : > { %2273 = vmatprep.subr.bf16.mxu0 %v3051_v25 }
  0xb0   : > { %2268 = vmatpush3.bf16.msra.mxu1 %v3116_v39 }
  0xb1   : > { %2293 = vmatprep.subr.bf16.mxu1 %v3051_v25 }
 0x104   : > { %v668_v40 = vpop.f32.mrb[0].mxu0  ;;  %v719_v55 = vpop.f32.mrb[0].mxu1 }
 0x105   : > { %v1059_v41 = vmul.f32 %v668_v40, %v668_v40  ;;  %v670_v42 = vpop.f32.mrb[1].mxu0  ;;  %v1330_v61 = vmul.f32 %v719_v55, %v719_v55  ;;  %v721_v63 = vpop.f32.mrb[1].mxu1 }
 0x106   : > { %v1062_v47 = vmul.f32 %v670_v42, %v670_v42  ;;  %v672_v48 = vpop.f32.mrb[2].mxu0  ;;  %v1333_v0 = vmul.f32 %v721_v63, %v721_v63  ;;  %v723_v5 = vpop.f32.mrb[2].mxu1 }
 0x107   : > { %v1060_v49 = vmul.f32 %v672_v48, %v672_v48  ;;  %v674_v50 = vpop.f32.mrb[3].mxu0  ;;  %v1331_v11 = vmul.f32 %v723_v5, %v723_v5  ;;  %v725_v15 = vpop.f32.mrb[3].mxu1 }
 0x108   : > { %v1065_v56 = vadd.f32 %v1062_v47, %v1059_v41  ;;  %v1063_v59 = vmul.f32 %v674_v50, %v674_v50  ;;  %v1336_v17 = vadd.f32 %v1333_v0, %v1330_v61  ;;  %v1334_v18 = vmul.f32 %v725_v15, %v725_v15 }
 0x10a   : > { %2415 = vrsqrt.f32 %v1065_v56  ;;  %v1066_v8 = vadd.f32 %v1063_v59, %v1060_v49  ;;  %v1337_v35 = vadd.f32 %v1334_v18, %v1331_v11  ;;  %vm1070_vm0 = vcmp.eq.f32.partialorder %v1065_v56, inf }
 0x10b   : > { %vm1072_vm1 = vcmp.eq.f32.partialorder %v1065_v56, 0.0  ;;  %v1073_v10 = vand.u32 2147483648, %v1065_v56  ;;  %vm1341_vm3 = vcmp.eq.f32.partialorder %v1336_v17, inf  ;;  %v1344_v44 = vand.u32 2147483648, %v1336_v17 }
 0x10c   : > { %2417 = vrsqrt.f32 %v1066_v8  ;;  %v678_v19 = vpop.f32.mrb[4].mxu0  ;;  %v729_v51 = vpop.f32.mrb[4].mxu1  ;;  %vm1077_vm2 = vcmp.eq.f32.partialorder %v1066_v8, inf  ;;  %vm1079_vm4 = vcmp.eq.f32.partialorder %v1066_v8, 0.0  ;;  %v1080_v54 = vand.u32 2147483648, %v1066_v8 }
 0x10d   : > { %v1061_v29 = vmul.f32 %v678_v19, %v678_v19  ;;  %v680_v30 = vpop.f32.mrb[5].mxu0  ;;  %2419 = vrsqrt.f32 %v1336_v17  ;;  %v1332_v53 = vmul.f32 %v729_v51, %v729_v51  ;;  %v731_v62 = vpop.f32.mrb[5].mxu1  ;;  %vm1343_vm5 = vcmp.eq.f32.partialorder %v1336_v17, 0.0 }
 0x10e   : > { %v1064_v36 = vmul.f32 %v680_v30, %v680_v30  ;;  %v682_v45 = vpop.f32.mrb[6].mxu0  ;;  %2421 = vrsqrt.f32 %v1337_v35  ;;  %v1335_v2 = vmul.f32 %v731_v62, %v731_v62  ;;  %v733_v9 = vpop.f32.mrb[6].mxu1  ;;  %vm1348_vm6 = vcmp.eq.f32.partialorder %v1337_v35, inf }
 0x10f   : > { %v683_v46 = vpop.f32.mrb[7].mxu0  ;;  %v734_v28 = vpop.f32.mrb[7].mxu1  ;;  %vm1350_vm7 = vcmp.eq.f32.partialorder %v1337_v35, 0.0  ;;  %v1351_v3 = vand.u32 2147483648, %v1337_v35 }
 0x110   : > { %v1067_v52 = vadd.f32 %v1064_v36, %v1061_v29  ;;  %v3128_v37 = vadd.f32 %v1335_v2, %v1332_v53 }
 0x112   : > { %2423 = vrsqrt.f32 %v1067_v52  ;;  %vm1084_vm8 = vcmp.eq.f32.partialorder %v1067_v52, inf  ;;  %v1087_v23 = vand.u32 2147483648, %v1067_v52  ;;  %vm1086_vm9 = vcmp.eq.f32.partialorder %v1067_v52, 0.0 }
 0x113   : > { %2425 = vrsqrt.f32 %v3128_v37  ;;  %vm1355_vm10 = vcmp.eq.f32.partialorder %v3128_v37, inf  ;;  %vm1357_vm11 = vcmp.eq.f32.partialorder %v3128_v37, 0.0 }
 0x114   : > { %v2416_v38 = vpop.eup %2415 }
 0x115   : > { %v1069_v43 = vmul.f32 %v2416_v38, %v1065_v56 }
 0x116   : > { %v2418_v60 = vpop.eup %2417 }
 0x117   : > { %v2420_v21 = vpop.eup %2419  ;;  %v1071_v22 = vsel %vm1070_vm0, %v1065_v56, %v1069_v43  ;;  %v1076_v27 = vmul.f32 %v2418_v60, %v1066_v8 }
 0x118   : > { %v1340_v57 = vmul.f32 %v2420_v21, %v1336_v17  ;;  %v2422_v58 = vpop.eup %2421  ;;  %v1074_v4 = vsel %vm1072_vm1, %v1073_v10, %v1071_v22 }
 0x119   : > { %v1078_v1 = vsel %vm1077_vm2, %v1066_v8, %v1076_v27  ;;  %v1347_v13 = vmul.f32 %v2422_v58, %v1337_v35 }
 0x11a   : > { %v1081_v7 = vsel %vm1079_vm4, %v1080_v54, %v1078_v1  ;;  %v1342_v12 = vsel %vm1341_vm3, %v1336_v17, %v1340_v57  ;;  %v1358_v1 = vand.u32 2147483648, %v3128_v37 }
 0x11b   : > { %v1119_v14 = vpack.c.bf16 %v1081_v7, %v1074_v4  ;;  %v1345_v16 = vsel %vm1343_vm5, %v1344_v44, %v1342_v12  ;;  %v1349_v24 = vsel %vm1348_vm6, %v1337_v35, %v1347_v13 }
 0x11c   : > { %v2424_v20 = vpop.eup %2423  ;;  %v1352_v41 = vsel %vm1350_vm7, %v1351_v3, %v1349_v24 }
 0x11d   : > { %2249 = vmatprep.mubr.bf16.mxu0 %v1119_v14  ;;  %v1083_v40 = vmul.f32 %v2424_v20, %v1067_v52  ;;  %v1390_v42 = vpack.c.bf16 %v1352_v41, %v1345_v16  ;;  %v2426_v62 = vpop.eup %2425 }
 0x11e   : > { %v1354_v21 = vmul.f32 %v2426_v62, %v3128_v37 }
 0x11f   : > { %v1085_v47 = vsel %vm1084_vm8, %v1067_v52, %v1083_v40 }
 0x120   : > { %v1088_v48 = vsel %vm1086_vm9, %v1087_v23, %v1085_v47  ;;  %v1356_v58 = vsel %vm1355_vm10, %v3128_v37, %v1354_v21 }
 0x121   : > { %v1120_v49 = vpack.c.bf16 %v1088_v48, %v1088_v48 }
 0x123   : > { %2250 = vmatmul.mubr.bf16.vlgmr.msra.gmra.mrb[32].mxu0 %v1120_v49 }
 0x124   : > { %2274 = vmatpush3.bf16.msra.mxu0 %v3051_v25  ;;  %v770_v50 = vpop.f32.mrb[8].mxu0  ;;  %2289 = vmatprep.mubr.bf16.mxu0 %v1390_v42 }
 0x125   : > { %v1553_v55 = vmul.f32 %v770_v50, %v770_v50  ;;  %v772_v56 = vpop.f32.mrb[9].mxu0  ;;  %2275 = vmatprep.subr.bf16.mxu0 %v3060_v6 }
 0x126   : > { %v1556_v59 = vmul.f32 %v772_v56, %v772_v56  ;;  %v774_v61 = vpop.f32.mrb[10].mxu0  ;;  %v821_v5 = vpop.f32.mrb[8].mxu1  ;;  %v1359_v56 = vsel %vm1357_vm11, %v1358_v1, %v1356_v58 }
 0x127   : > { %v1554_v63 = vmul.f32 %v774_v61, %v774_v61  ;;  %v776_v0 = vpop.f32.mrb[11].mxu0  ;;  %v1776_v15 = vmul.f32 %v821_v5, %v821_v5  ;;  %v823_v17 = vpop.f32.mrb[9].mxu1 }
 0x128   : > { %v3134_v8 = vadd.f32 %v1556_v59, %v1553_v55  ;;  %v1557_v11 = vmul.f32 %v776_v0, %v776_v0  ;;  %2276 = vmatpush3.bf16.msra.mxu0 %v3060_v6  ;;  %v1779_v18 = vmul.f32 %v823_v17, %v823_v17  ;;  %v825_v19 = vpop.f32.mrb[10].mxu1  ;;  %v1391_v0 = vpack.c.bf16 %v1359_v56, %v1359_v56 }
 0x129   : > { %2277 = vmatprep.subr.bf16.mxu0 %v3069_v26  ;;  %v1777_v30 = vmul.f32 %v825_v19, %v825_v19  ;;  %v827_v35 = vpop.f32.mrb[11].mxu1 }
 0x12a   : > { %2427 = vrsqrt.f32 %v3134_v8  ;;  %v1560_v29 = vadd.f32 %v1557_v11, %v1554_v63  ;;  %v1782_v36 = vadd.f32 %v1779_v18, %v1776_v15  ;;  %v1780_v45 = vmul.f32 %v827_v35, %v827_v35 }
 0x12b   : > { %vm1564_vm12 = vcmp.eq.f32.partialorder %v3134_v8, inf  ;;  %vm1566_vm13 = vcmp.eq.f32.partialorder %v3134_v8, 0.0  ;;  %v1567_v7 = vand.u32 2147483648, %v3134_v8 }
 0x12c   : > { %2429 = vrsqrt.f32 %v1560_v29  ;;  %2278 = vmatpush3.bf16.msra.mxu0 %v3069_v26  ;;  %v780_v46 = vpop.f32.mrb[12].mxu0  ;;  %v1783_v53 = vadd.f32 %v1780_v45, %v1777_v30  ;;  %vm1571_vm14 = vcmp.eq.f32.partialorder %v1560_v29, inf  ;;  %vm1787_vm15 = vcmp.eq.f32.partialorder %v1782_v36, inf }
 0x12d   : > { %v1555_v51 = vmul.f32 %v780_v46, %v780_v46  ;;  %2279 = vmatprep.subr.bf16.mxu0 %v3080_v31  ;;  %v782_v52 = vpop.f32.mrb[13].mxu0  ;;  %2431 = vrsqrt.f32 %v1782_v36  ;;  %v1790_v16 = vand.u32 2147483648, %v1782_v36  ;;  %vm1573_vm0 = vcmp.eq.f32.partialorder %v1560_v29, 0.0 }
 0x12e   : > { %v1558_v2 = vmul.f32 %v782_v52, %v782_v52  ;;  %v784_v9 = vpop.f32.mrb[14].mxu0  ;;  %2433 = vrsqrt.f32 %v1783_v53  ;;  %v831_v38 = vpop.f32.mrb[12].mxu1  ;;  %v1574_v20 = vand.u32 2147483648, %v1560_v29  ;;  %vm1789_vm1 = vcmp.eq.f32.partialorder %v1782_v36, 0.0 }
 0x12f   : > { %v785_v28 = vpop.f32.mrb[15].mxu0  ;;  %v1778_v60 = vmul.f32 %v831_v38, %v831_v38  ;;  %v833_v10 = vpop.f32.mrb[13].mxu1  ;;  %vm1794_vm2 = vcmp.eq.f32.partialorder %v1783_v53, inf  ;;  %vm1796_vm3 = vcmp.eq.f32.partialorder %v1783_v53, 0.0  ;;  %v1797_v41 = vand.u32 2147483648, %v1783_v53 }
 0x130   : > { %v3141_v43 = vadd.f32 %v1558_v2, %v1555_v51  ;;  %2280 = vmatpush3.bf16.msra.mxu0 %v3080_v31  ;;  %v1781_v22 = vmul.f32 %v833_v10, %v833_v10  ;;  %v835_v27 = vpop.f32.mrb[14].mxu1 }
 0x131   : > { %2281 = vmatprep.subr.bf16.mxu0 %v3089_v32  ;;  %v836_v44 = vpop.f32.mrb[15].mxu1 }
 0x132   : > { %v3147_v54 = vadd.f32 %v1781_v22, %v1778_v60  ;;  %2435 = vrsqrt.f32 %v3141_v43  ;;  %vm1578_vm4 = vcmp.eq.f32.partialorder %v3141_v43, inf }
 0x134   : > { %v2428_v57 = vpop.eup %2427  ;;  %2282 = vmatpush3.bf16.msra.mxu0 %v3089_v32 }
 0x135   : > { %2283 = vmatprep.subr.bf16.mxu0 %v3098_v33  ;;  %v1563_v3 = vmul.f32 %v2428_v57, %v3134_v8 }
 0x136   : > { %v2430_v4 = vpop.eup %2429 }
 0x137   : > { %v2432_v12 = vpop.eup %2431  ;;  %v1565_v13 = vsel %vm1564_vm12, %v3134_v8, %v1563_v3  ;;  %v1570_v14 = vmul.f32 %v2430_v4, %v1560_v29 }
 0x138   : > { %2284 = vmatpush3.bf16.msra.mxu0 %v3098_v33  ;;  %v1786_v23 = vmul.f32 %v2432_v12, %v1782_v36  ;;  %v2434_v24 = vpop.eup %2433  ;;  %v1568_v42 = vsel %vm1566_vm13, %v1567_v7, %v1565_v13  ;;  %vm1580_vm13 = vcmp.eq.f32.partialorder %v3141_v43, 0.0 }
 0x139   : > { %2285 = vmatprep.subr.bf16.mxu0 %v3107_v34  ;;  %v1572_v40 = vsel %vm1571_vm14, %v1560_v29, %v1570_v14  ;;  %v1793_v49 = vmul.f32 %v2434_v24, %v1783_v53 }
 0x13a   : > { %v1575_v47 = vsel %vm1573_vm0, %v1574_v20, %v1572_v40  ;;  %v1788_v48 = vsel %vm1787_vm15, %v1782_v36, %v1786_v23  ;;  %v1581_v20 = vand.u32 2147483648, %v3141_v43  ;;  %vm1801_vm0 = vcmp.eq.f32.partialorder %v3147_v54, inf }
 0x13b   : > { %v1613_v50 = vpack.c.bf16 %v1575_v47, %v1568_v42  ;;  %v3163_v55 = vsel %vm1789_vm1, %v1790_v16, %v1788_v48  ;;  %v1795_v59 = vsel %vm1794_vm2, %v1783_v53, %v1793_v49  ;;  %vm1803_vm1 = vcmp.eq.f32.partialorder %v3147_v54, 0.0 }
 0x13c   : > { %2286 = vmatpush3.bf16.msra.mxu0 %v3107_v34  ;;  %v3169_v61 = vsel %vm1796_vm3, %v1797_v41, %v1795_v59  ;;  %v2436_v4 = vpop.eup %2435 }
 0x13d   : > { %2287 = vmatprep.subr.bf16.mxu0 %v3116_v39  ;;  %v1836_v63 = vpack.c.bf16 %v3169_v61, %v3163_v55  ;;  %v1577_v16 = vmul.f32 %v2436_v4, %v3141_v43 }
 0x140   : > { %2288 = vmatpush3.bf16.msra.mxu0 %v3116_v39 }
 0x141   : > { %2313 = vmatprep.subr.bf16.mxu0 %v3051_v25 }
 0x143   : > { %2290 = vmatmul.mubr.bf16.vlgmr.msra.gmra.mrb[36].mxu0 %v1391_v0 }
 0x144   : > { %2314 = vmatpush3.bf16.msra.mxu0 %v3051_v25  ;;  %2329 = vmatprep.mubr.bf16.mxu0 %v1613_v50  ;;  %v885_v5 = vpop.f32.mrb[16].mxu0 }
 0x145   : > { %v1089_v37 = vmul.f32 %v885_v5, %v885_v5  ;;  %v887_v8 = vpop.f32.mrb[17].mxu0  ;;  %2315 = vmatprep.subr.bf16.mxu0 %v3060_v6 }
 0x146   : > { %v1092_v11 = vmul.f32 %v887_v8, %v887_v8  ;;  %v889_v15 = vpop.f32.mrb[18].mxu0  ;;  %v936_v19 = vpop.f32.mrb[16].mxu1 }
 0x147   : > { %v1090_v17 = vmul.f32 %v889_v15, %v889_v15  ;;  %v891_v18 = vpop.f32.mrb[19].mxu0  ;;  %v1360_v35 = vmul.f32 %v936_v19, %v936_v19  ;;  %v938_v36 = vpop.f32.mrb[17].mxu1  ;;  %v1579_v15 = vsel %vm1578_vm4, %v3141_v43, %v1577_v16 }
 0x148   : > { %v3178_v29 = vadd.f32 %v1092_v11, %v1089_v37  ;;  %v1093_v30 = vmul.f32 %v891_v18, %v891_v18  ;;  %2316 = vmatpush3.bf16.msra.mxu0 %v3060_v6  ;;  %v1363_v45 = vmul.f32 %v938_v36, %v938_v36  ;;  %v940_v46 = vpop.f32.mrb[18].mxu1 }
 0x149   : > { %2317 = vmatprep.subr.bf16.mxu0 %v3069_v26  ;;  %v1361_v52 = vmul.f32 %v940_v46, %v940_v46  ;;  %v942_v53 = vpop.f32.mrb[19].mxu1 }
 0x14a   : > { %2437 = vrsqrt.f32 %v3178_v29  ;;  %v1096_v51 = vadd.f32 %v1093_v30, %v1090_v17  ;;  %v3183_v62 = vadd.f32 %v1363_v45, %v1360_v35  ;;  %v1364_v2 = vmul.f32 %v942_v53, %v942_v53 }
 0x14b   : > { %vm1100_vm5 = vcmp.eq.f32.partialorder %v3178_v29, inf  ;;  %vm1102_vm6 = vcmp.eq.f32.partialorder %v3178_v29, 0.0  ;;  %v1103_v24 = vand.u32 2147483648, %v3178_v29  ;;  %v1582_v35 = vsel %vm1580_vm13, %v1581_v20, %v1579_v15 }
 0x14c   : > { %2439 = vrsqrt.f32 %v1096_v51  ;;  %2318 = vmatpush3.bf16.msra.mxu0 %v3069_v26  ;;  %v895_v9 = vpop.f32.mrb[20].mxu0  ;;  %v1367_v60 = vadd.f32 %v1364_v2, %v1361_v52  ;;  %vm1107_vm7 = vcmp.eq.f32.partialorder %v1096_v51, inf  ;;  %vm1371_vm8 = vcmp.eq.f32.partialorder %v3183_v62, inf }
 0x14d   : > { %v1091_v28 = vmul.f32 %v895_v9, %v895_v9  ;;  %v897_v38 = vpop.f32.mrb[21].mxu0  ;;  %2319 = vmatprep.subr.bf16.mxu0 %v3080_v31  ;;  %2441 = vrsqrt.f32 %v3183_v62  ;;  %v1374_v47 = vand.u32 2147483648, %v3183_v62  ;;  %vm1109_vm9 = vcmp.eq.f32.partialorder %v1096_v51, 0.0 }
 0x14e   : > { %v1094_v10 = vmul.f32 %v897_v38, %v897_v38  ;;  %v899_v21 = vpop.f32.mrb[22].mxu0  ;;  %2443 = vrsqrt.f32 %v1367_v60  ;;  %v946_v27 = vpop.f32.mrb[20].mxu1  ;;  %v1110_v48 = vand.u32 2147483648, %v1096_v51  ;;  %vm1373_vm10 = vcmp.eq.f32.partialorder %v3183_v62, 0.0 }
 0x14f   : > { %v900_v22 = vpop.f32.mrb[23].mxu0  ;;  %v1362_v57 = vmul.f32 %v946_v27, %v946_v27  ;;  %v948_v58 = vpop.f32.mrb[21].mxu1  ;;  %vm1378_vm11 = vcmp.eq.f32.partialorder %v1367_v60, inf  ;;  %vm1380_vm12 = vcmp.eq.f32.partialorder %v1367_v60, 0.0  ;;  %v1381_v59 = vand.u32 2147483648, %v1367_v60 }
 0x150   : > { %v3188_v44 = vadd.f32 %v1094_v10, %v1091_v28  ;;  %2320 = vmatpush3.bf16.msra.mxu0 %v3080_v31  ;;  %v1365_v1 = vmul.f32 %v948_v58, %v948_v58  ;;  %v950_v3 = vpop.f32.mrb[22].mxu1 }
 0x151   : > { %2321 = vmatprep.subr.bf16.mxu0 %v3089_v32  ;;  %v951_v7 = vpop.f32.mrb[23].mxu1 }
 0x152   : > { %2445 = vrsqrt.f32 %v3188_v44  ;;  %v3193_v12 = vadd.f32 %v1365_v1, %v1362_v57  ;;  %vm1114_vm14 = vcmp.eq.f32.partialorder %v3188_v44, inf  ;;  %v1117_v36 = vand.u32 2147483648, %v3188_v44 }
 0x153   : > { %vm1116_vm15 = vcmp.eq.f32.partialorder %v3188_v44, 0.0  ;;  %2447 = vrsqrt.f32 %v3147_v54 }
 0x154   : > { %v2438_v13 = vpop.eup %2437  ;;  %2322 = vmatpush3.bf16.msra.mxu0 %v3089_v32  ;;  %2449 = vrsqrt.f32 %v3193_v12 }
 0x155   : > { %2323 = vmatprep.subr.bf16.mxu0 %v3098_v33  ;;  %v1099_v14 = vmul.f32 %v2438_v13, %v3178_v29 }
 0x156   : > { %v2440_v23 = vpop.eup %2439 }
 0x157   : > { %v2442_v40 = vpop.eup %2441  ;;  %v1101_v41 = vsel %vm1100_vm5, %v3178_v29, %v1099_v14  ;;  %v1106_v42 = vmul.f32 %v2440_v23, %v1096_v51 }
 0x158   : > { %2324 = vmatpush3.bf16.msra.mxu0 %v3098_v33  ;;  %v1370_v49 = vmul.f32 %v2442_v40, %v3183_v62  ;;  %v2444_v50 = vpop.eup %2443  ;;  %v1104_v0 = vsel %vm1102_vm6, %v1103_v24, %v1101_v41 }
 0x159   : > { %2325 = vmatprep.subr.bf16.mxu0 %v3107_v34  ;;  %v1108_v56 = vsel %vm1107_vm7, %v1096_v51, %v1106_v42  ;;  %v1377_v8 = vmul.f32 %v2444_v50, %v1367_v60  ;;  %v1614_v51 = vpack.c.bf16 %v1582_v35, %v1582_v35  ;;  %vm1385_vm7 = vcmp.eq.f32.partialorder %v3193_v12, inf }
 0x15a   : > { %v1111_v5 = vsel %vm1109_vm9, %v1110_v48, %v1108_v56  ;;  %v1372_v37 = vsel %vm1371_vm8, %v3183_v62, %v1370_v49 }
 0x15b   : > { %v1217_v11 = vpack.c.bf16 %v1111_v5, %v1104_v0  ;;  %v1375_v17 = vsel %vm1373_vm10, %v1374_v47, %v1372_v37  ;;  %v1379_v19 = vsel %vm1378_vm11, %v1367_v60, %v1377_v8  ;;  %vm1387_vm11 = vcmp.eq.f32.partialorder %v3193_v12, 0.0 }
 0x15c   : > { %v2446_v18 = vpop.eup %2445  ;;  %2326 = vmatpush3.bf16.msra.mxu0 %v3107_v34  ;;  %v1382_v30 = vsel %vm1380_vm12, %v1381_v59, %v1379_v19 }
 0x15d   : > { %2269 = vmatprep.mubr.bf16.mxu1 %v1217_v11  ;;  %2327 = vmatprep.subr.bf16.mxu0 %v3116_v39  ;;  %v1113_v29 = vmul.f32 %v2446_v18, %v3188_v44  ;;  %v1440_v45 = vpack.c.bf16 %v1382_v30, %v1375_v17  ;;  %v2448_v16 = vpop.eup %2447  ;;  %v1804_v11 = vand.u32 2147483648, %v3147_v54 }
 0x15e   : > { %v1800_v48 = vmul.f32 %v2448_v16, %v3147_v54  ;;  %v2450_v59 = vpop.eup %2449 }
 0x15f   : > { %v1115_v43 = vsel %vm1114_vm14, %v3188_v44, %v1113_v29  ;;  %v1384_v18 = vmul.f32 %v2450_v59, %v3193_v12 }
 0x160   : > { %2328 = vmatpush3.bf16.msra.mxu0 %v3116_v39  ;;  %v1118_v46 = vsel %vm1116_vm15, %v1117_v36, %v1115_v43  ;;  %v1802_v8 = vsel %vm1801_vm0, %v3147_v54, %v1800_v48 }
 0x161   : > { %2353 = vmatprep.subr.bf16.mxu0 %v3051_v25  ;;  %v1218_v52 = vpack.c.bf16 %v1118_v46, %v1118_v46 }
 0x163   : > { %2330 = vmatmul.mubr.bf16.vlgmr.msra.gmra.mrb[40].mxu0 %v1614_v51  ;;  %2270 = vmatmul.mubr.bf16.vlgmr.msra.gmra.mrb[32].mxu1 %v1218_v52  ;;  %v1388_v51 = vand.u32 2147483648, %v3193_v12 }
 0x164   : > { %2294 = vmatpush3.bf16.msra.mxu1 %v3051_v25  ;;  %2354 = vmatpush3.bf16.msra.mxu0 %v3051_v25  ;;  %v987_v53 = vpop.f32.mrb[24].mxu0 }
 0x165   : > { %2369 = vmatprep.mubr.bf16.mxu0 %v1836_v63  ;;  %2295 = vmatprep.subr.bf16.mxu1 %v3060_v6  ;;  %v1583_v62 = vmul.f32 %v987_v53, %v987_v53  ;;  %v989_v2 = vpop.f32.mrb[25].mxu0 }
 0x166   : > { %2355 = vmatprep.subr.bf16.mxu0 %v3060_v6  ;;  %2309 = vmatprep.mubr.bf16.mxu1 %v1440_v45  ;;  %v1586_v9 = vmul.f32 %v989_v2, %v989_v2  ;;  %v991_v28 = vpop.f32.mrb[26].mxu0  ;;  %v1038_v10 = vpop.f32.mrb[24].mxu1 }
 0x167   : > { %v1584_v38 = vmul.f32 %v991_v28, %v991_v28  ;;  %v993_v60 = vpop.f32.mrb[27].mxu0  ;;  %v1806_v61 = vmul.f32 %v1038_v10, %v1038_v10  ;;  %v1040_v63 = vpop.f32.mrb[25].mxu1  ;;  %v1386_v28 = vsel %vm1385_vm7, %v3193_v12, %v1384_v18 }
 0x168   : > { %2296 = vmatpush3.bf16.msra.mxu1 %v3060_v6  ;;  %2356 = vmatpush3.bf16.msra.mxu0 %v3060_v6  ;;  %v3238_v21 = vadd.f32 %v1586_v9, %v1583_v62  ;;  %v1587_v55 = vmul.f32 %v993_v60, %v993_v60  ;;  %v1809_v22 = vmul.f32 %v1040_v63, %v1040_v63  ;;  %v1042_v27 = vpop.f32.mrb[26].mxu1 }
 0x169   : > { %2297 = vmatprep.subr.bf16.mxu1 %v3069_v26  ;;  %2357 = vmatprep.subr.bf16.mxu0 %v3069_v26  ;;  %v1044_v57 = vpop.f32.mrb[27].mxu1  ;;  %v1807_v1 = vmul.f32 %v1042_v27, %v1042_v27 }
 0x16a   : > { %2451 = vrsqrt.f32 %v3238_v21  ;;  %v3244_v44 = vadd.f32 %v1587_v55, %v1584_v38  ;;  %v3246_v58 = vadd.f32 %v1809_v22, %v1806_v61  ;;  %v1810_v3 = vmul.f32 %v1044_v57, %v1044_v57 }
 0x16b   : > { %vm1594_vm2 = vcmp.eq.f32.partialorder %v3238_v21, inf  ;;  %v1597_v37 = vand.u32 2147483648, %v3238_v21  ;;  %vm1596_vm3 = vcmp.eq.f32.partialorder %v3238_v21, 0.0  ;;  %v1389_v55 = vsel %vm1387_vm11, %v1388_v51, %v1386_v28 }
 0x16c   : > { %2298 = vmatpush3.bf16.msra.mxu1 %v3069_v26  ;;  %2358 = vmatpush3.bf16.msra.mxu0 %v3069_v26  ;;  %2453 = vrsqrt.f32 %v3244_v44  ;;  %v997_v4 = vpop.f32.mrb[28].mxu0  ;;  %v3254_v14 = vadd.f32 %v1810_v3, %v1807_v1  ;;  %vm1601_vm4 = vcmp.eq.f32.partialorder %v3244_v44, inf  ;;  %vm1603_vm5 = vcmp.eq.f32.partialorder %v3244_v44, 0.0 }
 0x16d   : > { %2299 = vmatprep.subr.bf16.mxu1 %v3080_v31  ;;  %2359 = vmatprep.subr.bf16.mxu0 %v3080_v31  ;;  %v1585_v7 = vmul.f32 %v997_v4, %v997_v4  ;;  %v999_v13 = vpop.f32.mrb[29].mxu0  ;;  %2455 = vrsqrt.f32 %v3246_v58  ;;  %v1604_v19 = vand.u32 2147483648, %v3244_v44  ;;  %vm1817_vm6 = vcmp.eq.f32.partialorder %v3246_v58, inf }
 0x16e   : > { %v1588_v20 = vmul.f32 %v999_v13, %v999_v13  ;;  %v1001_v23 = vpop.f32.mrb[30].mxu0  ;;  %2457 = vrsqrt.f32 %v3254_v14  ;;  %v1048_v40 = vpop.f32.mrb[28].mxu1  ;;  %v1820_v36 = vand.u32 2147483648, %v3246_v58  ;;  %vm1819_vm8 = vcmp.eq.f32.partialorder %v3246_v58, 0.0 }
 0x16f   : > { %v1002_v24 = vpop.f32.mrb[31].mxu0  ;;  %v1808_v42 = vmul.f32 %v1048_v40, %v1048_v40  ;;  %v1050_v47 = vpop.f32.mrb[29].mxu1  ;;  %vm1824_vm9 = vcmp.eq.f32.partialorder %v3254_v14, inf  ;;  %v1827_v53 = vand.u32 2147483648, %v3254_v14  ;;  %vm1826_vm10 = vcmp.eq.f32.partialorder %v3254_v14, 0.0 }
 0x170   : > { %2300 = vmatpush3.bf16.msra.mxu1 %v3080_v31  ;;  %2360 = vmatpush3.bf16.msra.mxu0 %v3080_v31  ;;  %v3259_v41 = vadd.f32 %v1588_v20, %v1585_v7  ;;  %v1811_v49 = vmul.f32 %v1050_v47, %v1050_v47  ;;  %v1052_v50 = vpop.f32.mrb[30].mxu1  ;;  %v1805_v61 = vsel %vm1803_vm1, %v1804_v11, %v1802_v8 }
 0x171   : > { %2301 = vmatprep.subr.bf16.mxu1 %v3089_v32  ;;  %2361 = vmatprep.subr.bf16.mxu0 %v3089_v32  ;;  %v1053_v56 = vpop.f32.mrb[31].mxu1  ;;  %v1441_v12 = vpack.c.bf16 %v1389_v55, %v1389_v55  ;;  %v1837_v22 = vpack.c.bf16 %v1805_v61, %v1805_v61 }
 0x172   : > { %v3265_v0 = vadd.f32 %v1811_v49, %v1808_v42  ;;  %2459 = vrsqrt.f32 %v3259_v41  ;;  %vm1608_vm12 = vcmp.eq.f32.partialorder %v3259_v41, inf  ;;  %vm1610_vm13 = vcmp.eq.f32.partialorder %v3259_v41, 0.0 }
 0x174   : > { %v2452_v5 = vpop.eup %2451  ;;  %2302 = vmatpush3.bf16.msra.mxu1 %v3089_v32  ;;  %2362 = vmatpush3.bf16.msra.mxu0 %v3089_v32  ;;  %2461 = vrsqrt.f32 %v3265_v0  ;;  %vm1831_vm14 = vcmp.eq.f32.partialorder %v3265_v0, inf  ;;  %vm1833_vm15 = vcmp.eq.f32.partialorder %v3265_v0, 0.0 }
 0x175   : > { %2303 = vmatprep.subr.bf16.mxu1 %v3098_v33  ;;  %2363 = vmatprep.subr.bf16.mxu0 %v3098_v33  ;;  %v1593_v15 = vmul.f32 %v2452_v5, %v3238_v21 }
 0x176   : > { %v2454_v17 = vpop.eup %2453 }
 0x177   : > { %v2456_v29 = vpop.eup %2455  ;;  %v1595_v30 = vsel %vm1594_vm2, %v3238_v21, %v1593_v15  ;;  %v1600_v35 = vmul.f32 %v2454_v17, %v3244_v44 }
 0x178   : > { %2304 = vmatpush3.bf16.msra.mxu1 %v3098_v33  ;;  %2364 = vmatpush3.bf16.msra.mxu0 %v3098_v33  ;;  %v1598_v45 = vsel %vm1596_vm3, %v1597_v37, %v1595_v30  ;;  %v1816_v43 = vmul.f32 %v2456_v29, %v3246_v58  ;;  %v2458_v46 = vpop.eup %2457 }
 0x179   : > { %2305 = vmatprep.subr.bf16.mxu1 %v3107_v34  ;;  %2365 = vmatprep.subr.bf16.mxu0 %v3107_v34  ;;  %v1602_v52 = vsel %vm1601_vm4, %v3244_v44, %v1600_v35  ;;  %v1823_v9 = vmul.f32 %v2458_v46, %v3254_v14  ;;  %v1611_v44 = vand.u32 2147483648, %v3259_v41 }
 0x17a   : > { %v1605_v62 = vsel %vm1603_vm5, %v1604_v19, %v1602_v52  ;;  %v1818_v2 = vsel %vm1817_vm6, %v3246_v58, %v1816_v43 }
 0x17b   : > { %v1663_v38 = vpack.c.bf16 %v1605_v62, %v1598_v45  ;;  %v1821_v60 = vsel %vm1819_vm8, %v1820_v36, %v1818_v2  ;;  %v1825_v10 = vsel %vm1824_vm9, %v3254_v14, %v1823_v9 }
 0x17c   : > { %2306 = vmatpush3.bf16.msra.mxu1 %v3107_v34  ;;  %2366 = vmatpush3.bf16.msra.mxu0 %v3107_v34  ;;  %v1828_v21 = vsel %vm1826_vm10, %v1827_v53, %v1825_v10  ;;  %v2460_v54 = vpop.eup %2459 }
 0x17d   : > { %2307 = vmatprep.subr.bf16.mxu1 %v3116_v39  ;;  %2367 = vmatprep.subr.bf16.mxu0 %v3116_v39  ;;  %v1886_v63 = vpack.c.bf16 %v1828_v21, %v1821_v60  ;;  %v1607_v27 = vmul.f32 %v2460_v54, %v3259_v41 }
 0x17e   : > { %v2462_v3 = vpop.eup %2461 }
 0x17f   : > { %v1609_v57 = vsel %vm1608_vm12, %v3259_v41, %v1607_v27  ;;  %v2520_v41 = vmov 0.0  }
 0x180   : > { %2308 = vmatpush3.bf16.msra.mxu1 %v3116_v39  ;;  %2368 = vmatpush3.bf16.msra.mxu0 %v3116_v39  ;;  %v1612_v58 = vsel %vm1610_vm13, %v1611_v44, %v1609_v57  ;;  %1999 = vst [vmem:[%s3372_s9] sm:$0xff] %v2520_v41 }
 0x181   : > { %2333 = vmatprep.subr.bf16.mxu1 %v3051_v25  ;;  %v1664_v1 = vpack.c.bf16 %v1612_v58, %v1612_v58 }
 0x183   : > { %2310 = vmatmul.mubr.bf16.vlgmr.msra.gmra.mrb[36].mxu1 %v1441_v12  ;;  %2370 = vmatmul.mubr.bf16.vlgmr.msra.gmra.mrb[44].mxu0 %v1837_v22 }
 0x184   : > { %2334 = vmatpush3.bf16.msra.mxu1 %v3051_v25  ;;  %2349 = vmatprep.mubr.bf16.mxu1 %v1663_v38 }
 0x185   : > { %2335 = vmatprep.subr.bf16.mxu1 %v3060_v6 }
 0x188   : > { %2336 = vmatpush3.bf16.msra.mxu1 %v3060_v6 }
 0x189   : > { %2337 = vmatprep.subr.bf16.mxu1 %v3069_v26 }
 0x18c   : > { %2338 = vmatpush3.bf16.msra.mxu1 %v3069_v26 }
 0x18d   : > { %2339 = vmatprep.subr.bf16.mxu1 %v3080_v31 }
 0x190   : > { %2340 = vmatpush3.bf16.msra.mxu1 %v3080_v31 }
 0x191   : > { %2341 = vmatprep.subr.bf16.mxu1 %v3089_v32 }
 0x194   : > { %2342 = vmatpush3.bf16.msra.mxu1 %v3089_v32 }
 0x195   : > { %2343 = vmatprep.subr.bf16.mxu1 %v3098_v33 }
 0x198   : > { %2344 = vmatpush3.bf16.msra.mxu1 %v3098_v33 }
 0x199   : > { %2345 = vmatprep.subr.bf16.mxu1 %v3107_v34 }
 0x19c   : > { %2346 = vmatpush3.bf16.msra.mxu1 %v3107_v34 }
 0x19d   : > { %2347 = vmatprep.subr.bf16.mxu1 %v3116_v39 }
 0x1a0   : > { %2348 = vmatpush3.bf16.msra.mxu1 %v3116_v39 }
 0x1a1   : > { %2373 = vmatprep.subr.bf16.mxu1 %v3051_v25 }
 0x1a3   : > { %2350 = vmatmul.mubr.bf16.vlgmr.msra.gmra.mrb[40].mxu1 %v1664_v1 }
 0x1a4   : > { %2374 = vmatpush3.bf16.msra.mxu1 %v3051_v25  ;;  %2389 = vmatprep.mubr.bf16.mxu1 %v1886_v63  ;;  %v1830_v25 = vmul.f32 %v2462_v3, %v3265_v0 }
 0x1a5   : > { %2375 = vmatprep.subr.bf16.mxu1 %v3060_v6 }
 0x1a8   : > { %2376 = vmatpush3.bf16.msra.mxu1 %v3060_v6  ;;  %v1834_v6 = vand.u32 2147483648, %v3265_v0 }
 0x1a9   : > { %2377 = vmatprep.subr.bf16.mxu1 %v3069_v26 }
 0x1ac   : > { %2378 = vmatpush3.bf16.msra.mxu1 %v3069_v26  ;;  %v1832_v26 = vsel %vm1831_vm14, %v3265_v0, %v1830_v25 }
 0x1ad   : > { %2379 = vmatprep.subr.bf16.mxu1 %v3080_v31 }
 0x1b0   : > { %2380 = vmatpush3.bf16.msra.mxu1 %v3080_v31  ;;  %v1835_v31 = vsel %vm1833_vm15, %v1834_v6, %v1832_v26 }
 0x1b1   : > { %2381 = vmatprep.subr.bf16.mxu1 %v3089_v32 }
 0x1b4   : > { %2382 = vmatpush3.bf16.msra.mxu1 %v3089_v32  ;;  %v1887_v32 = vpack.c.bf16 %v1835_v31, %v1835_v31 }
 0x1b5   : > { %2383 = vmatprep.subr.bf16.mxu1 %v3098_v33 }
 0x1b8   : > { %2384 = vmatpush3.bf16.msra.mxu1 %v3098_v33 }
 0x1b9   : > { %2385 = vmatprep.subr.bf16.mxu1 %v3107_v34 }
 0x1bc   : > { %2386 = vmatpush3.bf16.msra.mxu1 %v3107_v34  ;;  %v1055_v34 = vlaneseq }
 0x1bd   : > { %2387 = vmatprep.subr.bf16.mxu1 %v3116_v39 }
 0x1be   : > { %v1056_v24 = vshrl.u32 %v1055_v34, 7 }
 0x1c0   : > { %2388 = vmatpush3.bf16.msra.mxu1 %v3116_v39  ;;  %v1058_v39 = vadd.s32 16, %v1056_v24  ;;  %v1057_v40 = vadd.s32 8, %v1056_v24  ;;  %v3375_v42 = vmul.u32 4, %v1056_v24 }
 0x1c2   : > { %v3379_v49 = vmul.u32 4, %v1058_v39  ;;  %v3381_v50 = vmul.u32 4, %v1057_v40  ;;  %vm1270_vm0 = vcmp.lt.s32.totalorder %v3375_v42, 65  ;;  %v3400_v27 = vadd.s32 1, %v3375_v42 }
 0x1c3   : > { %2390 = vmatmul.mubr.bf16.vlgmr.msra.gmra.mrb[44].mxu1 %v1887_v32 }
 0x1c4   : > { %vm1272_vm1 = vcmp.lt.s32.totalorder %v3379_v49, 65  ;;  %vm1271_vm2 = vcmp.lt.s32.totalorder %v3381_v50, 65  ;;  %v3397_v54 = vadd.s32 1, %v3379_v49  ;;  %v3405_v3 = vadd.s32 1, %v3381_v50 }
 0x1c5   : > { %vm1493_vm4 = vcmp.lt.s32.totalorder %v3400_v27, 65 }
 0x1c6   : > { %vm1495_vm3 = vcmp.lt.s32.totalorder %v3397_v54, 65  ;;  %vm1494_vm5 = vcmp.lt.s32.totalorder %v3405_v3, 65 }
 0x1f6   : > { %v2251_v33 = vpop.f32.mrb[32].mxu0 }
 0x1f7   : > { %v1203_v4 = vpop.f32.mrb[33].mxu0  ;;  %v1287_v52 = vadd.f32 1e-07, %v2251_v33 }
 0x1f8   : > { %v2252_v7 = vpop.f32.mrb[34].mxu0  ;;  %v1285_v2 = vadd.f32 1e-07, %v1203_v4 }
 0x1f9   : > { %v1206_v13 = vpop.f32.mrb[35].mxu0 }
 0x1fa   : > { %v1286_v60 = vadd.f32 1e-07, %v1206_v13 }
 0x216   : > { %v3361_v14 = vpop.f32.mrb[36].mxu0 }
 0x217   : > { %v3363_v16 = vpop.f32.mrb[37].mxu0 }
 0x218   : > { %v2292_v20 = vpop.f32.mrb[38].mxu0 }
 0x219   : > { %v3365_v23 = vpop.f32.mrb[39].mxu0 }
 0x236   : > { %v3377_v47 = vpop.f32.mrb[40].mxu0  ;;  %v2271_v48 = vpop.f32.mrb[32].mxu1 }
 0x237   : > { %v1275_v56 = vsub.f32 %v2251_v33, %v2271_v48  ;;  %v1290_v59 = vadd.f32 1e-07, %v2271_v48  ;;  %v3383_v0 = vpop.f32.mrb[41].mxu0  ;;  %v1253_v5 = vpop.f32.mrb[33].mxu1 }
 0x238   : > { %v1273_v37 = vsub.f32 %v1203_v4, %v1253_v5  ;;  %v1288_v8 = vadd.f32 1e-07, %v1253_v5  ;;  %v2332_v11 = vpop.f32.mrb[42].mxu0  ;;  %v2272_v15 = vpop.f32.mrb[34].mxu1 }
 0x239   : > { %2463 = vrcp.f32 %v1290_v59  ;;  %v3386_v17 = vpop.f32.mrb[43].mxu0  ;;  %v1256_v18 = vpop.f32.mrb[35].mxu1  ;;  %v1284_v35 = vsel %vm1272_vm1, %v1275_v56, 0.0 }
 0x23a   : > { %2465 = vrcp.f32 %v1288_v8  ;;  %v1282_v19 = vsel %vm1270_vm0, %v1273_v37, 0.0  ;;  %v1274_v29 = vsub.f32 %v1206_v13, %v1256_v18  ;;  %v1289_v30 = vadd.f32 1e-07, %v1256_v18 }
 0x23b   : > { %v1309_v45 = vmul.f32 %v1282_v19, %v1282_v19  ;;  %v1311_v46 = vmul.f32 %v1284_v35, %v1284_v35 }
 0x23c   : > { %v1283_v36 = vsel %vm1271_vm2, %v1274_v29, 0.0  ;;  %2467 = vrcp.f32 %v1289_v30 }
 0x23d   : > { %v1310_v43 = vmul.f32 %v1283_v36, %v1283_v36  ;;  %v1510_v36 = vadd.f32 1e-07, %v3361_v14 }
 0x23f   : > { %v1312_v51 = vadd.f32 %v1310_v43, %v1309_v45 }
 0x241   : > { %v1313_v53 = vadd.f32 %v1312_v51, %v1311_v46 }
 0x243   : > { %v2464_v62 = vpop.eup %2463  ;;  %v1314_v24 = vrot.slane %v1313_v53, 4 }
 0x244   : > { %v2466_v9 = vpop.eup %2465  ;;  %v1296_v28 = vmul.f32 %v2464_v62, %v1287_v52  ;;  %v1508_v62 = vadd.f32 1e-07, %v3363_v16 }
 0x245   : > { %v1292_v38 = vmul.f32 %v2466_v9, %v1285_v2  ;;  %v1315_v18 = vadd.f32 %v1314_v24, %v1313_v53  ;;  %v1509_v9 = vadd.f32 1e-07, %v3365_v23 }
 0x246   : > { %2469 = vlog2.f32 %v1296_v28  ;;  %v2468_v10 = vpop.eup %2467 }
 0x247   : > { %2471 = vlog2.f32 %v1292_v38  ;;  %v1294_v21 = vmul.f32 %v2468_v10, %v1286_v60  ;;  %v1316_v45 = vrot.slane %v1315_v18, 2 }
 0x249   : > { %2473 = vlog2.f32 %v1294_v21  ;;  %v1317_v28 = vadd.f32 %v1316_v45, %v1315_v18 }
 0x250   : > { %v2470_v55 = vpop.eup %2469 }
 0x251   : > { %v2472_v61 = vpop.eup %2471  ;;  %v1302_v12 = vmul.f32 0.6931472, %v2470_v55  ;;  %v1318_v55 = vrot.slane %v1317_v28, 1 }
 0x252   : > { %v1298_v63 = vmul.f32 0.6931472, %v2472_v61 }
 0x253   : > { %v2474_v22 = vpop.eup %2473  ;;  %v1305_v25 = vand.u32 2147483647, %v1302_v12 }
 0x254   : > { %v1303_v44 = vand.u32 2147483647, %v1298_v63  ;;  %v1300_v57 = vmul.f32 0.6931472, %v2474_v22  ;;  %v1319_v63 = vadd.f32 %v1318_v55, %v1317_v28 }
 0x255   : > { %v1308_v56 = vsel %vm1272_vm1, %v1305_v25, 0.0 }
 0x256   : > { %v2311_v58 = vpop.f32.mrb[36].mxu1  ;;  %v3402_v1 = vpop.f32.mrb[44].mxu0  ;;  %v1304_v6 = vand.u32 2147483647, %v1300_v57  ;;  %v1306_v4 = vsel %vm1270_vm0, %v1303_v44, 0.0 }
 0x257   : > { %v1498_v26 = vsub.f32 %v3361_v14, %v2311_v58  ;;  %v1513_v31 = vadd.f32 1e-07, %v2311_v58  ;;  %v1476_v32 = vpop.f32.mrb[37].mxu1  ;;  %v3410_v33 = vpop.f32.mrb[45].mxu0 }
 0x258   : > { %v1307_v7 = vsel %vm1271_vm2, %v1304_v6, 0.0  ;;  %v1496_v13 = vsub.f32 %v3363_v16, %v1476_v32  ;;  %v2312_v20 = vpop.f32.mrb[38].mxu1  ;;  %v2372_v34 = vpop.f32.mrb[46].mxu0  ;;  %v1511_v40 = vadd.f32 1e-07, %v1476_v32  ;;  %v3435_v6 = vadd.s32 2, %v3375_v42 }
 0x259   : > { %2475 = vrcp.f32 %v1513_v31  ;;  %v1321_v39 = vadd.f32 %v1307_v7, %v1306_v4  ;;  %v1479_v41 = vpop.f32.mrb[39].mxu1  ;;  %v3418_v48 = vpop.f32.mrb[47].mxu0  ;;  %v1507_v11 = vsel %vm1495_vm3, %v1498_v26, 0.0  ;;  %v3438_v31 = vadd.s32 2, %v3379_v49 }
 0x25a   : > { %v1505_v59 = vsel %vm1493_vm4, %v1496_v13, 0.0  ;;  %v1497_v5 = vsub.f32 %v3365_v23, %v1479_v41  ;;  %v1512_v37 = vadd.f32 1e-07, %v1479_v41  ;;  %2477 = vrcp.f32 %v1511_v40 }
 0x25b   : > { %v1322_v8 = vadd.f32 %v1321_v39, %v1308_v56  ;;  %v1532_v19 = vmul.f32 %v1505_v59, %v1505_v59  ;;  %v1534_v30 = vmul.f32 %v1507_v11, %v1507_v11  ;;  %v3441_v13 = vadd.s32 2, %v3381_v50 }
 0x25c   : > { %v1506_v15 = vsel %vm1494_vm5, %v1497_v5, 0.0  ;;  %2479 = vrcp.f32 %v1512_v37  ;;  %vm1716_vm6 = vcmp.lt.s32.totalorder %v3435_v6, 65  ;;  %vm1718_vm7 = vcmp.lt.s32.totalorder %v3438_v31, 65 }
 0x25d   : > { %v1533_v29 = vmul.f32 %v1506_v15, %v1506_v15  ;;  %v1323_v58 = vrot.slane %v1322_v8, 4  ;;  %vm1717_vm8 = vcmp.lt.s32.totalorder %v3441_v13, 65 }
 0x25f   : > { %v1535_v35 = vadd.f32 %v1533_v29, %v1532_v19  ;;  %v1324_v40 = vadd.f32 %v1323_v58, %v1322_v8 }
 0x261   : > { %v1536_v43 = vadd.f32 %v1535_v35, %v1534_v30  ;;  %v1325_v29 = vrot.slane %v1324_v40, 2 }
 0x263   : > { %v2476_v46 = vpop.eup %2475  ;;  %v1537_v52 = vrot.slane %v1536_v43, 4  ;;  %v1326_v54 = vadd.f32 %v1325_v29, %v1324_v40 }
 0x264   : > { %v1519_v51 = vmul.f32 %v2476_v46, %v1510_v36  ;;  %v2478_v2 = vpop.eup %2477 }
 0x265   : > { %v1538_v38 = vadd.f32 %v1537_v52, %v1536_v43  ;;  %v1515_v60 = vmul.f32 %v2478_v2, %v1508_v62  ;;  %v1733_v62 = vadd.f32 1e-07, %v3377_v47 }
 0x266   : > { %2481 = vlog2.f32 %v1519_v51  ;;  %v2480_v53 = vpop.eup %2479 }
 0x267   : > { %v1517_v10 = vmul.f32 %v2480_v53, %v1509_v9  ;;  %v1539_v21 = vrot.slane %v1538_v38, 2  ;;  %2483 = vlog2.f32 %v1515_v60  ;;  %v1327_v60 = vrot.slane %v1326_v54, 1 }
 0x269   : > { %2485 = vlog2.f32 %v1517_v10  ;;  %v1540_v14 = vadd.f32 %v1539_v21, %v1538_v38  ;;  %v1731_v38 = vadd.f32 1e-07, %v3383_v0 }
 0x26b   : > { %v1541_v61 = vrot.slane %v1540_v14, 1 }
 0x26d   : > { %v1542_v12 = vadd.f32 %v1541_v61, %v1540_v14  ;;  %v1732_v61 = vadd.f32 1e-07, %v3386_v17 }
 0x26f   : > { %v3432_v44 = vadd.f32 %v1542_v12, %v1319_v63 }
 0x270   : > { %v2482_v22 = vpop.eup %2481 }
 0x271   : > { %v1525_v16 = vmul.f32 0.6931472, %v2482_v22  ;;  %v2484_v57 = vpop.eup %2483 }
 0x272   : > { %v1521_v25 = vmul.f32 0.6931472, %v2484_v57 }
 0x273   : > { %v2486_v23 = vpop.eup %2485  ;;  %v1528_v32 = vand.u32 2147483647, %v1525_v16  ;;  %v1328_v16 = vadd.f32 %v1327_v60, %v1326_v54 }
 0x274   : > { %v1523_v26 = vmul.f32 0.6931472, %v2486_v23  ;;  %v1526_v4 = vand.u32 2147483647, %v1521_v25 }
 0x275   : > { %v1531_v8 = vsel %vm1495_vm3, %v1528_v32, 0.0 }
 0x276   : > { %v2351_v7 = vpop.f32.mrb[40].mxu1  ;;  %v1527_v20 = vand.u32 2147483647, %v1523_v26  ;;  %v1529_v5 = vsel %vm1493_vm4, %v1526_v4, 0.0 }
 0x277   : > { %v1721_v34 = vsub.f32 %v3377_v47, %v2351_v7  ;;  %v1736_v24 = vadd.f32 1e-07, %v2351_v7  ;;  %v1699_v39 = vpop.f32.mrb[41].mxu1 }
 0x278   : > { %v1719_v41 = vsub.f32 %v3383_v0, %v1699_v39  ;;  %v1734_v56 = vadd.f32 1e-07, %v1699_v39  ;;  %v2352_v59 = vpop.f32.mrb[42].mxu1  ;;  %v1530_v37 = vsel %vm1494_vm5, %v1527_v20, 0.0 }
 0x279   : > { %2487 = vrcp.f32 %v1736_v24  ;;  %v1702_v11 = vpop.f32.mrb[43].mxu1  ;;  %v1544_v15 = vadd.f32 %v1530_v37, %v1529_v5  ;;  %v1730_v30 = vsel %vm1718_vm7, %v1721_v34, 0.0  ;;  %v3470_v24 = vadd.s32 3, %v3375_v42 }
 0x27a   : > { %2489 = vrcp.f32 %v1734_v56  ;;  %v1728_v18 = vsel %vm1716_vm6, %v1719_v41, 0.0  ;;  %v1720_v27 = vsub.f32 %v3386_v17, %v1702_v11  ;;  %v1735_v19 = vadd.f32 1e-07, %v1702_v11 }
 0x27b   : > { %v1545_v3 = vadd.f32 %v1544_v15, %v1531_v8  ;;  %v1755_v45 = vmul.f32 %v1728_v18, %v1728_v18  ;;  %v1757_v51 = vmul.f32 %v1730_v30, %v1730_v30  ;;  %v3473_v59 = vadd.s32 3, %v3379_v49 }
 0x27c   : > { %v1729_v35 = vsel %vm1717_vm8, %v1720_v27, 0.0  ;;  %2491 = vrcp.f32 %v1735_v19  ;;  %v3476_v5 = vadd.s32 3, %v3381_v50  ;;  %vm1939_vm9 = vcmp.lt.s32.totalorder %v3470_v24, 65 }
 0x27d   : > { %v1546_v36 = vrot.slane %v1545_v3, 4  ;;  %v1756_v43 = vmul.f32 %v1729_v35, %v1729_v35  ;;  %vm1941_vm10 = vcmp.lt.s32.totalorder %v3473_v59, 65 }
 0x27e   : > { %vm1940_vm11 = vcmp.lt.s32.totalorder %v3476_v5, 65 }
 0x27f   : > { %v1547_v46 = vadd.f32 %v1546_v36, %v1545_v3  ;;  %v1758_v52 = vadd.f32 %v1756_v43, %v1755_v45 }
 0x281   : > { %v1548_v2 = vrot.slane %v1547_v46, 2  ;;  %v1759_v9 = vadd.f32 %v1758_v52, %v1757_v51  ;;  %v1956_v52 = vadd.f32 1e-07, %v3402_v1 }
 0x283   : > { %v2488_v28 = vpop.eup %2487  ;;  %v1549_v10 = vadd.f32 %v1548_v2, %v1547_v46  ;;  %v1760_v55 = vrot.slane %v1759_v9, 4 }
 0x284   : > { %v2490_v53 = vpop.eup %2489  ;;  %v1742_v21 = vmul.f32 %v2488_v28, %v1733_v62  ;;  %v1954_v28 = vadd.f32 1e-07, %v3410_v33 }
 0x285   : > { %v1738_v14 = vmul.f32 %v2490_v53, %v1731_v38  ;;  %v1550_v63 = vrot.slane %v1549_v10, 1  ;;  %v1761_v12 = vadd.f32 %v1760_v55, %v1759_v9  ;;  %v1955_v55 = vadd.f32 1e-07, %v3418_v48 }
 0x286   : > { %2493 = vlog2.f32 %v1742_v21  ;;  %v2492_v22 = vpop.eup %2491 }
 0x287   : > { %2495 = vlog2.f32 %v1738_v14  ;;  %v1551_v47 = vadd.f32 %v1550_v63, %v1549_v10  ;;  %v1740_v57 = vmul.f32 %v2492_v22, %v1732_v61  ;;  %v1762_v23 = vrot.slane %v1761_v12, 2 }
 0x289   : > { %v3464_v58 = vadd.f32 %v1551_v47, %v1328_v16  ;;  %2497 = vlog2.f32 %v1740_v57  ;;  %v1763_v0 = vadd.f32 %v1762_v23, %v1761_v12 }
 0x28b   : > { %v1764_v25 = vrot.slane %v1763_v0, 1 }
 0x28d   : > { %v1765_v26 = vadd.f32 %v1764_v25, %v1763_v0 }
 0x28f   : > { %v3467_v4 = vadd.f32 %v1765_v26, %v3432_v44 }
 0x290   : > { %v2494_v32 = vpop.eup %2493 }
 0x291   : > { %v2496_v17 = vpop.eup %2495  ;;  %v1748_v7 = vmul.f32 0.6931472, %v2494_v32 }
 0x292   : > { %v1744_v20 = vmul.f32 0.6931472, %v2496_v17 }
 0x293   : > { %v2498_v34 = vpop.eup %2497  ;;  %v1751_v41 = vand.u32 2147483647, %v1748_v7 }
 0x294   : > { %v1749_v39 = vand.u32 2147483647, %v1744_v20  ;;  %v1746_v40 = vmul.f32 0.6931472, %v2498_v34 }
 0x295   : > { %v1754_v29 = vsel %vm1718_vm7, %v1751_v41, 0.0 }
 0x296   : > { %v2391_v56 = vpop.f32.mrb[44].mxu1  ;;  %v1750_v37 = vand.u32 2147483647, %v1746_v40  ;;  %v1752_v27 = vsel %vm1716_vm6, %v1749_v39, 0.0 }
 0x297   : > { %v1944_v44 = vsub.f32 %v3402_v1, %v2391_v56  ;;  %v1959_v11 = vadd.f32 1e-07, %v2391_v56  ;;  %v1922_v15 = vpop.f32.mrb[45].mxu1 }
 0x298   : > { %v1942_v42 = vsub.f32 %v3410_v33, %v1922_v15  ;;  %v1957_v8 = vadd.f32 1e-07, %v1922_v15  ;;  %v2392_v18 = vpop.f32.mrb[46].mxu1  ;;  %v1753_v49 = vsel %vm1717_vm8, %v1750_v37, 0.0 }
 0x299   : > { %2499 = vrcp.f32 %v1959_v11  ;;  %v1925_v50 = vpop.f32.mrb[47].mxu1  ;;  %v1767_v19 = vadd.f32 %v1753_v49, %v1752_v27  ;;  %v1953_v13 = vsel %vm1941_vm10, %v1944_v44, 0.0 }
 0x29a   : > { %2501 = vrcp.f32 %v1957_v8  ;;  %v1951_v3 = vsel %vm1939_vm9, %v1942_v42, 0.0  ;;  %v1943_v6 = vsub.f32 %v3418_v48, %v1925_v50  ;;  %v1958_v30 = vadd.f32 1e-07, %v1925_v50 }
 0x29b   : > { %v1768_v35 = vadd.f32 %v1767_v19, %v1754_v29  ;;  %v1978_v43 = vmul.f32 %v1951_v3, %v1951_v3  ;;  %v1980_v31 = vmul.f32 %v1953_v13, %v1953_v13 }
 0x29c   : > { %v1952_v36 = vsel %vm1940_vm11, %v1943_v6, 0.0  ;;  %2503 = vrcp.f32 %v1958_v30 }
 0x29d   : > { %v1769_v45 = vrot.slane %v1768_v35, 4  ;;  %v1979_v54 = vmul.f32 %v1952_v36, %v1952_v36 }
 0x29f   : > { %v1770_v46 = vadd.f32 %v1769_v45, %v1768_v35  ;;  %v1981_v51 = vadd.f32 %v1979_v54, %v1978_v43 }
 0x2a1   : > { %v1771_v62 = vrot.slane %v1770_v46, 2  ;;  %v1982_v2 = vadd.f32 %v1981_v51, %v1980_v31 }
 0x2a3   : > { %v2500_v9 = vpop.eup %2499  ;;  %v1772_v53 = vadd.f32 %v1771_v62, %v1770_v46  ;;  %v1983_v10 = vrot.slane %v1982_v2, 4 }
 0x2a4   : > { %v2502_v38 = vpop.eup %2501  ;;  %v1965_v60 = vmul.f32 %v2500_v9, %v1956_v52 }
 0x2a5   : > { %v1961_v21 = vmul.f32 %v2502_v38, %v1954_v28  ;;  %v1773_v14 = vrot.slane %v1772_v53, 1  ;;  %v1984_v61 = vadd.f32 %v1983_v10, %v1982_v2 }
 0x2a6   : > { %2505 = vlog2.f32 %v1965_v60  ;;  %v2504_v63 = vpop.eup %2503 }
 0x2a7   : > { %2507 = vlog2.f32 %v1961_v21  ;;  %v1774_v12 = vadd.f32 %v1773_v14, %v1772_v53  ;;  %v1963_v1 = vmul.f32 %v2504_v63, %v1955_v55  ;;  %v1985_v22 = vrot.slane %v1984_v61, 2 }
 0x2a9   : > { %v1775_v16 = vadd.f32 %v1774_v12, %v3464_v58  ;;  %2509 = vlog2.f32 %v1963_v1  ;;  %v1986_v33 = vadd.f32 %v1985_v22, %v1984_v61 }
 0x2ab   : > { %v1987_v47 = vrot.slane %v1986_v33, 1 }
 0x2ad   : > { %v1988_v57 = vadd.f32 %v1987_v47, %v1986_v33 }
 0x2af   : > { %v1989_v0 = vadd.f32 %v1988_v57, %v3467_v4 }
 0x2b0   : > { %v2506_v23 = vpop.eup %2505 }
 0x2b1   : > { %v2508_v25 = vpop.eup %2507  ;;  %2000 = vst [vmem:[%s3372_s9] sm:$0x1] %v1989_v0  ;;  %v1971_v26 = vmul.f32 0.6931472, %v2506_v23 }
 0x2b2   : > { %v1967_v48 = vmul.f32 0.6931472, %v2508_v25 }
 0x2b3   : > { %v2510_v32 = vpop.eup %2509  ;;  %v1974_v20 = vand.u32 2147483647, %v1971_v26 }
 0x2b4   : > { %v1972_v17 = vand.u32 2147483647, %v1967_v48  ;;  %v1969_v7 = vmul.f32 0.6931472, %v2510_v32 }
 0x2b5   : > { %v1977_v4 = vsel %vm1941_vm10, %v1974_v20, 0.0 }
 0x2b6   : > { %v1973_v34 = vand.u32 2147483647, %v1969_v7  ;;  %v1975_v58 = vsel %vm1939_vm9, %v1972_v17, 0.0 }
 0x2b8   : > { %v1976_v39 = vsel %vm1940_vm11, %v1973_v34, 0.0 }
 0x2b9   : > { %v1990_v40 = vadd.f32 %v1976_v39, %v1975_v58 }
 0x2bb   : > { %v1991_v41 = vadd.f32 %v1990_v40, %v1977_v4 }
 0x2bd   : > { %v1992_v56 = vrot.slane %v1991_v41, 4 }
 0x2bf   : > { %v1993_v37 = vadd.f32 %v1992_v56, %v1991_v41 }
 0x2c1   : > { %v1994_v44 = vrot.slane %v1993_v37, 2 }
 0x2c3   : > { %v1995_v11 = vadd.f32 %v1994_v44, %v1993_v37 }
 0x2c5   : > { %v1996_v15 = vrot.slane %v1995_v11, 1 }
 0x2c7   : > { %v1997_v42 = vadd.f32 %v1996_v15, %v1995_v11 }
 0x2c9   : > { %v1998_v8 = vadd.f32 %v1997_v42, %v1775_v16 }
 0x2cb   : > { %2001 = vst [vmem:[%s3372_s9 + $0x1] sm:$0x1] %v1998_v8 }
 0x2cc PF: > { %s14_s15 = sadd.s32 1, %s2517_s15  }
 0x2cd   : > { %p11_p5 = scmp.ge.s32.totalorder %s14_s15, 6  }
 0x2cf   :  { %13 = sbr.rel (!%p11_p5) target bundleno = 1 (0x1), region = 69 }

// kernel: audio_distance.3
= control target key start
LH: loop header
LB: loop body
LE: loop exit
PB: predicated region body
PF: predicated region fallthrough
CT: control target
= control target key end

     0   :  { %s2689_s15 = smov 0   ;;  %s3910_s0 = inlined_call_operand.vmem [shape: bf16[64,256], index: 0, kind: input, shape index: {}]   ;;  %s3911_s1 = inlined_call_operand.vmem [shape: bf16[64,256], index: 1, kind: input, shape index: {}]   ;;  %s3912_s2 = inlined_call_operand.vmem [shape: bf16[256,1024], index: 2, kind: input, shape index: {}]   ;;  %s3913_s3 = inlined_call_operand.vmem [shape: bf16[128,128], index: 3, kind: input, shape index: {}]   ;;  %s3914_s4 = inlined_call_operand.vmem [shape: f32[32,128], index: 4, kind: output, shape index: {}]  }
   0x1 LB: > { %s2695_s16 = sadd.s32 4294967295, %s2660_s15   ;;  %p2182_p0 = scmp.ge.s32.totalorder %s2660_s15, 1  ;;  %s2660_s15 = sphi %s2689_s15, %s14_s15  }
   0x2   : > { %p176_p1 = scmp.lt.s32.totalorder %s2660_s15, 5 }
   0x4   : > { %p177_p2 = pnand %p2182_p0, %p176_p1 }
   0x6   : > { %180 = sbr.rel (%p177_p2) target bundleno = 803 (0x323), region = 36 }
   0xd   : > { %v227_v0 = vld [vmem:[%s3912_s2] sm:$0xff]  ;;  %v228_v9 = vld [vmem:[%s3912_s2 + $0x8] sm:$0xff]  ;;  %s2183_s5 = sshll.u32 %s2695_s16, 1  ;;  %vm2663_vm0 = vmmov 0   ;;  %p222_p4 = scmp.lt.s32.totalorder %s2695_s16, 3 }
   0xe   : > { %v231_v1 = vld [vmem:[%s3912_s2 + $0x20] sm:$0xff]  ;;  %v232_v10 = vld [vmem:[%s3912_s2 + $0x28] sm:$0xff]  ;;  %p2755_p3 = scmp.lt.s32.totalorder %s2183_s5, 7 }
   0xf   : > { %v235_v2 = vld [vmem:[%s3912_s2 + $0x40] sm:$0xff]  ;;  %v2708_v3 = vcombine.high %v227_v0, %v231_v1  ;;  %v2710_v4 = vcombine.low %v227_v0, %v231_v1  ;;  %v2734_v12 = vcombine.high %v228_v9, %v232_v10  ;;  %v2736_v13 = vcombine.low %v228_v9, %v232_v10  ;;  %v236_v14 = vld [vmem:[%s3912_s2 + $0x48] sm:$0xff]  ;;  %s4132_s16 = smov (!%p222_p4, %s2695_s16), 3 }
  0x10   : > { %v239_v5 = vld [vmem:[%s3912_s2 + $0x60] sm:$0xff]  ;;  %v240_v15 = vld [vmem:[%s3912_s2 + $0x68] sm:$0xff]  ;;  %s4130_s5 = smov (!%p2755_p3, %s2183_s5), 7  ;;  %s2189_s27 = sshll.u32 %s4132_s16, 3 }
  0x11   : > { %v2715_v6 = vcombine.high %v235_v2, %v239_v5  ;;  %v243_v7 = vld [vmem:[%s3912_s2 + $0x80] sm:$0xff]  ;;  %1023 = vmatprep.subr.bf16.mxu0 %v2708_v3  ;;  %v2732_v11 = vcombine.low %v235_v2, %v239_v5  ;;  %v2747_v17 = vcombine.high %v236_v14, %v240_v15  ;;  %v244_v18 = vld [vmem:[%s3912_s2 + $0x88] sm:$0xff]  ;;  %1066 = vmatprep.subr.bf16.mxu1 %v2734_v12  ;;  %s2332_s10 = sshll.u32 %s4130_s5, 3  ;;  %s3852_s30 = scalar_lea.vmem %s3914_s4, %s2189_s27 }
  0x12   : > { %v247_v8 = vld [vmem:[%s3912_s2 + $0xa0] sm:$0xff]  ;;  %1024 = vmatpush1.bf16.msra.mxu0 %v2710_v4  ;;  %v248_v19 = vld [vmem:[%s3912_s2 + $0xa8] sm:$0xff]  ;;  %1067 = vmatpush1.bf16.msra.mxu1 %v2736_v13  ;;  %v2767_v22 = vcombine.low %v236_v14, %v240_v15  ;;  %s2833_s19 = scalar_lea.vmem %s3910_s0, %s2332_s10  ;;  %s3130_s9 = scalar_lea.vmem %s3911_s1, %s2332_s10 }
  0x13   : > { %1025 = vmatprep.subr.bf16.mxu0 %v2715_v6  ;;  %v2745_v16 = vcombine.high %v243_v7, %v247_v8  ;;  %v251_v20 = vld [vmem:[%s3912_s2 + $0xc0] sm:$0xff]  ;;  %v2770_v23 = vcombine.low %v243_v7, %v247_v8  ;;  %1068 = vmatprep.subr.bf16.mxu1 %v2747_v17  ;;  %v2773_v24 = vcombine.high %v244_v18, %v248_v19  ;;  %v252_v26 = vld [vmem:[%s3912_s2 + $0xc8] sm:$0xff] }
  0x14   : > { %v255_v21 = vld [vmem:[%s3912_s2 + $0xe0] sm:$0xff]  ;;  %v256_v27 = vld [vmem:[%s3912_s2 + $0xe8] sm:$0xff]  ;;  %v2795_v30 = vcombine.low %v244_v18, %v248_v19 }
  0x15   : > { %v2776_v25 = vcombine.high %v251_v20, %v255_v21  ;;  %v259_v28 = vld [vmem:[%s3912_s2 + $0x100] sm:$0xff]  ;;  %v2798_v31 = vcombine.low %v251_v20, %v255_v21  ;;  %v2801_v32 = vcombine.high %v252_v26, %v256_v27  ;;  %v260_v34 = vld [vmem:[%s3912_s2 + $0x108] sm:$0xff]  ;;  %v2820_v38 = vcombine.low %v252_v26, %v256_v27 }
  0x16   : > { %1026 = vmatpush1.bf16.msra.mxu0 %v2732_v11  ;;  %v263_v29 = vld [vmem:[%s3912_s2 + $0x120] sm:$0xff]  ;;  %1069 = vmatpush1.bf16.msra.mxu1 %v2767_v22  ;;  %v264_v35 = vld [vmem:[%s3912_s2 + $0x128] sm:$0xff] }
  0x17   : > { %1027 = vmatprep.subr.bf16.mxu0 %v2745_v16  ;;  %1070 = vmatprep.subr.bf16.mxu1 %v2773_v24  ;;  %v2804_v33 = vcombine.high %v259_v28, %v263_v29  ;;  %v267_v36 = vld [vmem:[%s3912_s2 + $0x140] sm:$0xff]  ;;  %v2823_v39 = vcombine.low %v259_v28, %v263_v29  ;;  %v2826_v40 = vcombine.high %v260_v34, %v264_v35  ;;  %v268_v42 = vld [vmem:[%s3912_s2 + $0x148] sm:$0xff] }
  0x18   : > { %v271_v37 = vld [vmem:[%s3912_s2 + $0x160] sm:$0xff]  ;;  %v272_v43 = vld [vmem:[%s3912_s2 + $0x168] sm:$0xff]  ;;  %v2851_v46 = vcombine.low %v260_v34, %v264_v35 }
  0x19   : > { %v2836_v41 = vcombine.high %v267_v36, %v271_v37  ;;  %v275_v44 = vld [vmem:[%s3912_s2 + $0x180] sm:$0xff]  ;;  %v2857_v48 = vcombine.low %v267_v36, %v271_v37  ;;  %v2860_v49 = vcombine.high %v268_v42, %v272_v43  ;;  %v276_v51 = vld [vmem:[%s3912_s2 + $0x188] sm:$0xff]  ;;  %v2880_v55 = vcombine.low %v268_v42, %v272_v43 }
  0x1a   : > { %1028 = vmatpush1.bf16.msra.mxu0 %v2770_v23  ;;  %1071 = vmatpush1.bf16.msra.mxu1 %v2795_v30  ;;  %v279_v45 = vld [vmem:[%s3912_s2 + $0x1a0] sm:$0xff]  ;;  %v280_v52 = vld [vmem:[%s3912_s2 + $0x1a8] sm:$0xff] }
  0x1b   : > { %1029 = vmatprep.subr.bf16.mxu0 %v2776_v25  ;;  %1072 = vmatprep.subr.bf16.mxu1 %v2801_v32  ;;  %v2854_v47 = vld [vmem:[%s2833_s19 + $0x4] ss:$8 sps:$4 sm:$0xff]   ;;  %v2863_v50 = vcombine.high %v275_v44, %v279_v45  ;;  %v2883_v56 = vcombine.low %v275_v44, %v279_v45  ;;  %v2886_v57 = vcombine.high %v276_v51, %v280_v52 }
  0x1c   : > { %1055 = vmatprep.mubr.bf16.mxu0 %v2854_v47  ;;  %v283_v53 = vld [vmem:[%s3912_s2 + $0x1c0] sm:$0xff]  ;;  %1098 = vmatprep.mubr.bf16.mxu1 %v2854_v47  ;;  %v284_v59 = vld [vmem:[%s3912_s2 + $0x1c8] sm:$0xff]  ;;  %v2904_v63 = vcombine.low %v276_v51, %v280_v52 }
  0x1d   : > { %v287_v54 = vld [vmem:[%s3912_s2 + $0x1e0] sm:$0xff]  ;;  %v288_v60 = vld [vmem:[%s3912_s2 + $0x1e8] sm:$0xff] }
  0x1e   : > { %1030 = vmatpush1.bf16.msra.mxu0 %v2798_v31  ;;  %1073 = vmatpush1.bf16.msra.mxu1 %v2820_v38  ;;  %v2889_v58 = vcombine.high %v283_v53, %v287_v54  ;;  %v291_v61 = vld [vmem:[%s3912_s2 + $0x200] sm:$0xff]  ;;  %v2907_v0 = vcombine.low %v283_v53, %v287_v54  ;;  %v2910_v1 = vcombine.high %v284_v59, %v288_v60  ;;  %v292_v5 = vld [vmem:[%s3912_s2 + $0x208] sm:$0xff] }
  0x1f   : > { %1031 = vmatprep.subr.bf16.mxu0 %v2804_v33  ;;  %1074 = vmatprep.subr.bf16.mxu1 %v2826_v40  ;;  %v295_v62 = vld [vmem:[%s3912_s2 + $0x220] sm:$0xff]  ;;  %v296_v7 = vld [vmem:[%s3912_s2 + $0x228] sm:$0xff]  ;;  %v2928_v10 = vcombine.low %v284_v59, %v288_v60 }
  0x20   : > { %v2913_v2 = vcombine.high %v291_v61, %v295_v62  ;;  %v299_v8 = vld [vmem:[%s3912_s2 + $0x240] sm:$0xff]  ;;  %v2931_v14 = vcombine.low %v291_v61, %v295_v62  ;;  %v2934_v15 = vcombine.high %v292_v5, %v296_v7  ;;  %v300_v19 = vld [vmem:[%s3912_s2 + $0x248] sm:$0xff]  ;;  %v2952_v27 = vcombine.low %v292_v5, %v296_v7 }
  0x21   : > { %v303_v9 = vld [vmem:[%s3912_s2 + $0x260] sm:$0xff]  ;;  %v304_v20 = vld [vmem:[%s3912_s2 + $0x268] sm:$0xff] }
  0x22   : > { %1032 = vmatpush1.bf16.msra.mxu0 %v2823_v39  ;;  %1075 = vmatpush1.bf16.msra.mxu1 %v2851_v46  ;;  %v2937_v18 = vcombine.high %v299_v8, %v303_v9  ;;  %v307_v21 = vld [vmem:[%s3912_s2 + $0x280] sm:$0xff]  ;;  %v2955_v28 = vcombine.low %v299_v8, %v303_v9  ;;  %v2958_v29 = vcombine.high %v300_v19, %v304_v20  ;;  %v308_v35 = vld [vmem:[%s3912_s2 + $0x288] sm:$0xff] }
  0x23   : > { %1033 = vmatprep.subr.bf16.mxu0 %v2836_v41  ;;  %1076 = vmatprep.subr.bf16.mxu1 %v2860_v49  ;;  %v311_v26 = vld [vmem:[%s3912_s2 + $0x2a0] sm:$0xff]  ;;  %v312_v36 = vld [vmem:[%s3912_s2 + $0x2a8] sm:$0xff]  ;;  %v2976_v43 = vcombine.low %v300_v19, %v304_v20 }
  0x24   : > { %v2961_v34 = vcombine.high %v307_v21, %v311_v26  ;;  %v315_v37 = vld [vmem:[%s3912_s2 + $0x2c0] sm:$0xff]  ;;  %v2979_v44 = vcombine.low %v307_v21, %v311_v26  ;;  %v2982_v45 = vcombine.high %v308_v35, %v312_v36  ;;  %v316_v52 = vld [vmem:[%s3912_s2 + $0x2c8] sm:$0xff]  ;;  %v3000_v60 = vcombine.low %v308_v35, %v312_v36 }
  0x25   : > { %v319_v42 = vld [vmem:[%s3912_s2 + $0x2e0] sm:$0xff]  ;;  %v320_v53 = vld [vmem:[%s3912_s2 + $0x2e8] sm:$0xff] }
  0x26   : > { %1034 = vmatpush1.bf16.msra.mxu0 %v2857_v48  ;;  %1077 = vmatpush1.bf16.msra.mxu1 %v2880_v55  ;;  %v2985_v51 = vcombine.high %v315_v37, %v319_v42  ;;  %v323_v54 = vld [vmem:[%s3912_s2 + $0x300] sm:$0xff]  ;;  %v324_v61 = vld [vmem:[%s3912_s2 + $0x308] sm:$0xff]  ;;  %v3009_v5 = vcombine.low %v315_v37, %v319_v42  ;;  %v3018_v9 = vcombine.high %v316_v52, %v320_v53 }
  0x27   : > { %1035 = vmatprep.subr.bf16.mxu0 %v2863_v50  ;;  %1078 = vmatprep.subr.bf16.mxu1 %v2886_v57  ;;  %v327_v59 = vld [vmem:[%s3912_s2 + $0x320] sm:$0xff]  ;;  %v328_v62 = vld [vmem:[%s3912_s2 + $0x328] sm:$0xff]  ;;  %v3024_v20 = vcombine.low %v316_v52, %v320_v53 }
  0x28   : > { %3987 = vst [vmem:[#allocation2_spill] sm:$0xff] %v3009_v5  ;;  %v331_v7 = vld [vmem:[%s3912_s2 + $0x340] sm:$0xff]  ;;  %3988 = vst [vmem:[#allocation3_spill] sm:$0xff] %v3018_v9  ;;  %v3021_v19 = vcombine.high %v323_v54, %v327_v59  ;;  %v3027_v21 = vcombine.low %v323_v54, %v327_v59  ;;  %v3030_v26 = vcombine.high %v324_v61, %v328_v62  ;;  %v332_v36 = vld [vmem:[%s3912_s2 + $0x348] sm:$0xff] }
  0x29   : > { %v335_v8 = vld [vmem:[%s3912_s2 + $0x360] sm:$0xff]  ;;  %3990 = vst [vmem:[#allocation5_spill] sm:$0xff] %v3024_v20  ;;  %v336_v37 = vld [vmem:[%s3912_s2 + $0x368] sm:$0xff]  ;;  %v3048_v53 = vcombine.low %v324_v61, %v328_v62 }
  0x2a   : > { %1036 = vmatpush1.bf16.msra.mxu0 %v2883_v56  ;;  %1079 = vmatpush1.bf16.msra.mxu1 %v2904_v63  ;;  %3989 = vst [vmem:[#allocation4_spill] sm:$0xff] %v3021_v19  ;;  %3991 = vst [vmem:[#allocation6_spill] sm:$0xff] %v3027_v21  ;;  %v3033_v35 = vcombine.high %v331_v7, %v335_v8  ;;  %v339_v42 = vld [vmem:[%s3912_s2 + $0x380] sm:$0xff]  ;;  %v3051_v54 = vcombine.low %v331_v7, %v335_v8  ;;  %v344_v61 = vld [vmem:[%s3912_s2 + $0x3a8] sm:$0xff] }
  0x2b   : > { %1037 = vmatprep.subr.bf16.mxu0 %v2889_v58  ;;  %1080 = vmatprep.subr.bf16.mxu1 %v2910_v1  ;;  %3992 = vst [vmem:[#allocation7_spill] sm:$0xff] %v3030_v26  ;;  %v343_v52 = vld [vmem:[%s3912_s2 + $0x3a0] sm:$0xff]  ;;  %3994 = vst [vmem:[#allocation9_spill] sm:$0xff] %v3048_v53  ;;  %v3054_v59 = vcombine.high %v332_v36, %v336_v37  ;;  %v3072_v8 = vcombine.low %v332_v36, %v336_v37  ;;  %v352_v36 = vld [vmem:[%s3912_s2 + $0x3e8] sm:$0xff] }
  0x2c   : > { %3993 = vst [vmem:[#allocation8_spill] sm:$0xff] %v3033_v35  ;;  %3995 = vst [vmem:[#allocation10_spill] sm:$0xff] %v3051_v54  ;;  %v347_v62 = vld [vmem:[%s3912_s2 + $0x3c0] sm:$0xff]  ;;  %v229_v37 = vld [vmem:[%s3912_s2 + $0x10] sm:$0xff] }
  0x2d   : > { %3996 = vst [vmem:[#allocation11_spill] sm:$0xff] %v3054_v59  ;;  %v351_v7 = vld [vmem:[%s3912_s2 + $0x3e0] sm:$0xff]  ;;  %3998 = vst [vmem:[#allocation13_spill] sm:$0xff] %v3072_v8 }
  0x2e   : > { %1038 = vmatpush1.bf16.msra.mxu0 %v2907_v0  ;;  %1081 = vmatpush1.bf16.msra.mxu1 %v2928_v10 }
  0x2f   : > { %1039 = vmatprep.subr.bf16.mxu0 %v2913_v2  ;;  %1082 = vmatprep.subr.bf16.mxu1 %v2934_v15 }
  0x32   : > { %1040 = vmatpush1.bf16.msra.mxu0 %v2931_v14  ;;  %1083 = vmatpush1.bf16.msra.mxu1 %v2952_v27 }
  0x33   : > { %1041 = vmatprep.subr.bf16.mxu0 %v2937_v18  ;;  %1084 = vmatprep.subr.bf16.mxu1 %v2958_v29 }
  0x36   : > { %1042 = vmatpush1.bf16.msra.mxu0 %v2955_v28  ;;  %1085 = vmatpush1.bf16.msra.mxu1 %v2976_v43 }
  0x37   : > { %1043 = vmatprep.subr.bf16.mxu0 %v2961_v34  ;;  %1086 = vmatprep.subr.bf16.mxu1 %v2982_v45 }
  0x3a   : > { %1044 = vmatpush1.bf16.msra.mxu0 %v2979_v44  ;;  %1087 = vmatpush1.bf16.msra.mxu1 %v3000_v60 }
  0x3b   : > { %1045 = vmatprep.subr.bf16.mxu0 %v2985_v51  ;;  %1088 = vmatprep.subr.bf16.mxu1 %v3018_v9  ;;  %v340_v9 = vld [vmem:[%s3912_s2 + $0x388] sm:$0xff] }
  0x3e   : > { %1046 = vmatpush1.bf16.msra.mxu0 %v3009_v5  ;;  %1089 = vmatpush1.bf16.msra.mxu1 %v3024_v20  ;;  %v348_v20 = vld [vmem:[%s3912_s2 + $0x3c8] sm:$0xff]  ;;  %v246_v5 = vld [vmem:[%s3912_s2 + $0x98] sm:$0xff] }
  0x3f   : > { %1047 = vmatprep.subr.bf16.mxu0 %v3021_v19  ;;  %1090 = vmatprep.subr.bf16.mxu1 %v3030_v26  ;;  %v3057_v19 = vcombine.high %v339_v42, %v343_v52  ;;  %v3078_v26 = vcombine.high %v340_v9, %v344_v61 }
  0x41   : > { %3997 = vst [vmem:[#allocation12_spill] sm:$0xff] %v3057_v19  ;;  %4000 = vst [vmem:[#allocation15_spill] sm:$0xff] %v3078_v26 }
  0x42   : > { %1048 = vmatpush1.bf16.msra.mxu0 %v3027_v21  ;;  %1091 = vmatpush1.bf16.msra.mxu1 %v3048_v53  ;;  %v3081_v21 = vcombine.high %v347_v62, %v351_v7  ;;  %v230_v53 = vld [vmem:[%s3912_s2 + $0x18] sm:$0xff] }
  0x43   : > { %1049 = vmatprep.subr.bf16.mxu0 %v3033_v35  ;;  %v3075_v35 = vcombine.low %v339_v42, %v343_v52  ;;  %1092 = vmatprep.subr.bf16.mxu1 %v3054_v59  ;;  %v233_v42 = vld [vmem:[%s3912_s2 + $0x30] sm:$0xff]  ;;  %v3096_v52 = vcombine.low %v340_v9, %v344_v61  ;;  %v3102_v59 = vcombine.high %v348_v20, %v352_v36  ;;  %v234_v9 = vld [vmem:[%s3912_s2 + $0x38] sm:$0xff] }
  0x44   : > { %4001 = vst [vmem:[#allocation16_spill] sm:$0xff] %v3081_v21  ;;  %v237_v61 = vld [vmem:[%s3912_s2 + $0x50] sm:$0xff] }
  0x45   : > { %3999 = vst [vmem:[#allocation14_spill] sm:$0xff] %v3075_v35  ;;  %4002 = vst [vmem:[#allocation17_spill] sm:$0xff] %v3096_v52 }
  0x46   : > { %1050 = vmatpush1.bf16.msra.mxu0 %v3051_v54  ;;  %1093 = vmatpush1.bf16.msra.mxu1 %v3072_v8  ;;  %4004 = vst [vmem:[#allocation19_spill] sm:$0xff] %v3102_v59  ;;  %v3105_v54 = vcombine.high %v229_v37, %v233_v42 }
  0x47   : > { %1051 = vmatprep.subr.bf16.mxu0 %v3057_v19  ;;  %v3099_v19 = vcombine.low %v347_v62, %v351_v7  ;;  %1094 = vmatprep.subr.bf16.mxu1 %v3078_v26  ;;  %v241_v62 = vld [vmem:[%s3912_s2 + $0x70] sm:$0xff]  ;;  %v3120_v7 = vld [vmem:[%s2833_s19] ss:$8 sps:$4 sm:$0xff]   ;;  %v3133_v26 = vcombine.low %v229_v37, %v233_v42 }
  0x48   : > { %4005 = vst [vmem:[#allocation20_spill] sm:$0xff] %v3105_v54  ;;  %v3139_v8 = vcombine.high %v237_v61, %v241_v62  ;;  %v245_v37 = vld [vmem:[%s3912_s2 + $0x90] sm:$0xff] }
  0x49   : > { %4003 = vst [vmem:[#allocation18_spill] sm:$0xff] %v3099_v19  ;;  %4006 = vst [vmem:[#allocation21_spill] sm:$0xff] %v3133_v26  ;;  %v249_v42 = vld [vmem:[%s3912_s2 + $0xb0] sm:$0xff] }
  0x4a   : > { %1052 = vmatpush1.bf16.msra.mxu0 %v3075_v35  ;;  %1095 = vmatpush1.bf16.msra.mxu1 %v3096_v52  ;;  %v3136_v35 = vcombine.high %v230_v53, %v234_v9  ;;  %4008 = vst [vmem:[#allocation23_spill] sm:$0xff] %v3139_v8  ;;  %v3164_v52 = vcombine.high %v245_v37, %v249_v42 }
  0x4b   : > { %1053 = vmatprep.subr.bf16.mxu0 %v3081_v21  ;;  %v3123_v21 = vcombine.low %v348_v20, %v352_v36  ;;  %1096 = vmatprep.subr.bf16.mxu1 %v3102_v59  ;;  %v238_v20 = vld [vmem:[%s3912_s2 + $0x58] sm:$0xff]  ;;  %v3158_v59 = vcombine.low %v237_v61, %v241_v62  ;;  %v257_v61 = vld [vmem:[%s3912_s2 + $0xf0] sm:$0xff] }
  0x4c   : > { %4007 = vst [vmem:[#allocation22_spill] sm:$0xff] %v3136_v35  ;;  %v242_v36 = vld [vmem:[%s3912_s2 + $0x78] sm:$0xff]  ;;  %4012 = vst [vmem:[#allocation27_spill] sm:$0xff] %v3164_v52 }
  0x4d   : > { %4010 = vst [vmem:[#allocation25_spill] sm:$0xff] %v3158_v59  ;;  %v3181_v62 = vcombine.low %v238_v20, %v242_v36 }
  0x4e   : > { %1054 = vmatpush1.bf16.msra.mxu0 %v3099_v19  ;;  %1097 = vmatpush1.bf16.msra.mxu1 %v3123_v21  ;;  %v3161_v19 = vcombine.high %v238_v20, %v242_v36  ;;  %v261_v20 = vld [vmem:[%s3912_s2 + $0x110] sm:$0xff] }
  0x4f   : > { %1109 = vmatprep.subr.bf16.mxu0 %v3105_v54  ;;  %v3155_v54 = vcombine.low %v230_v53, %v234_v9  ;;  %1152 = vmatprep.subr.bf16.mxu1 %v3136_v35  ;;  %v250_v53 = vld [vmem:[%s3912_s2 + $0xb8] sm:$0xff]  ;;  %v253_v9 = vld [vmem:[%s3912_s2 + $0xd0] sm:$0xff]  ;;  %4013 = vst [vmem:[#allocation28_spill] sm:$0xff] %v3181_v62 }
  0x50   : > { %4011 = vst [vmem:[#allocation26_spill] sm:$0xff] %v3161_v19  ;;  %v3188_v35 = vcombine.high %v246_v5, %v250_v53  ;;  %v265_v36 = vld [vmem:[%s3912_s2 + $0x130] sm:$0xff] }
  0x51   : > { %1056 = vmatmul.mubr.bf16.vlgmr.msra.gmra.mrb[0].mxu0 %v3120_v7  ;;  %4009 = vst [vmem:[#allocation24_spill] sm:$0xff] %v3155_v54  ;;  %1099 = vmatmul.mubr.bf16.vlgmr.msra.gmra.mrb[0].mxu1 %v3120_v7 }
  0x52   : > { %1110 = vmatpush1.bf16.msra.mxu0 %v3133_v26  ;;  %1141 = vmatprep.mubr.bf16.mxu0 %v2854_v47  ;;  %4015 = vst [vmem:[#allocation30_spill] sm:$0xff] %v3188_v35  ;;  %v3191_v26 = vcombine.high %v253_v9, %v257_v61 }
  0x53   : > { %1111 = vmatprep.subr.bf16.mxu0 %v3139_v8  ;;  %1153 = vmatpush1.bf16.msra.mxu1 %v3155_v54  ;;  %v3185_v8 = vcombine.low %v245_v37, %v249_v42  ;;  %v254_v54 = vld [vmem:[%s3912_s2 + $0xd8] sm:$0xff]  ;;  %v3206_v37 = vcombine.low %v246_v5, %v250_v53  ;;  %v3209_v42 = vcombine.low %v253_v9, %v257_v61  ;;  %v269_v53 = vld [vmem:[%s3912_s2 + $0x150] sm:$0xff] }
  0x54   : > { %1184 = vmatprep.mubr.bf16.mxu1 %v2854_v47  ;;  %1154 = vmatprep.subr.bf16.mxu1 %v3161_v19  ;;  %4016 = vst [vmem:[#allocation31_spill] sm:$0xff] %v3191_v26  ;;  %v258_v47 = vld [vmem:[%s3912_s2 + $0xf8] sm:$0xff]  ;;  %v3215_v19 = vcombine.high %v261_v20, %v265_v36  ;;  %v273_v9 = vld [vmem:[%s3912_s2 + $0x170] sm:$0xff] }
  0x55   : > { %4014 = vst [vmem:[#allocation29_spill] sm:$0xff] %v3185_v8  ;;  %4017 = vst [vmem:[#allocation32_spill] sm:$0xff] %v3206_v37  ;;  %v266_v5 = vld [vmem:[%s3912_s2 + $0x138] sm:$0xff]  ;;  %v3230_v61 = vcombine.low %v254_v54, %v258_v47 }
  0x56   : > { %1112 = vmatpush1.bf16.msra.mxu0 %v3158_v59  ;;  %4018 = vst [vmem:[#allocation33_spill] sm:$0xff] %v3209_v42  ;;  %4020 = vst [vmem:[#allocation35_spill] sm:$0xff] %v3215_v19  ;;  %v262_v59 = vld [vmem:[%s3912_s2 + $0x118] sm:$0xff] }
  0x57   : > { %1113 = vmatprep.subr.bf16.mxu0 %v3164_v52  ;;  %1155 = vmatpush1.bf16.msra.mxu1 %v3181_v62  ;;  %v3212_v52 = vcombine.high %v254_v54, %v258_v47  ;;  %4021 = vst [vmem:[#allocation36_spill] sm:$0xff] %v3230_v61  ;;  %v270_v62 = vld [vmem:[%s3912_s2 + $0x158] sm:$0xff]  ;;  %v277_v47 = vld [vmem:[%s3912_s2 + $0x190] sm:$0xff] }
  0x58   : > { %1156 = vmatprep.subr.bf16.mxu1 %v3188_v35  ;;  %v3236_v35 = vcombine.high %v262_v59, %v266_v5  ;;  %v274_v54 = vld [vmem:[%s3912_s2 + $0x178] sm:$0xff] }
  0x59   : > { %4019 = vst [vmem:[#allocation34_spill] sm:$0xff] %v3212_v52 }
  0x5a   : > { %1114 = vmatpush1.bf16.msra.mxu0 %v3185_v8  ;;  %4023 = vst [vmem:[#allocation38_spill] sm:$0xff] %v3236_v35  ;;  %v3239_v8 = vcombine.high %v269_v53, %v273_v9 }
  0x5b   : > { %1115 = vmatprep.subr.bf16.mxu0 %v3191_v26  ;;  %1157 = vmatpush1.bf16.msra.mxu1 %v3206_v37  ;;  %v3233_v26 = vcombine.low %v261_v20, %v265_v36  ;;  %v281_v20 = vld [vmem:[%s3912_s2 + $0x1b0] sm:$0xff]  ;;  %v3254_v36 = vcombine.low %v262_v59, %v266_v5  ;;  %v278_v37 = vld [vmem:[%s3912_s2 + $0x198] sm:$0xff] }
  0x5c   : > { %1158 = vmatprep.subr.bf16.mxu1 %v3212_v52  ;;  %4024 = vst [vmem:[#allocation39_spill] sm:$0xff] %v3239_v8  ;;  %v3260_v52 = vcombine.high %v270_v62, %v274_v54  ;;  %v282_v59 = vld [vmem:[%s3912_s2 + $0x1b8] sm:$0xff]  ;;  %v285_v5 = vld [vmem:[%s3912_s2 + $0x1d0] sm:$0xff] }
  0x5d   : > { %4022 = vst [vmem:[#allocation37_spill] sm:$0xff] %v3233_v26  ;;  %4025 = vst [vmem:[#allocation40_spill] sm:$0xff] %v3254_v36 }
  0x5e   : > { %1116 = vmatpush1.bf16.msra.mxu0 %v3209_v42  ;;  %4027 = vst [vmem:[#allocation42_spill] sm:$0xff] %v3260_v52  ;;  %v3263_v42 = vcombine.high %v277_v47, %v281_v20 }
  0x5f   : > { %1117 = vmatprep.subr.bf16.mxu0 %v3215_v19  ;;  %1159 = vmatpush1.bf16.msra.mxu1 %v3230_v61  ;;  %v3257_v19 = vcombine.low %v269_v53, %v273_v9  ;;  %v289_v53 = vld [vmem:[%s3912_s2 + $0x1f0] sm:$0xff]  ;;  %v3278_v9 = vcombine.low %v270_v62, %v274_v54  ;;  %v286_v61 = vld [vmem:[%s3912_s2 + $0x1d8] sm:$0xff] }
  0x60   : > { %1160 = vmatprep.subr.bf16.mxu1 %v3236_v35  ;;  %4028 = vst [vmem:[#allocation43_spill] sm:$0xff] %v3263_v42  ;;  %v3284_v35 = vcombine.high %v278_v37, %v282_v59  ;;  %v290_v62 = vld [vmem:[%s3912_s2 + $0x1f8] sm:$0xff]  ;;  %v293_v54 = vld [vmem:[%s3912_s2 + $0x210] sm:$0xff] }
  0x61   : > { %4026 = vst [vmem:[#allocation41_spill] sm:$0xff] %v3257_v19  ;;  %4029 = vst [vmem:[#allocation44_spill] sm:$0xff] %v3278_v9 }
  0x62   : > { %1118 = vmatpush1.bf16.msra.mxu0 %v3233_v26  ;;  %4031 = vst [vmem:[#allocation46_spill] sm:$0xff] %v3284_v35  ;;  %v3287_v26 = vcombine.high %v285_v5, %v289_v53 }
  0x63   : > { %1119 = vmatprep.subr.bf16.mxu0 %v3239_v8  ;;  %1161 = vmatpush1.bf16.msra.mxu1 %v3254_v36  ;;  %v3281_v8 = vcombine.low %v277_v47, %v281_v20  ;;  %v297_v47 = vld [vmem:[%s3912_s2 + $0x230] sm:$0xff]  ;;  %v3302_v20 = vcombine.low %v278_v37, %v282_v59  ;;  %v294_v36 = vld [vmem:[%s3912_s2 + $0x218] sm:$0xff] }
  0x64   : > { %1162 = vmatprep.subr.bf16.mxu1 %v3260_v52  ;;  %4032 = vst [vmem:[#allocation47_spill] sm:$0xff] %v3287_v26  ;;  %v3308_v52 = vcombine.high %v286_v61, %v290_v62  ;;  %v298_v37 = vld [vmem:[%s3912_s2 + $0x238] sm:$0xff]  ;;  %v301_v59 = vld [vmem:[%s3912_s2 + $0x250] sm:$0xff] }
  0x65   : > { %4030 = vst [vmem:[#allocation45_spill] sm:$0xff] %v3281_v8  ;;  %4033 = vst [vmem:[#allocation48_spill] sm:$0xff] %v3302_v20 }
  0x66   : > { %1120 = vmatpush1.bf16.msra.mxu0 %v3257_v19  ;;  %4035 = vst [vmem:[#allocation50_spill] sm:$0xff] %v3308_v52  ;;  %v3311_v19 = vcombine.high %v293_v54, %v297_v47 }
  0x67   : > { %1121 = vmatprep.subr.bf16.mxu0 %v3263_v42  ;;  %1163 = vmatpush1.bf16.msra.mxu1 %v3278_v9  ;;  %v3305_v42 = vcombine.low %v285_v5, %v289_v53  ;;  %v305_v5 = vld [vmem:[%s3912_s2 + $0x270] sm:$0xff]  ;;  %v3326_v53 = vcombine.low %v286_v61, %v290_v62  ;;  %v302_v9 = vld [vmem:[%s3912_s2 + $0x258] sm:$0xff] }
  0x68   : > { %1164 = vmatprep.subr.bf16.mxu1 %v3284_v35  ;;  %4036 = vst [vmem:[#allocation51_spill] sm:$0xff] %v3311_v19  ;;  %v3332_v35 = vcombine.high %v294_v36, %v298_v37  ;;  %v306_v61 = vld [vmem:[%s3912_s2 + $0x278] sm:$0xff]  ;;  %v309_v62 = vld [vmem:[%s3912_s2 + $0x290] sm:$0xff] }
  0x69   : > { %4034 = vst [vmem:[#allocation49_spill] sm:$0xff] %v3305_v42  ;;  %4037 = vst [vmem:[#allocation52_spill] sm:$0xff] %v3326_v53 }
  0x6a   : > { %1122 = vmatpush1.bf16.msra.mxu0 %v3281_v8  ;;  %4039 = vst [vmem:[#allocation54_spill] sm:$0xff] %v3332_v35  ;;  %v3335_v8 = vcombine.high %v301_v59, %v305_v5 }
  0x6b   : > { %1123 = vmatprep.subr.bf16.mxu0 %v3287_v26  ;;  %1165 = vmatpush1.bf16.msra.mxu1 %v3302_v20  ;;  %v3329_v26 = vcombine.low %v293_v54, %v297_v47  ;;  %v313_v54 = vld [vmem:[%s3912_s2 + $0x2b0] sm:$0xff]  ;;  %v3350_v47 = vcombine.low %v294_v36, %v298_v37  ;;  %v310_v20 = vld [vmem:[%s3912_s2 + $0x298] sm:$0xff] }
  0x6c   : > { %1166 = vmatprep.subr.bf16.mxu1 %v3308_v52  ;;  %4040 = vst [vmem:[#allocation55_spill] sm:$0xff] %v3335_v8  ;;  %v3356_v52 = vcombine.high %v302_v9, %v306_v61  ;;  %v314_v36 = vld [vmem:[%s3912_s2 + $0x2b8] sm:$0xff]  ;;  %v317_v37 = vld [vmem:[%s3912_s2 + $0x2d0] sm:$0xff] }
  0x6d   : > { %4038 = vst [vmem:[#allocation53_spill] sm:$0xff] %v3329_v26  ;;  %4041 = vst [vmem:[#allocation56_spill] sm:$0xff] %v3350_v47 }
  0x6e   : > { %1124 = vmatpush1.bf16.msra.mxu0 %v3305_v42  ;;  %4043 = vst [vmem:[#allocation58_spill] sm:$0xff] %v3356_v52  ;;  %v3359_v42 = vcombine.high %v309_v62, %v313_v54 }
  0x6f   : > { %1125 = vmatprep.subr.bf16.mxu0 %v3311_v19  ;;  %1167 = vmatpush1.bf16.msra.mxu1 %v3326_v53  ;;  %v3353_v19 = vcombine.low %v301_v59, %v305_v5  ;;  %v321_v59 = vld [vmem:[%s3912_s2 + $0x2f0] sm:$0xff]  ;;  %v3374_v5 = vcombine.low %v302_v9, %v306_v61  ;;  %v318_v53 = vld [vmem:[%s3912_s2 + $0x2d8] sm:$0xff] }
  0x70   : > { %1168 = vmatprep.subr.bf16.mxu1 %v3332_v35  ;;  %4044 = vst [vmem:[#allocation59_spill] sm:$0xff] %v3359_v42  ;;  %v3380_v35 = vcombine.high %v310_v20, %v314_v36  ;;  %v322_v9 = vld [vmem:[%s3912_s2 + $0x2f8] sm:$0xff]  ;;  %v325_v61 = vld [vmem:[%s3912_s2 + $0x310] sm:$0xff] }
  0x71   : > { %4042 = vst [vmem:[#allocation57_spill] sm:$0xff] %v3353_v19  ;;  %4045 = vst [vmem:[#allocation60_spill] sm:$0xff] %v3374_v5 }
  0x72   : > { %1126 = vmatpush1.bf16.msra.mxu0 %v3329_v26  ;;  %4047 = vst [vmem:[#allocation62_spill] sm:$0xff] %v3380_v35  ;;  %v3383_v26 = vcombine.high %v317_v37, %v321_v59 }
  0x73   : > { %1127 = vmatprep.subr.bf16.mxu0 %v3335_v8  ;;  %1169 = vmatpush1.bf16.msra.mxu1 %v3350_v47  ;;  %v3377_v8 = vcombine.low %v309_v62, %v313_v54  ;;  %v329_v62 = vld [vmem:[%s3912_s2 + $0x330] sm:$0xff]  ;;  %v3398_v54 = vcombine.low %v310_v20, %v314_v36  ;;  %v326_v47 = vld [vmem:[%s3912_s2 + $0x318] sm:$0xff] }
  0x74   : > { %1170 = vmatprep.subr.bf16.mxu1 %v3356_v52  ;;  %4048 = vst [vmem:[#allocation63_spill] sm:$0xff] %v3383_v26  ;;  %v3404_v52 = vcombine.high %v318_v53, %v322_v9  ;;  %v330_v20 = vld [vmem:[%s3912_s2 + $0x338] sm:$0xff]  ;;  %v333_v36 = vld [vmem:[%s3912_s2 + $0x350] sm:$0xff] }
  0x75   : > { %4046 = vst [vmem:[#allocation61_spill] sm:$0xff] %v3377_v8  ;;  %4049 = vst [vmem:[#allocation64_spill] sm:$0xff] %v3398_v54 }
  0x76   : > { %1128 = vmatpush1.bf16.msra.mxu0 %v3353_v19  ;;  %4051 = vst [vmem:[#allocation66_spill] sm:$0xff] %v3404_v52  ;;  %v3407_v19 = vcombine.high %v325_v61, %v329_v62 }
  0x77   : > { %1129 = vmatprep.subr.bf16.mxu0 %v3359_v42  ;;  %1171 = vmatpush1.bf16.msra.mxu1 %v3374_v5  ;;  %v3401_v42 = vcombine.low %v317_v37, %v321_v59  ;;  %v337_v37 = vld [vmem:[%s3912_s2 + $0x370] sm:$0xff]  ;;  %v3422_v59 = vcombine.low %v318_v53, %v322_v9  ;;  %v334_v5 = vld [vmem:[%s3912_s2 + $0x358] sm:$0xff] }
  0x78   : > { %1172 = vmatprep.subr.bf16.mxu1 %v3380_v35  ;;  %4052 = vst [vmem:[#allocation67_spill] sm:$0xff] %v3407_v19  ;;  %v3428_v35 = vcombine.high %v326_v47, %v330_v20  ;;  %v338_v53 = vld [vmem:[%s3912_s2 + $0x378] sm:$0xff]  ;;  %v341_v9 = vld [vmem:[%s3912_s2 + $0x390] sm:$0xff] }
  0x79   : > { %4050 = vst [vmem:[#allocation65_spill] sm:$0xff] %v3401_v42  ;;  %4053 = vst [vmem:[#allocation68_spill] sm:$0xff] %v3422_v59 }
  0x7a   : > { %1130 = vmatpush1.bf16.msra.mxu0 %v3377_v8  ;;  %4055 = vst [vmem:[#allocation70_spill] sm:$0xff] %v3428_v35  ;;  %v3431_v8 = vcombine.high %v333_v36, %v337_v37 }
  0x7b   : > { %1131 = vmatprep.subr.bf16.mxu0 %v3383_v26  ;;  %1173 = vmatpush1.bf16.msra.mxu1 %v3398_v54  ;;  %v3425_v26 = vcombine.low %v325_v61, %v329_v62  ;;  %v345_v61 = vld [vmem:[%s3912_s2 + $0x3b0] sm:$0xff]  ;;  %v3446_v62 = vcombine.low %v326_v47, %v330_v20  ;;  %v342_v54 = vld [vmem:[%s3912_s2 + $0x398] sm:$0xff] }
  0x7c   : > { %1174 = vmatprep.subr.bf16.mxu1 %v3404_v52  ;;  %4056 = vst [vmem:[#allocation71_spill] sm:$0xff] %v3431_v8  ;;  %v3452_v52 = vcombine.high %v334_v5, %v338_v53  ;;  %v346_v47 = vld [vmem:[%s3912_s2 + $0x3b8] sm:$0xff]  ;;  %v349_v20 = vld [vmem:[%s3912_s2 + $0x3d0] sm:$0xff] }
  0x7d   : > { %4054 = vst [vmem:[#allocation69_spill] sm:$0xff] %v3425_v26 }
  0x7e   : > { %1132 = vmatpush1.bf16.msra.mxu0 %v3401_v42  ;;  %v3455_v42 = vcombine.high %v341_v9, %v345_v61 }
  0x7f   : > { %1133 = vmatprep.subr.bf16.mxu0 %v3407_v19  ;;  %1175 = vmatpush1.bf16.msra.mxu1 %v3422_v59  ;;  %v3449_v19 = vcombine.low %v333_v36, %v337_v37  ;;  %v353_v36 = vld [vmem:[%s3912_s2 + $0x3f0] sm:$0xff]  ;;  %v3470_v37 = vcombine.low %v334_v5, %v338_v53  ;;  %v350_v59 = vld [vmem:[%s3912_s2 + $0x3d8] sm:$0xff]  ;;  %v3488_v53 = vcombine.low %v342_v54, %v346_v47 }
  0x80   : > { %1176 = vmatprep.subr.bf16.mxu1 %v3428_v35  ;;  %4057 = vst [vmem:[#allocation72_spill] sm:$0xff] %v3455_v42  ;;  %v3476_v35 = vcombine.high %v342_v54, %v346_v47  ;;  %v354_v5 = vld [vmem:[%s3912_s2 + $0x3f8] sm:$0xff]  ;;  %v3504_v54 = vld [vmem:[%s3130_s9 + $0x4] ss:$8 sps:$4 sm:$0xff]  }
  0x81   : > { %v4105_v47 = vld [vmem:[#allocation49_spill] sm:$0xff] }
  0x82   : > { %1134 = vmatpush1.bf16.msra.mxu0 %v3425_v26  ;;  %v3479_v26 = vcombine.high %v349_v20, %v353_v36 }
  0x83   : > { %1135 = vmatprep.subr.bf16.mxu0 %v3431_v8  ;;  %1177 = vmatpush1.bf16.msra.mxu1 %v3446_v62  ;;  %v3473_v8 = vcombine.low %v341_v9, %v345_v61  ;;  %v3491_v9 = vcombine.low %v349_v20, %v353_v36  ;;  %v3494_v61 = vcombine.high %v350_v59, %v354_v5  ;;  %v4106_v20 = vld [vmem:[#allocation50_spill] sm:$0xff]  ;;  %v4107_v36 = vld [vmem:[#allocation51_spill] sm:$0xff] }
  0x84   : > { %1178 = vmatprep.subr.bf16.mxu1 %v3452_v52 }
  0x86   : > { %1136 = vmatpush1.bf16.msra.mxu0 %v3449_v19 }
  0x87   : > { %1137 = vmatprep.subr.bf16.mxu0 %v3455_v42  ;;  %1179 = vmatpush1.bf16.msra.mxu1 %v3470_v37  ;;  %v3498_v42 = vcombine.low %v350_v59, %v354_v5  ;;  %v4104_v59 = vld [vmem:[#allocation48_spill] sm:$0xff] }
  0x88   : > { %1180 = vmatprep.subr.bf16.mxu1 %v3476_v35  ;;  %v4108_v5 = vld [vmem:[#allocation52_spill] sm:$0xff] }
  0x8a   : > { %1138 = vmatpush1.bf16.msra.mxu0 %v3473_v8 }
  0x8b   : > { %1139 = vmatprep.subr.bf16.mxu0 %v3479_v26  ;;  %1181 = vmatpush1.bf16.msra.mxu1 %v3488_v53 }
  0x8c   : > { %1182 = vmatprep.subr.bf16.mxu1 %v3494_v61 }
  0x8e   : > { %1140 = vmatpush1.bf16.msra.mxu0 %v3491_v9 }
  0x8f   : > { %1207 = vmatprep.subr.bf16.mxu0 %v2708_v3  ;;  %1183 = vmatpush1.bf16.msra.mxu1 %v3498_v42  ;;  %v4058_v3 = vld [vmem:[#allocation2_spill] sm:$0xff] }
  0x90   : > { %1250 = vmatprep.subr.bf16.mxu1 %v2734_v12  ;;  %v4062_v12 = vld [vmem:[#allocation6_spill] sm:$0xff] }
  0x91   : > { %1142 = vmatmul.mubr.bf16.vlgmr.msra.gmra.mrb[4].mxu0 %v3120_v7 }
  0x92   : > { %1208 = vmatpush1.bf16.msra.mxu0 %v2710_v4  ;;  %1239 = vmatprep.mubr.bf16.mxu0 %v3504_v54  ;;  %v4059_v4 = vld [vmem:[#allocation3_spill] sm:$0xff] }
  0x93   : > { %1209 = vmatprep.subr.bf16.mxu0 %v2715_v6  ;;  %1185 = vmatmul.mubr.bf16.vlgmr.msra.gmra.mrb[4].mxu1 %v3120_v7  ;;  %v4060_v6 = vld [vmem:[#allocation4_spill] sm:$0xff]  ;;  %v4103_v7 = vld [vmem:[#allocation47_spill] sm:$0xff] }
  0x94   : > { %1251 = vmatpush1.bf16.msra.mxu1 %v2736_v13  ;;  %1282 = vmatprep.mubr.bf16.mxu1 %v3504_v54  ;;  %v4063_v13 = vld [vmem:[#allocation7_spill] sm:$0xff] }
  0x95   : > { %1252 = vmatprep.subr.bf16.mxu1 %v2747_v17  ;;  %v4065_v17 = vld [vmem:[#allocation9_spill] sm:$0xff] }
  0x96   : > { %1210 = vmatpush1.bf16.msra.mxu0 %v2732_v11  ;;  %v4061_v11 = vld [vmem:[#allocation5_spill] sm:$0xff] }
  0x97   : > { %1211 = vmatprep.subr.bf16.mxu0 %v2745_v16  ;;  %v4064_v16 = vld [vmem:[#allocation8_spill] sm:$0xff] }
  0x98   : > { %1253 = vmatpush1.bf16.msra.mxu1 %v2767_v22  ;;  %v4066_v22 = vld [vmem:[#allocation10_spill] sm:$0xff] }
  0x99   : > { %1254 = vmatprep.subr.bf16.mxu1 %v2773_v24  ;;  %v4068_v24 = vld [vmem:[#allocation12_spill] sm:$0xff] }
  0x9a   : > { %1212 = vmatpush1.bf16.msra.mxu0 %v2770_v23  ;;  %v4067_v23 = vld [vmem:[#allocation11_spill] sm:$0xff] }
  0x9b   : > { %1213 = vmatprep.subr.bf16.mxu0 %v2776_v25  ;;  %v4069_v25 = vld [vmem:[#allocation13_spill] sm:$0xff] }
  0x9c   : > { %1255 = vmatpush1.bf16.msra.mxu1 %v2795_v30  ;;  %v4070_v30 = vld [vmem:[#allocation14_spill] sm:$0xff] }
  0x9d   : > { %1256 = vmatprep.subr.bf16.mxu1 %v2801_v32  ;;  %v4072_v32 = vld [vmem:[#allocation16_spill] sm:$0xff] }
  0x9e   : > { %1214 = vmatpush1.bf16.msra.mxu0 %v2798_v31  ;;  %v4071_v31 = vld [vmem:[#allocation15_spill] sm:$0xff] }
  0x9f   : > { %1215 = vmatprep.subr.bf16.mxu0 %v2804_v33  ;;  %v3571_v33 = vld [vmem:[%s3130_s9] ss:$8 sps:$4 sm:$0xff]  }
  0xa0   : > { %1257 = vmatpush1.bf16.msra.mxu1 %v2820_v38  ;;  %v4073_v38 = vld [vmem:[#allocation17_spill] sm:$0xff] }
  0xa1   : > { %1258 = vmatprep.subr.bf16.mxu1 %v2826_v40  ;;  %v4075_v40 = vld [vmem:[#allocation19_spill] sm:$0xff] }
  0xa2   : > { %1216 = vmatpush1.bf16.msra.mxu0 %v2823_v39  ;;  %v4074_v39 = vld [vmem:[#allocation18_spill] sm:$0xff] }
  0xa3   : > { %1217 = vmatprep.subr.bf16.mxu0 %v2836_v41  ;;  %v4076_v41 = vld [vmem:[#allocation20_spill] sm:$0xff] }
  0xa4   : > { %1259 = vmatpush1.bf16.msra.mxu1 %v2851_v46  ;;  %v4077_v46 = vld [vmem:[#allocation21_spill] sm:$0xff] }
  0xa5   : > { %1260 = vmatprep.subr.bf16.mxu1 %v2860_v49  ;;  %v4079_v49 = vld [vmem:[#allocation23_spill] sm:$0xff] }
  0xa6   : > { %1218 = vmatpush1.bf16.msra.mxu0 %v2857_v48  ;;  %v4078_v48 = vld [vmem:[#allocation22_spill] sm:$0xff] }
  0xa7   : > { %1219 = vmatprep.subr.bf16.mxu0 %v2863_v50  ;;  %v4080_v50 = vld [vmem:[#allocation24_spill] sm:$0xff] }
  0xa8   : > { %1261 = vmatpush1.bf16.msra.mxu1 %v2880_v55  ;;  %v4081_v55 = vld [vmem:[#allocation25_spill] sm:$0xff] }
  0xa9   : > { %1262 = vmatprep.subr.bf16.mxu1 %v2886_v57  ;;  %v4083_v57 = vld [vmem:[#allocation27_spill] sm:$0xff] }
  0xaa   : > { %1220 = vmatpush1.bf16.msra.mxu0 %v2883_v56  ;;  %v4082_v56 = vld [vmem:[#allocation26_spill] sm:$0xff] }
  0xab   : > { %1221 = vmatprep.subr.bf16.mxu0 %v2889_v58  ;;  %v4084_v58 = vld [vmem:[#allocation28_spill] sm:$0xff] }
  0xac   : > { %1263 = vmatpush1.bf16.msra.mxu1 %v2904_v63  ;;  %v4085_v63 = vld [vmem:[#allocation29_spill] sm:$0xff] }
  0xad   : > { %1264 = vmatprep.subr.bf16.mxu1 %v2910_v1  ;;  %v4087_v1 = vld [vmem:[#allocation31_spill] sm:$0xff] }
  0xae   : > { %1222 = vmatpush1.bf16.msra.mxu0 %v2907_v0  ;;  %v4086_v0 = vld [vmem:[#allocation30_spill] sm:$0xff] }
  0xaf   : > { %1223 = vmatprep.subr.bf16.mxu0 %v2913_v2  ;;  %v4088_v2 = vld [vmem:[#allocation32_spill] sm:$0xff] }
  0xb0   : > { %1265 = vmatpush1.bf16.msra.mxu1 %v2928_v10  ;;  %v4089_v10 = vld [vmem:[#allocation33_spill] sm:$0xff] }
  0xb1   : > { %1266 = vmatprep.subr.bf16.mxu1 %v2934_v15  ;;  %v4091_v15 = vld [vmem:[#allocation35_spill] sm:$0xff] }
  0xb2   : > { %1224 = vmatpush1.bf16.msra.mxu0 %v2931_v14  ;;  %v4090_v14 = vld [vmem:[#allocation34_spill] sm:$0xff] }
  0xb3   : > { %1225 = vmatprep.subr.bf16.mxu0 %v2937_v18  ;;  %v4092_v18 = vld [vmem:[#allocation36_spill] sm:$0xff] }
  0xb4   : > { %1267 = vmatpush1.bf16.msra.mxu1 %v2952_v27  ;;  %v4093_v27 = vld [vmem:[#allocation37_spill] sm:$0xff] }
  0xb5   : > { %1268 = vmatprep.subr.bf16.mxu1 %v2958_v29  ;;  %v4095_v29 = vld [vmem:[#allocation39_spill] sm:$0xff] }
  0xb6   : > { %1226 = vmatpush1.bf16.msra.mxu0 %v2955_v28  ;;  %v4094_v28 = vld [vmem:[#allocation38_spill] sm:$0xff] }
  0xb7   : > { %1227 = vmatprep.subr.bf16.mxu0 %v2961_v34  ;;  %v4096_v34 = vld [vmem:[#allocation40_spill] sm:$0xff] }
  0xb8   : > { %1269 = vmatpush1.bf16.msra.mxu1 %v2976_v43  ;;  %v4097_v43 = vld [vmem:[#allocation41_spill] sm:$0xff] }
  0xb9   : > { %1270 = vmatprep.subr.bf16.mxu1 %v2982_v45  ;;  %v4099_v45 = vld [vmem:[#allocation43_spill] sm:$0xff] }
  0xba   : > { %1228 = vmatpush1.bf16.msra.mxu0 %v2979_v44  ;;  %v4098_v44 = vld [vmem:[#allocation42_spill] sm:$0xff] }
  0xbb   : > { %1229 = vmatprep.subr.bf16.mxu0 %v2985_v51  ;;  %v4100_v51 = vld [vmem:[#allocation44_spill] sm:$0xff] }
  0xbc   : > { %1271 = vmatpush1.bf16.msra.mxu1 %v3000_v60  ;;  %v4101_v60 = vld [vmem:[#allocation45_spill] sm:$0xff] }
  0xbd   : > { %1272 = vmatprep.subr.bf16.mxu1 %v4059_v4  ;;  %v4111_v4 = vld [vmem:[#allocation55_spill] sm:$0xff] }
  0xbe   : > { %1230 = vmatpush1.bf16.msra.mxu0 %v4058_v3  ;;  %v4110_v3 = vld [vmem:[#allocation54_spill] sm:$0xff] }
  0xbf   : > { %1231 = vmatprep.subr.bf16.mxu0 %v4060_v6  ;;  %v4112_v6 = vld [vmem:[#allocation56_spill] sm:$0xff] }
  0xc0   : > { %1273 = vmatpush1.bf16.msra.mxu1 %v4061_v11  ;;  %v4113_v11 = vld [vmem:[#allocation57_spill] sm:$0xff] }
  0xc1   : > { %1274 = vmatprep.subr.bf16.mxu1 %v4063_v13  ;;  %v4115_v13 = vld [vmem:[#allocation59_spill] sm:$0xff] }
  0xc2   : > { %1232 = vmatpush1.bf16.msra.mxu0 %v4062_v12  ;;  %v4114_v12 = vld [vmem:[#allocation58_spill] sm:$0xff] }
  0xc3   : > { %1233 = vmatprep.subr.bf16.mxu0 %v4064_v16  ;;  %v4116_v16 = vld [vmem:[#allocation60_spill] sm:$0xff] }
  0xc4   : > { %1275 = vmatpush1.bf16.msra.mxu1 %v4065_v17  ;;  %v4117_v17 = vld [vmem:[#allocation61_spill] sm:$0xff] }
  0xc5   : > { %1276 = vmatprep.subr.bf16.mxu1 %v4067_v23  ;;  %v4119_v23 = vld [vmem:[#allocation63_spill] sm:$0xff] }
  0xc6   : > { %1234 = vmatpush1.bf16.msra.mxu0 %v4066_v22  ;;  %v4118_v22 = vld [vmem:[#allocation62_spill] sm:$0xff] }
  0xc7   : > { %1235 = vmatprep.subr.bf16.mxu0 %v4068_v24  ;;  %v4120_v24 = vld [vmem:[#allocation64_spill] sm:$0xff] }
  0xc8   : > { %1277 = vmatpush1.bf16.msra.mxu1 %v4069_v25  ;;  %v4121_v25 = vld [vmem:[#allocation65_spill] sm:$0xff] }
  0xc9   : > { %1278 = vmatprep.subr.bf16.mxu1 %v4071_v31  ;;  %v4123_v31 = vld [vmem:[#allocation67_spill] sm:$0xff] }
  0xca   : > { %1236 = vmatpush1.bf16.msra.mxu0 %v4070_v30  ;;  %v4122_v30 = vld [vmem:[#allocation66_spill] sm:$0xff] }
  0xcb   : > { %1237 = vmatprep.subr.bf16.mxu0 %v4072_v32  ;;  %v4124_v32 = vld [vmem:[#allocation68_spill] sm:$0xff] }
  0xcc   : > { %1279 = vmatpush1.bf16.msra.mxu1 %v4073_v38  ;;  %v4125_v38 = vld [vmem:[#allocation69_spill] sm:$0xff] }
  0xcd   : > { %1280 = vmatprep.subr.bf16.mxu1 %v4075_v40  ;;  %v4127_v40 = vld [vmem:[#allocation71_spill] sm:$0xff] }
  0xce   : > { %1238 = vmatpush1.bf16.msra.mxu0 %v4074_v39  ;;  %v4126_v39 = vld [vmem:[#allocation70_spill] sm:$0xff] }
  0xcf   : > { %1293 = vmatprep.subr.bf16.mxu0 %v4076_v41  ;;  %v4128_v41 = vld [vmem:[#allocation72_spill] sm:$0xff] }
  0xd0   : > { %1281 = vmatpush1.bf16.msra.mxu1 %v3123_v21  ;;  %v4102_v21 = vld [vmem:[#allocation46_spill] sm:$0xff] }
  0xd1   : > { %1240 = vmatmul.mubr.bf16.vlgmr.msra.gmra.mrb[8].mxu0 %v3571_v33  ;;  %1336 = vmatprep.subr.bf16.mxu1 %v4078_v48 }
  0xd2   : > { %1294 = vmatpush1.bf16.msra.mxu0 %v4077_v46  ;;  %1325 = vmatprep.mubr.bf16.mxu0 %v3504_v54  ;;  %v3706_v46 = vld [vmem:[%s3913_s3 + $0x30] sm:$0xff]  }
  0xd3   : > { %1295 = vmatprep.subr.bf16.mxu0 %v4079_v49  ;;  %1283 = vmatmul.mubr.bf16.vlgmr.msra.gmra.mrb[8].mxu1 %v3571_v33 }
  0xd4   : > { %1337 = vmatpush1.bf16.msra.mxu1 %v4080_v50  ;;  %1368 = vmatprep.mubr.bf16.mxu1 %v3504_v54  ;;  %v4109_v54 = vld [vmem:[#allocation53_spill] sm:$0xff] }
  0xd5   : > { %1338 = vmatprep.subr.bf16.mxu1 %v4082_v56 }
  0xd6   : > { %1296 = vmatpush1.bf16.msra.mxu0 %v4081_v55 }
  0xd7   : > { %1297 = vmatprep.subr.bf16.mxu0 %v4083_v57 }
  0xd8   : > { %1339 = vmatpush1.bf16.msra.mxu1 %v4084_v58 }
  0xd9   : > { %1340 = vmatprep.subr.bf16.mxu1 %v4086_v0 }
  0xda   : > { %1298 = vmatpush1.bf16.msra.mxu0 %v4085_v63 }
  0xdb   : > { %1299 = vmatprep.subr.bf16.mxu0 %v4087_v1 }
  0xdc   : > { %1341 = vmatpush1.bf16.msra.mxu1 %v4088_v2 }
  0xdd   : > { %1342 = vmatprep.subr.bf16.mxu1 %v4090_v14  ;;  %v3715_v14 = vld [vmem:[%s3913_s3 + $0x38] sm:$0xff]  }
  0xde   : > { %1300 = vmatpush1.bf16.msra.mxu0 %v4089_v10 }
  0xdf   : > { %1301 = vmatprep.subr.bf16.mxu0 %v4091_v15 }
  0xe0   : > { %1343 = vmatpush1.bf16.msra.mxu1 %v4092_v18 }
  0xe1   : > { %1344 = vmatprep.subr.bf16.mxu1 %v4094_v28 }
  0xe2   : > { %1302 = vmatpush1.bf16.msra.mxu0 %v4093_v27 }
  0xe3   : > { %1303 = vmatprep.subr.bf16.mxu0 %v4095_v29 }
  0xe4   : > { %1345 = vmatpush1.bf16.msra.mxu1 %v4096_v34 }
  0xe5   : > { %1346 = vmatprep.subr.bf16.mxu1 %v4098_v44 }
  0xe6   : > { %1304 = vmatpush1.bf16.msra.mxu0 %v4097_v43 }
  0xe7   : > { %1305 = vmatprep.subr.bf16.mxu0 %v4099_v45 }
  0xe8   : > { %1347 = vmatpush1.bf16.msra.mxu1 %v4100_v51 }
  0xe9   : > { %1348 = vmatprep.subr.bf16.mxu1 %v4102_v21 }
  0xea   : > { %1306 = vmatpush1.bf16.msra.mxu0 %v4101_v60 }
  0xeb   : > { %1307 = vmatprep.subr.bf16.mxu0 %v4103_v7 }
  0xec   : > { %1349 = vmatpush1.bf16.msra.mxu1 %v4104_v59 }
  0xed   : > { %1350 = vmatprep.subr.bf16.mxu1 %v4106_v20 }
  0xee   : > { %1308 = vmatpush1.bf16.msra.mxu0 %v4105_v47 }
  0xef   : > { %1309 = vmatprep.subr.bf16.mxu0 %v4107_v36 }
  0xf0   : > { %1351 = vmatpush1.bf16.msra.mxu1 %v4108_v5 }
  0xf1   : > { %1352 = vmatprep.subr.bf16.mxu1 %v4110_v3 }
  0xf2   : > { %1310 = vmatpush1.bf16.msra.mxu0 %v4109_v54 }
  0xf3   : > { %1311 = vmatprep.subr.bf16.mxu0 %v4111_v4 }
  0xf4   : > { %1353 = vmatpush1.bf16.msra.mxu1 %v4112_v6 }
  0xf5   : > { %1354 = vmatprep.subr.bf16.mxu1 %v4114_v12 }
  0xf6   : > { %1312 = vmatpush1.bf16.msra.mxu0 %v4113_v11 }
  0xf7   : > { %1313 = vmatprep.subr.bf16.mxu0 %v4115_v13 }
  0xf8   : > { %1355 = vmatpush1.bf16.msra.mxu1 %v4116_v16 }
  0xf9   : > { %1356 = vmatprep.subr.bf16.mxu1 %v4118_v22 }
  0xfa   : > { %1314 = vmatpush1.bf16.msra.mxu0 %v4117_v17 }
  0xfb   : > { %1315 = vmatprep.subr.bf16.mxu0 %v4119_v23 }
  0xfc   : > { %1357 = vmatpush1.bf16.msra.mxu1 %v4120_v24 }
  0xfd   : > { %1358 = vmatprep.subr.bf16.mxu1 %v4122_v30 }
  0xfe   : > { %1316 = vmatpush1.bf16.msra.mxu0 %v4121_v25 }
  0xff   : > { %1317 = vmatprep.subr.bf16.mxu0 %v4123_v31 }
 0x100   : > { %1359 = vmatpush1.bf16.msra.mxu1 %v4124_v32 }
 0x101   : > { %1360 = vmatprep.subr.bf16.mxu1 %v4126_v39 }
 0x102   : > { %1318 = vmatpush1.bf16.msra.mxu0 %v4125_v38 }
 0x103   : > { %1319 = vmatprep.subr.bf16.mxu0 %v4127_v40 }
 0x104   : > { %1361 = vmatpush1.bf16.msra.mxu1 %v3446_v62  ;;  %v3697_v62 = vld [vmem:[%s3913_s3 + $0x28] sm:$0xff]  }
 0x105   : > { %1362 = vmatprep.subr.bf16.mxu1 %v3452_v52  ;;  %v2662_v52 = vmov 0.0  }
 0x106   : > { %1320 = vmatpush1.bf16.msra.mxu0 %v3449_v19  ;;  %v3647_v19 = vld [vmem:[%s3913_s3] sm:$0xff]   ;;  %2110 = vst [vmem:[%s3852_s30] sm:$0xff] %v2662_v52 }
 0x107   : > { %1321 = vmatprep.subr.bf16.mxu0 %v4128_v41 }
 0x108   : > { %1363 = vmatpush1.bf16.msra.mxu1 %v3470_v37 }
 0x109   : > { %1364 = vmatprep.subr.bf16.mxu1 %v3476_v35  ;;  %v3670_v35 = vld [vmem:[%s3913_s3 + $0x10] sm:$0xff]  }
 0x10a   : > { %1322 = vmatpush1.bf16.msra.mxu0 %v3473_v8  ;;  %v3679_v8 = vld [vmem:[%s3913_s3 + $0x18] sm:$0xff]  }
 0x10b   : > { %1323 = vmatprep.subr.bf16.mxu0 %v3479_v26  ;;  %v3656_v26 = vld [vmem:[%s3913_s3 + $0x8] sm:$0xff]  }
 0x10c   : > { %1365 = vmatpush1.bf16.msra.mxu1 %v3488_v53 }
 0x10d   : > { %1366 = vmatprep.subr.bf16.mxu1 %v3494_v61 }
 0x10e   : > { %1324 = vmatpush1.bf16.msra.mxu0 %v3491_v9 }
 0x10f   : > { %2406 = vmatprep.subr.bf16.mxu0 %v2662_v52 }
 0x110   : > { %1367 = vmatpush1.bf16.msra.mxu1 %v3498_v42  ;;  %v3688_v42 = vld [vmem:[%s3913_s3 + $0x20] sm:$0xff]  }
 0x111   : > { %1326 = vmatmul.mubr.bf16.vlgmr.msra.gmra.mrb[12].mxu0 %v3571_v33  ;;  %2426 = vmatprep.subr.bf16.mxu1 %v2662_v52 }
 0x112   : > { %2407 = vmatpush3.bf16.msra.mxu0 %v3647_v19  ;;  %2422 = vmatprep.mubr.msk.bf16.mxu0 %vm2663_vm0, %v2662_v52 }
 0x113   : > { %2408 = vmatprep.subr.bf16.mxu0 %v2662_v52  ;;  %1369 = vmatmul.mubr.bf16.vlgmr.msra.gmra.mrb[12].mxu1 %v3571_v33 }
 0x114   : > { %2427 = vmatpush3.bf16.msra.mxu1 %v3647_v19  ;;  %2442 = vmatprep.mubr.msk.bf16.mxu1 %vm2663_vm0, %v2662_v52 }
 0x115   : > { %2428 = vmatprep.subr.bf16.mxu1 %v2662_v52 }
 0x116   : > { %2409 = vmatpush3.bf16.msra.mxu0 %v3656_v26 }
 0x117   : > { %2410 = vmatprep.subr.bf16.mxu0 %v2662_v52 }
 0x118   : > { %2429 = vmatpush3.bf16.msra.mxu1 %v3656_v26 }
 0x119   : > { %2430 = vmatprep.subr.bf16.mxu1 %v2662_v52 }
 0x11a   : > { %2411 = vmatpush3.bf16.msra.mxu0 %v3670_v35 }
 0x11b   : > { %2412 = vmatprep.subr.bf16.mxu0 %v2662_v52 }
 0x11c   : > { %2431 = vmatpush3.bf16.msra.mxu1 %v3670_v35 }
 0x11d   : > { %2432 = vmatprep.subr.bf16.mxu1 %v2662_v52 }
 0x11e   : > { %2413 = vmatpush3.bf16.msra.mxu0 %v3679_v8 }
 0x11f   : > { %2414 = vmatprep.subr.bf16.mxu0 %v2662_v52 }
 0x120   : > { %2433 = vmatpush3.bf16.msra.mxu1 %v3679_v8 }
 0x121   : > { %2434 = vmatprep.subr.bf16.mxu1 %v2662_v52 }
 0x122   : > { %2415 = vmatpush3.bf16.msra.mxu0 %v3688_v42 }
 0x123   : > { %2416 = vmatprep.subr.bf16.mxu0 %v2662_v52 }
 0x124   : > { %v1057_v37 = vpop.f32.mrb[0].mxu0  ;;  %2435 = vmatpush3.bf16.msra.mxu1 %v3688_v42  ;;  %v1100_v50 = vpop.f32.mrb[0].mxu1 }
 0x125   : > { %v1382_v53 = vmul.f32 %v1057_v37, %v1057_v37  ;;  %v1059_v9 = vpop.f32.mrb[1].mxu0  ;;  %2436 = vmatprep.subr.bf16.mxu1 %v2662_v52  ;;  %v1600_v57 = vmul.f32 %v1100_v50, %v1100_v50  ;;  %v1102_v58 = vpop.f32.mrb[1].mxu1 }
 0x126   : > { %v1384_v61 = vmul.f32 %v1059_v9, %v1059_v9  ;;  %v1061_v33 = vpop.f32.mrb[2].mxu0  ;;  %2417 = vmatpush3.bf16.msra.mxu0 %v3697_v62  ;;  %v1602_v63 = vmul.f32 %v1102_v58, %v1102_v58  ;;  %v1104_v0 = vpop.f32.mrb[2].mxu1 }
 0x127   : > { %v1383_v48 = vmul.f32 %v1061_v33, %v1061_v33  ;;  %v1063_v49 = vpop.f32.mrb[3].mxu0  ;;  %2418 = vmatprep.subr.bf16.mxu0 %v2662_v52  ;;  %v1601_v2 = vmul.f32 %v1104_v0, %v1104_v0  ;;  %v1106_v10 = vpop.f32.mrb[3].mxu1 }
 0x128   : > { %v1386_v55 = vadd.f32 %v1384_v61, %v1382_v53  ;;  %v1385_v56 = vmul.f32 %v1063_v49, %v1063_v49  ;;  %2437 = vmatpush3.bf16.msra.mxu1 %v3697_v62  ;;  %v1604_v15 = vadd.f32 %v1602_v63, %v1600_v57  ;;  %v1603_v18 = vmul.f32 %v1106_v10, %v1106_v10 }
 0x129   : > { %2438 = vmatprep.subr.bf16.mxu1 %v2662_v52 }
 0x12a   : > { %2590 = vrsqrt.f32 %v1386_v55  ;;  %v1387_v1 = vadd.f32 %v1385_v56, %v1383_v48  ;;  %2419 = vmatpush3.bf16.msra.mxu0 %v3706_v46  ;;  %v1605_v27 = vadd.f32 %v1603_v18, %v1601_v2  ;;  %vm1390_vm1 = vcmp.eq.f32.partialorder %v1386_v55, inf }
 0x12b   : > { %2420 = vmatprep.subr.bf16.mxu0 %v2662_v52  ;;  %vm1392_vm2 = vcmp.eq.f32.partialorder %v1386_v55, 0.0  ;;  %v1393_v43 = vand.u32 2147483648, %v1386_v55  ;;  %vm1608_vm4 = vcmp.eq.f32.partialorder %v1604_v15, inf  ;;  %v1611_v60 = vand.u32 2147483648, %v1604_v15 }
 0x12c   : > { %2592 = vrsqrt.f32 %v1387_v1  ;;  %2439 = vmatpush3.bf16.msra.mxu1 %v3706_v46  ;;  %vm1397_vm3 = vcmp.eq.f32.partialorder %v1387_v1, inf  ;;  %vm1399_vm5 = vcmp.eq.f32.partialorder %v1387_v1, 0.0  ;;  %v1400_v21 = vand.u32 2147483648, %v1387_v1 }
 0x12d   : > { %2594 = vrsqrt.f32 %v1604_v15  ;;  %2440 = vmatprep.subr.bf16.mxu1 %v2662_v52  ;;  %vm1610_vm6 = vcmp.eq.f32.partialorder %v1604_v15, 0.0  ;;  %vm1615_vm7 = vcmp.eq.f32.partialorder %v1605_v27, inf  ;;  %vm1617_vm8 = vcmp.eq.f32.partialorder %v1605_v27, 0.0 }
 0x12e   : > { %2421 = vmatpush3.bf16.msra.mxu0 %v3715_v14  ;;  %2596 = vrsqrt.f32 %v1605_v27  ;;  %v1618_v20 = vand.u32 2147483648, %v1605_v27 }
 0x12f   : > { %2446 = vmatprep.subr.bf16.mxu0 %v2662_v52 }
 0x130   : > { %2441 = vmatpush3.bf16.msra.mxu1 %v3715_v14 }
 0x131   : > { %2466 = vmatprep.subr.bf16.mxu1 %v2662_v52 }
 0x134   : > { %v2591_v28 = vpop.eup %2590 }
 0x135   : > { %v1389_v29 = vmul.f32 %v2591_v28, %v1386_v55 }
 0x136   : > { %v2593_v34 = vpop.eup %2592 }
 0x137   : > { %v2595_v44 = vpop.eup %2594  ;;  %v1391_v45 = vsel %vm1390_vm1, %v1386_v55, %v1389_v29  ;;  %v1396_v51 = vmul.f32 %v2593_v34, %v1387_v1 }
 0x138   : > { %v1607_v7 = vmul.f32 %v2595_v44, %v1604_v15  ;;  %v2597_v59 = vpop.eup %2596  ;;  %v1394_v36 = vsel %vm1392_vm2, %v1393_v43, %v1391_v45 }
 0x139   : > { %v1398_v47 = vsel %vm1397_vm3, %v1387_v1, %v1396_v51  ;;  %v1614_v3 = vmul.f32 %v2597_v59, %v1605_v27 }
 0x13a   : > { %v1401_v5 = vsel %vm1399_vm5, %v1400_v21, %v1398_v47  ;;  %v1609_v54 = vsel %vm1608_vm4, %v1604_v15, %v1607_v7 }
 0x13b   : > { %v1422_v4 = vpack.c.bf16 %v1401_v5, %v1394_v36  ;;  %v1612_v6 = vsel %vm1610_vm6, %v1611_v60, %v1609_v54  ;;  %v1616_v11 = vsel %vm1615_vm7, %v1605_v27, %v1614_v3 }
 0x13c   : > { %v1619_v12 = vsel %vm1617_vm8, %v1618_v20, %v1616_v11 }
 0x13d   : > { %2423 = vmatmul.mubr.bf16.vlgmr.msra.gmra.mrb[16].mxu0 %v1422_v4  ;;  %v1640_v13 = vpack.c.bf16 %v1619_v12, %v1612_v6 }
 0x13e   : > { %2447 = vmatpush3.bf16.msra.mxu0 %v3647_v19  ;;  %2462 = vmatprep.mubr.msk.bf16.mxu0 %vm2663_vm0, %v2662_v52 }
 0x13f   : > { %2448 = vmatprep.subr.bf16.mxu0 %v2662_v52 }
 0x142   : > { %2449 = vmatpush3.bf16.msra.mxu0 %v3656_v26 }
 0x143   : > { %2450 = vmatprep.subr.bf16.mxu0 %v2662_v52 }
 0x146   : > { %2451 = vmatpush3.bf16.msra.mxu0 %v3670_v35 }
 0x147   : > { %2452 = vmatprep.subr.bf16.mxu0 %v2662_v52 }
 0x14a   : > { %2453 = vmatpush3.bf16.msra.mxu0 %v3679_v8 }
 0x14b   : > { %2454 = vmatprep.subr.bf16.mxu0 %v2662_v52 }
 0x14e   : > { %2455 = vmatpush3.bf16.msra.mxu0 %v3688_v42 }
 0x14f   : > { %2456 = vmatprep.subr.bf16.mxu0 %v2662_v52 }
 0x152   : > { %2457 = vmatpush3.bf16.msra.mxu0 %v3697_v62 }
 0x153   : > { %2458 = vmatprep.subr.bf16.mxu0 %v2662_v52 }
 0x156   : > { %2459 = vmatpush3.bf16.msra.mxu0 %v3706_v46 }
 0x157   : > { %2460 = vmatprep.subr.bf16.mxu0 %v2662_v52 }
 0x15a   : > { %2461 = vmatpush3.bf16.msra.mxu0 %v3715_v14 }
 0x15b   : > { %2486 = vmatprep.subr.bf16.mxu0 %v2662_v52 }
 0x15d   : > { %2463 = vmatmul.mubr.bf16.vlgmr.msra.gmra.mrb[20].mxu0 %v1640_v13 }
 0x15e   : > { %2487 = vmatpush3.bf16.msra.mxu0 %v3647_v19  ;;  %2502 = vmatprep.mubr.msk.bf16.mxu0 %vm2663_vm0, %v2662_v52 }
 0x15f   : > { %2488 = vmatprep.subr.bf16.mxu0 %v2662_v52 }
 0x162   : > { %2489 = vmatpush3.bf16.msra.mxu0 %v3656_v26 }
 0x163   : > { %2490 = vmatprep.subr.bf16.mxu0 %v2662_v52 }
 0x164   : > { %v1143_v16 = vpop.f32.mrb[4].mxu0 }
 0x165   : > { %v1770_v17 = vmul.f32 %v1143_v16, %v1143_v16  ;;  %v1145_v22 = vpop.f32.mrb[5].mxu0 }
 0x166   : > { %v1772_v23 = vmul.f32 %v1145_v22, %v1145_v22  ;;  %2491 = vmatpush3.bf16.msra.mxu0 %v3670_v35  ;;  %v1147_v24 = vpop.f32.mrb[6].mxu0  ;;  %v1186_v31 = vpop.f32.mrb[4].mxu1 }
 0x167   : > { %v1771_v25 = vmul.f32 %v1147_v24, %v1147_v24  ;;  %v1149_v30 = vpop.f32.mrb[7].mxu0  ;;  %2492 = vmatprep.subr.bf16.mxu0 %v2662_v52  ;;  %v1940_v39 = vmul.f32 %v1186_v31, %v1186_v31  ;;  %v1188_v40 = vpop.f32.mrb[5].mxu1 }
 0x168   : > { %v1774_v32 = vadd.f32 %v1772_v23, %v1770_v17  ;;  %v1773_v38 = vmul.f32 %v1149_v30, %v1149_v30  ;;  %v1942_v41 = vmul.f32 %v1188_v40, %v1188_v40  ;;  %v1190_v37 = vpop.f32.mrb[6].mxu1 }
 0x169   : > { %v1941_v9 = vmul.f32 %v1190_v37, %v1190_v37  ;;  %v1192_v61 = vpop.f32.mrb[7].mxu1 }
 0x16a   : > { %2598 = vrsqrt.f32 %v1774_v32  ;;  %v1775_v53 = vadd.f32 %v1773_v38, %v1771_v25  ;;  %2493 = vmatpush3.bf16.msra.mxu0 %v3679_v8  ;;  %v1944_v33 = vadd.f32 %v1942_v41, %v1940_v39  ;;  %v1943_v48 = vmul.f32 %v1192_v61, %v1192_v61 }
 0x16b   : > { %2494 = vmatprep.subr.bf16.mxu0 %v2662_v52  ;;  %vm1778_vm9 = vcmp.eq.f32.partialorder %v1774_v32, inf  ;;  %vm1780_vm10 = vcmp.eq.f32.partialorder %v1774_v32, 0.0  ;;  %v1781_v57 = vand.u32 2147483648, %v1774_v32 }
 0x16c   : > { %2600 = vrsqrt.f32 %v1775_v53  ;;  %v1945_v49 = vadd.f32 %v1943_v48, %v1941_v9  ;;  %vm1785_vm11 = vcmp.eq.f32.partialorder %v1775_v53, inf  ;;  %vm1948_vm12 = vcmp.eq.f32.partialorder %v1944_v33, inf }
 0x16d   : > { %2602 = vrsqrt.f32 %v1944_v33  ;;  %v1951_v1 = vand.u32 2147483648, %v1944_v33  ;;  %vm1787_vm13 = vcmp.eq.f32.partialorder %v1775_v53, 0.0  ;;  %v1788_v2 = vand.u32 2147483648, %v1775_v53 }
 0x16e   : > { %2495 = vmatpush3.bf16.msra.mxu0 %v3688_v42  ;;  %2604 = vrsqrt.f32 %v1945_v49  ;;  %vm1950_vm14 = vcmp.eq.f32.partialorder %v1944_v33, 0.0  ;;  %vm1955_vm15 = vcmp.eq.f32.partialorder %v1945_v49, inf  ;;  %vm1957_vm1 = vcmp.eq.f32.partialorder %v1945_v49, 0.0 }
 0x16f   : > { %2496 = vmatprep.subr.bf16.mxu0 %v2662_v52  ;;  %v1958_v27 = vand.u32 2147483648, %v1945_v49 }
 0x172   : > { %2497 = vmatpush3.bf16.msra.mxu0 %v3697_v62 }
 0x173   : > { %2498 = vmatprep.subr.bf16.mxu0 %v2662_v52 }
 0x174   : > { %v2599_v50 = vpop.eup %2598 }
 0x175   : > { %v1777_v55 = vmul.f32 %v2599_v50, %v1774_v32 }
 0x176   : > { %v2601_v56 = vpop.eup %2600  ;;  %2499 = vmatpush3.bf16.msra.mxu0 %v3706_v46 }
 0x177   : > { %v2603_v58 = vpop.eup %2602  ;;  %2500 = vmatprep.subr.bf16.mxu0 %v2662_v52  ;;  %v1779_v63 = vsel %vm1778_vm9, %v1774_v32, %v1777_v55  ;;  %v1784_v0 = vmul.f32 %v2601_v56, %v1775_v53 }
 0x178   : > { %v1947_v10 = vmul.f32 %v2603_v58, %v1944_v33  ;;  %v2605_v15 = vpop.eup %2604  ;;  %v1782_v28 = vsel %vm1780_vm10, %v1781_v57, %v1779_v63 }
 0x179   : > { %v1786_v18 = vsel %vm1785_vm11, %v1775_v53, %v1784_v0  ;;  %v1954_v43 = vmul.f32 %v2605_v15, %v1945_v49 }
 0x17a   : > { %2501 = vmatpush3.bf16.msra.mxu0 %v3715_v14  ;;  %v1789_v29 = vsel %vm1787_vm13, %v1788_v2, %v1786_v18  ;;  %v1949_v34 = vsel %vm1948_vm12, %v1944_v33, %v1947_v10 }
 0x17b   : > { %2526 = vmatprep.subr.bf16.mxu0 %v2662_v52  ;;  %v1810_v44 = vpack.c.bf16 %v1789_v29, %v1782_v28  ;;  %v1952_v45 = vsel %vm1950_vm14, %v1951_v1, %v1949_v34  ;;  %v1956_v51 = vsel %vm1955_vm15, %v1945_v49, %v1954_v43 }
 0x17c   : > { %v1959_v60 = vsel %vm1957_vm1, %v1958_v27, %v1956_v51 }
 0x17d   : > { %2503 = vmatmul.mubr.bf16.vlgmr.msra.gmra.mrb[24].mxu0 %v1810_v44  ;;  %v1980_v21 = vpack.c.bf16 %v1959_v60, %v1952_v45 }
 0x17e   : > { %2527 = vmatpush3.bf16.msra.mxu0 %v3647_v19  ;;  %2542 = vmatprep.mubr.msk.bf16.mxu0 %vm2663_vm0, %v2662_v52 }
 0x17f   : > { %2528 = vmatprep.subr.bf16.mxu0 %v2662_v52 }
 0x182   : > { %2529 = vmatpush3.bf16.msra.mxu0 %v3656_v26 }
 0x183   : > { %2530 = vmatprep.subr.bf16.mxu0 %v2662_v52 }
 0x186   : > { %2531 = vmatpush3.bf16.msra.mxu0 %v3670_v35 }
 0x187   : > { %2532 = vmatprep.subr.bf16.mxu0 %v2662_v52 }
 0x18a   : > { %2533 = vmatpush3.bf16.msra.mxu0 %v3679_v8 }
 0x18b   : > { %2534 = vmatprep.subr.bf16.mxu0 %v2662_v52 }
 0x18e   : > { %2535 = vmatpush3.bf16.msra.mxu0 %v3688_v42 }
 0x18f   : > { %2536 = vmatprep.subr.bf16.mxu0 %v2662_v52 }
 0x192   : > { %2537 = vmatpush3.bf16.msra.mxu0 %v3697_v62 }
 0x193   : > { %2538 = vmatprep.subr.bf16.mxu0 %v2662_v52 }
 0x196   : > { %2539 = vmatpush3.bf16.msra.mxu0 %v3706_v46 }
 0x197   : > { %2540 = vmatprep.subr.bf16.mxu0 %v2662_v52 }
 0x19a   : > { %2541 = vmatpush3.bf16.msra.mxu0 %v3715_v14 }
 0x19d   : > { %2543 = vmatmul.mubr.bf16.vlgmr.msra.gmra.mrb[28].mxu0 %v1980_v21 }
 0x1a4   : > { %v1241_v7 = vpop.f32.mrb[8].mxu0 }
 0x1a5   : > { %v1402_v59 = vmul.f32 %v1241_v7, %v1241_v7  ;;  %v1243_v47 = vpop.f32.mrb[9].mxu0 }
 0x1a6   : > { %v1404_v20 = vmul.f32 %v1243_v47, %v1243_v47  ;;  %v1245_v36 = vpop.f32.mrb[10].mxu0  ;;  %v1284_v3 = vpop.f32.mrb[8].mxu1 }
 0x1a7   : > { %v1403_v5 = vmul.f32 %v1245_v36, %v1245_v36  ;;  %v1247_v54 = vpop.f32.mrb[11].mxu0  ;;  %v1620_v11 = vmul.f32 %v1284_v3, %v1284_v3  ;;  %v1286_v12 = vpop.f32.mrb[9].mxu1 }
 0x1a8   : > { %v1406_v4 = vadd.f32 %v1404_v20, %v1402_v59  ;;  %v1405_v6 = vmul.f32 %v1247_v54, %v1247_v54  ;;  %v1622_v13 = vmul.f32 %v1286_v12, %v1286_v12  ;;  %v1288_v16 = vpop.f32.mrb[10].mxu1 }
 0x1a9   : > { %v1621_v22 = vmul.f32 %v1288_v16, %v1288_v16  ;;  %v1290_v23 = vpop.f32.mrb[11].mxu1 }
 0x1aa   : > { %2606 = vrsqrt.f32 %v1406_v4  ;;  %v1407_v17 = vadd.f32 %v1405_v6, %v1403_v5  ;;  %v1624_v24 = vadd.f32 %v1622_v13, %v1620_v11  ;;  %v1623_v25 = vmul.f32 %v1290_v23, %v1290_v23 }
 0x1ab   : > { %vm1410_vm2 = vcmp.eq.f32.partialorder %v1406_v4, inf  ;;  %vm1412_vm3 = vcmp.eq.f32.partialorder %v1406_v4, 0.0  ;;  %v1413_v39 = vand.u32 2147483648, %v1406_v4 }
 0x1ac   : > { %2608 = vrsqrt.f32 %v1407_v17  ;;  %v1625_v30 = vadd.f32 %v1623_v25, %v1621_v22  ;;  %vm1417_vm4 = vcmp.eq.f32.partialorder %v1407_v17, inf  ;;  %vm1628_vm5 = vcmp.eq.f32.partialorder %v1624_v24, inf }
 0x1ad   : > { %2610 = vrsqrt.f32 %v1624_v24  ;;  %v1631_v53 = vand.u32 2147483648, %v1624_v24  ;;  %vm1419_vm6 = vcmp.eq.f32.partialorder %v1407_v17, 0.0  ;;  %v1420_v9 = vand.u32 2147483648, %v1407_v17 }
 0x1ae   : > { %2612 = vrsqrt.f32 %v1625_v30  ;;  %vm1630_vm7 = vcmp.eq.f32.partialorder %v1624_v24, 0.0  ;;  %vm1635_vm8 = vcmp.eq.f32.partialorder %v1625_v30, inf  ;;  %vm1637_vm9 = vcmp.eq.f32.partialorder %v1625_v30, 0.0 }
 0x1af   : > { %v1638_v49 = vand.u32 2147483648, %v1625_v30 }
 0x1b4   : > { %v2607_v31 = vpop.eup %2606 }
 0x1b5   : > { %v1409_v32 = vmul.f32 %v2607_v31, %v1406_v4 }
 0x1b6   : > { %v2609_v38 = vpop.eup %2608 }
 0x1b7   : > { %v2611_v40 = vpop.eup %2610  ;;  %v1411_v41 = vsel %vm1410_vm2, %v1406_v4, %v1409_v32  ;;  %v1416_v37 = vmul.f32 %v2609_v38, %v1407_v17 }
 0x1b8   : > { %v1627_v61 = vmul.f32 %v2611_v40, %v1624_v24  ;;  %v2613_v33 = vpop.eup %2612  ;;  %v1414_v50 = vsel %vm1412_vm3, %v1413_v39, %v1411_v41 }
 0x1b9   : > { %v1418_v48 = vsel %vm1417_vm4, %v1407_v17, %v1416_v37  ;;  %v1634_v57 = vmul.f32 %v2613_v33, %v1625_v30 }
 0x1ba   : > { %v1421_v55 = vsel %vm1419_vm6, %v1420_v9, %v1418_v48  ;;  %v1629_v56 = vsel %vm1628_vm5, %v1624_v24, %v1627_v61 }
 0x1bb   : > { %v1512_v58 = vpack.c.bf16 %v1421_v55, %v1414_v50  ;;  %v1632_v63 = vsel %vm1630_vm7, %v1631_v53, %v1629_v56  ;;  %v1636_v0 = vsel %vm1635_vm8, %v1625_v30, %v1634_v57 }
 0x1bc   : > { %v1639_v1 = vsel %vm1637_vm9, %v1638_v49, %v1636_v0 }
 0x1bd   : > { %2443 = vmatmul.mubr.bf16.vlgmr.msra.gmra.mrb[16].mxu1 %v1512_v58  ;;  %v1682_v2 = vpack.c.bf16 %v1639_v1, %v1632_v63  ;;  %v1379_v58 = vlaneseq }
 0x1be   : > { %2467 = vmatpush3.bf16.msra.mxu1 %v3647_v19  ;;  %2482 = vmatprep.mubr.msk.bf16.mxu1 %vm2663_vm0, %v2662_v52 }
 0x1bf   : > { %2468 = vmatprep.subr.bf16.mxu1 %v2662_v52  ;;  %v1380_v63 = vshrl.u32 %v1379_v58, 7 }
 0x1c1   : > { %v1381_v0 = vadd.s32 8, %v1380_v63  ;;  %v3856_v1 = vmul.u32 4, %v1380_v63 }
 0x1c2   : > { %2469 = vmatpush3.bf16.msra.mxu1 %v3656_v26 }
 0x1c3   : > { %2470 = vmatprep.subr.bf16.mxu1 %v2662_v52 }
 0x1c6   : > { %2471 = vmatpush3.bf16.msra.mxu1 %v3670_v35 }
 0x1c7   : > { %2472 = vmatprep.subr.bf16.mxu1 %v2662_v52 }
 0x1ca   : > { %2473 = vmatpush3.bf16.msra.mxu1 %v3679_v8 }
 0x1cb   : > { %2474 = vmatprep.subr.bf16.mxu1 %v2662_v52 }
 0x1ce   : > { %2475 = vmatpush3.bf16.msra.mxu1 %v3688_v42 }
 0x1cf   : > { %2476 = vmatprep.subr.bf16.mxu1 %v2662_v52 }
 0x1d2   : > { %2477 = vmatpush3.bf16.msra.mxu1 %v3697_v62 }
 0x1d3   : > { %2478 = vmatprep.subr.bf16.mxu1 %v2662_v52 }
 0x1d6   : > { %2479 = vmatpush3.bf16.msra.mxu1 %v3706_v46 }
 0x1d7   : > { %2480 = vmatprep.subr.bf16.mxu1 %v2662_v52 }
 0x1da   : > { %2481 = vmatpush3.bf16.msra.mxu1 %v3715_v14 }
 0x1db   : > { %2506 = vmatprep.subr.bf16.mxu1 %v2662_v52 }
 0x1dd   : > { %2483 = vmatmul.mubr.bf16.vlgmr.msra.gmra.mrb[20].mxu1 %v1682_v2  ;;  %v3858_v2 = vmul.u32 4, %v1381_v0 }
 0x1de   : > { %2507 = vmatpush3.bf16.msra.mxu1 %v3647_v19  ;;  %2522 = vmatprep.mubr.msk.bf16.mxu1 %vm2663_vm0, %v2662_v52 }
 0x1df   : > { %2508 = vmatprep.subr.bf16.mxu1 %v2662_v52  ;;  %vm1557_vm3 = vcmp.lt.s32.totalorder %v3858_v2, 33 }
 0x1e2   : > { %2509 = vmatpush3.bf16.msra.mxu1 %v3656_v26 }
 0x1e3   : > { %2510 = vmatprep.subr.bf16.mxu1 %v2662_v52 }
 0x1e4   : > { %v1327_v10 = vpop.f32.mrb[12].mxu0 }
 0x1e5   : > { %v1790_v15 = vmul.f32 %v1327_v10, %v1327_v10  ;;  %v1329_v18 = vpop.f32.mrb[13].mxu0 }
 0x1e6   : > { %v1792_v27 = vmul.f32 %v1329_v18, %v1329_v18  ;;  %2511 = vmatpush3.bf16.msra.mxu1 %v3670_v35  ;;  %v1331_v28 = vpop.f32.mrb[14].mxu0  ;;  %v1370_v43 = vpop.f32.mrb[12].mxu1 }
 0x1e7   : > { %v1791_v29 = vmul.f32 %v1331_v28, %v1331_v28  ;;  %v1333_v34 = vpop.f32.mrb[15].mxu0  ;;  %2512 = vmatprep.subr.bf16.mxu1 %v2662_v52  ;;  %v1960_v51 = vmul.f32 %v1370_v43, %v1370_v43  ;;  %v1372_v60 = vpop.f32.mrb[13].mxu1 }
 0x1e8   : > { %v1794_v44 = vadd.f32 %v1792_v27, %v1790_v15  ;;  %v1793_v45 = vmul.f32 %v1333_v34, %v1333_v34  ;;  %v1962_v21 = vmul.f32 %v1372_v60, %v1372_v60  ;;  %v1374_v7 = vpop.f32.mrb[14].mxu1 }
 0x1e9   : > { %v1961_v47 = vmul.f32 %v1374_v7, %v1374_v7  ;;  %v1376_v20 = vpop.f32.mrb[15].mxu1 }
 0x1ea   : > { %2614 = vrsqrt.f32 %v1794_v44  ;;  %v1795_v59 = vadd.f32 %v1793_v45, %v1791_v29  ;;  %2513 = vmatpush3.bf16.msra.mxu1 %v3679_v8  ;;  %v1964_v36 = vadd.f32 %v1962_v21, %v1960_v51  ;;  %v1963_v5 = vmul.f32 %v1376_v20, %v1376_v20 }
 0x1eb   : > { %2514 = vmatprep.subr.bf16.mxu1 %v2662_v52  ;;  %vm1798_vm10 = vcmp.eq.f32.partialorder %v1794_v44, inf  ;;  %vm1800_vm11 = vcmp.eq.f32.partialorder %v1794_v44, 0.0  ;;  %v1801_v11 = vand.u32 2147483648, %v1794_v44 }
 0x1ec   : > { %2616 = vrsqrt.f32 %v1795_v59  ;;  %v1965_v54 = vadd.f32 %v1963_v5, %v1961_v47  ;;  %vm1805_vm12 = vcmp.eq.f32.partialorder %v1795_v59, inf  ;;  %vm1968_vm13 = vcmp.eq.f32.partialorder %v1964_v36, inf }
 0x1ed   : > { %2618 = vrsqrt.f32 %v1964_v36  ;;  %v1971_v17 = vand.u32 2147483648, %v1964_v36  ;;  %vm1807_vm14 = vcmp.eq.f32.partialorder %v1795_v59, 0.0  ;;  %v1808_v22 = vand.u32 2147483648, %v1795_v59 }
 0x1ee   : > { %2515 = vmatpush3.bf16.msra.mxu1 %v3688_v42  ;;  %2620 = vrsqrt.f32 %v1965_v54  ;;  %vm1970_vm15 = vcmp.eq.f32.partialorder %v1964_v36, 0.0  ;;  %vm1975_vm1 = vcmp.eq.f32.partialorder %v1965_v54, inf  ;;  %vm1977_vm2 = vcmp.eq.f32.partialorder %v1965_v54, 0.0 }
 0x1ef   : > { %2516 = vmatprep.subr.bf16.mxu1 %v2662_v52  ;;  %v1978_v30 = vand.u32 2147483648, %v1965_v54 }
 0x1f2   : > { %2517 = vmatpush3.bf16.msra.mxu1 %v3697_v62 }
 0x1f3   : > { %2518 = vmatprep.subr.bf16.mxu1 %v2662_v52 }
 0x1f4   : > { %v2615_v3 = vpop.eup %2614 }
 0x1f5   : > { %v1797_v4 = vmul.f32 %v2615_v3, %v1794_v44 }
 0x1f6   : > { %v2617_v6 = vpop.eup %2616  ;;  %2519 = vmatpush3.bf16.msra.mxu1 %v3706_v46 }
 0x1f7   : > { %v2619_v12 = vpop.eup %2618  ;;  %2520 = vmatprep.subr.bf16.mxu1 %v2662_v52  ;;  %v1799_v13 = vsel %vm1798_vm10, %v1794_v44, %v1797_v4  ;;  %v1804_v16 = vmul.f32 %v2617_v6, %v1795_v59  ;;  %v1724_v4 = vadd.s32 1, %v3856_v1 }
 0x1f8   : > { %v1967_v23 = vmul.f32 %v2619_v12, %v1964_v36  ;;  %v2621_v24 = vpop.eup %2620  ;;  %v1802_v31 = vsel %vm1800_vm11, %v1801_v11, %v1799_v13  ;;  %v1725_v12 = vadd.s32 1, %v3858_v2 }
 0x1f9   : > { %v1806_v25 = vsel %vm1805_vm12, %v1795_v59, %v1804_v16  ;;  %v1974_v39 = vmul.f32 %v2621_v24, %v1965_v54  ;;  %vm1726_vm4 = vcmp.lt.s32.totalorder %v1724_v4, 33 }
 0x1fa   : > { %2521 = vmatpush3.bf16.msra.mxu1 %v3715_v14  ;;  %v1809_v32 = vsel %vm1807_vm14, %v1808_v22, %v1806_v25  ;;  %v1969_v38 = vsel %vm1968_vm13, %v1964_v36, %v1967_v23  ;;  %vm1727_vm5 = vcmp.lt.s32.totalorder %v1725_v12, 33 }
 0x1fb   : > { %2546 = vmatprep.subr.bf16.mxu1 %v2662_v52  ;;  %v1852_v40 = vpack.c.bf16 %v1809_v32, %v1802_v31  ;;  %v1972_v41 = vsel %vm1970_vm15, %v1971_v17, %v1969_v38  ;;  %v1976_v37 = vsel %vm1975_vm1, %v1965_v54, %v1974_v39 }
 0x1fc   : > { %v1979_v53 = vsel %vm1977_vm2, %v1978_v30, %v1976_v37 }
 0x1fd   : > { %2523 = vmatmul.mubr.bf16.vlgmr.msra.gmra.mrb[24].mxu1 %v1852_v40  ;;  %v2022_v9 = vpack.c.bf16 %v1979_v53, %v1972_v41 }
 0x1fe   : > { %2547 = vmatpush3.bf16.msra.mxu1 %v3647_v19  ;;  %2562 = vmatprep.mubr.msk.bf16.mxu1 %vm2663_vm0, %v2662_v52  ;;  %vm1556_vm0 = vcmp.lt.s32.totalorder %v3856_v1, 33 }
 0x1ff   : > { %2548 = vmatprep.subr.bf16.mxu1 %v2662_v52 }
 0x202   : > { %2549 = vmatpush3.bf16.msra.mxu1 %v3656_v26 }
 0x203   : > { %2550 = vmatprep.subr.bf16.mxu1 %v2662_v52 }
 0x206   : > { %2551 = vmatpush3.bf16.msra.mxu1 %v3670_v35 }
 0x207   : > { %2552 = vmatprep.subr.bf16.mxu1 %v2662_v52 }
 0x20a   : > { %2553 = vmatpush3.bf16.msra.mxu1 %v3679_v8 }
 0x20b   : > { %2554 = vmatprep.subr.bf16.mxu1 %v2662_v52 }
 0x20e   : > { %2555 = vmatpush3.bf16.msra.mxu1 %v3688_v42 }
 0x20f   : > { %2556 = vmatprep.subr.bf16.mxu1 %v2662_v52 }
 0x210   : > { %v1505_v19 = vpop.f32.mrb[16].mxu0 }
 0x211   : > { %v2424_v61 = vpop.f32.mrb[17].mxu0  ;;  %v1566_v21 = vadd.f32 1e-07, %v1505_v19 }
 0x212   : > { %2557 = vmatpush3.bf16.msra.mxu1 %v3697_v62  ;;  %v1508_v33 = vpop.f32.mrb[18].mxu0 }
 0x213   : > { %v2425_v26 = vpop.f32.mrb[19].mxu0  ;;  %2558 = vmatprep.subr.bf16.mxu1 %v2662_v52  ;;  %v1567_v59 = vadd.f32 1e-07, %v1508_v33 }
 0x216   : > { %2559 = vmatpush3.bf16.msra.mxu1 %v3706_v46 }
 0x217   : > { %2560 = vmatprep.subr.bf16.mxu1 %v2662_v52 }
 0x21a   : > { %2561 = vmatpush3.bf16.msra.mxu1 %v3715_v14 }
 0x21d   : > { %2563 = vmatmul.mubr.bf16.vlgmr.msra.gmra.mrb[28].mxu1 %v2022_v9 }
 0x230   : > { %v3835_v35 = vpop.f32.mrb[20].mxu0 }
 0x231   : > { %v2464_v8 = vpop.f32.mrb[21].mxu0 }
 0x232   : > { %v3837_v42 = vpop.f32.mrb[22].mxu0  ;;  %v1736_v8 = vadd.f32 1e-07, %v3835_v35 }
 0x233   : > { %v2465_v48 = vpop.f32.mrb[23].mxu0 }
 0x250   : > { %v3839_v62 = vpop.f32.mrb[24].mxu0 }
 0x251   : > { %v2504_v49 = vpop.f32.mrb[25].mxu0 }
 0x252   : > { %v3841_v50 = vpop.f32.mrb[26].mxu0 }
 0x253   : > { %v2505_v55 = vpop.f32.mrb[27].mxu0 }
 0x270   : > { %v3843_v46 = vpop.f32.mrb[28].mxu0 }
 0x271   : > { %v2544_v56 = vpop.f32.mrb[29].mxu0 }
 0x272   : > { %v3845_v57 = vpop.f32.mrb[30].mxu0  ;;  %v1737_v56 = vadd.f32 1e-07, %v3837_v42 }
 0x273   : > { %v2545_v14 = vpop.f32.mrb[31].mxu0 }
 0x290   : > { %v1547_v10 = vpop.f32.mrb[16].mxu1 }
 0x291   : > { %v1558_v15 = vsub.f32 %v1505_v19, %v1547_v10  ;;  %v1568_v18 = vadd.f32 1e-07, %v1547_v10  ;;  %v2444_v27 = vpop.f32.mrb[17].mxu1 }
 0x292   : > { %v1550_v28 = vpop.f32.mrb[18].mxu1 }
 0x293   : > { %v1564_v29 = vsel %vm1556_vm0, %v1558_v15, 0.0  ;;  %2622 = vrcp.f32 %v1568_v18  ;;  %v1559_v34 = vsub.f32 %v1508_v33, %v1550_v28  ;;  %v1569_v52 = vadd.f32 1e-07, %v1550_v28  ;;  %v2445_v43 = vpop.f32.mrb[19].mxu1 }
 0x294   : > { %v1582_v45 = vmul.f32 %v1564_v29, %v1564_v29 }
 0x295   : > { %v1565_v44 = vsel %vm1557_vm3, %v1559_v34, 0.0  ;;  %2624 = vrcp.f32 %v1569_v52 }
 0x296   : > { %v1583_v51 = vmul.f32 %v1565_v44, %v1565_v44  ;;  %v3879_v44 = vadd.s32 2, %v3856_v1 }
 0x298   : > { %v1584_v60 = vadd.f32 %v1583_v51, %v1582_v45  ;;  %vm1896_vm6 = vcmp.lt.s32.totalorder %v3879_v44, 33 }
 0x29a   : > { %v1585_v16 = vrot.slane %v1584_v60, 4 }
 0x29c   : > { %v1586_v37 = vadd.f32 %v1585_v16, %v1584_v60  ;;  %v1895_v60 = vadd.s32 2, %v3858_v2 }
 0x29d   : > { %v2623_v7 = vpop.eup %2622 }
 0x29e   : > { %v1571_v47 = vmul.f32 %v2623_v7, %v1566_v21  ;;  %v1587_v61 = vrot.slane %v1586_v37, 2  ;;  %vm1897_vm7 = vcmp.lt.s32.totalorder %v1895_v60, 33 }
 0x29f   : > { %v2625_v20 = vpop.eup %2624 }
 0x2a0   : > { %2626 = vlog2.f32 %v1571_v47  ;;  %v1573_v36 = vmul.f32 %v2625_v20, %v1567_v59  ;;  %v1588_v48 = vadd.f32 %v1587_v61, %v1586_v37 }
 0x2a2   : > { %2628 = vlog2.f32 %v1573_v36  ;;  %v1589_v0 = vrot.slane %v1588_v48, 1 }
 0x2a4   : > { %v1590_v27 = vadd.f32 %v1589_v0, %v1588_v48 }
 0x2aa   : > { %v2627_v5 = vpop.eup %2626 }
 0x2ab   : > { %v1575_v54 = vmul.f32 0.6931472, %v2627_v5 }
 0x2ac   : > { %v2629_v3 = vpop.eup %2628 }
 0x2ad   : > { %v1578_v6 = vand.u32 2147483647, %v1575_v54  ;;  %v1577_v11 = vmul.f32 0.6931472, %v2629_v3 }
 0x2af   : > { %v1579_v13 = vand.u32 2147483647, %v1577_v11  ;;  %v1580_v22 = vsel %vm1556_vm0, %v1578_v6, 0.0 }
 0x2b0   : > { %v1717_v17 = vpop.f32.mrb[20].mxu1 }
 0x2b1   : > { %v1581_v23 = vsel %vm1557_vm3, %v1579_v13, 0.0  ;;  %v1728_v24 = vsub.f32 %v3835_v35, %v1717_v17  ;;  %v1738_v25 = vadd.f32 1e-07, %v1717_v17  ;;  %v2484_v30 = vpop.f32.mrb[21].mxu1 }
 0x2b2   : > { %v1592_v31 = vadd.f32 %v1581_v23, %v1580_v22  ;;  %v1720_v32 = vpop.f32.mrb[22].mxu1 }
 0x2b3   : > { %v1734_v38 = vsel %vm1726_vm4, %v1728_v24, 0.0  ;;  %2630 = vrcp.f32 %v1738_v25  ;;  %v1729_v39 = vsub.f32 %v3837_v42, %v1720_v32  ;;  %v1739_v40 = vadd.f32 1e-07, %v1720_v32  ;;  %v2485_v41 = vpop.f32.mrb[23].mxu1 }
 0x2b4   : > { %v1752_v9 = vmul.f32 %v1734_v38, %v1734_v38  ;;  %v1593_v52 = vrot.slane %v1592_v31, 4 }
 0x2b5   : > { %v1735_v53 = vsel %vm1727_vm5, %v1729_v39, 0.0  ;;  %2632 = vrcp.f32 %v1739_v40  ;;  %v1906_v40 = vadd.f32 1e-07, %v3839_v62 }
 0x2b6   : > { %v1753_v19 = vmul.f32 %v1735_v53, %v1735_v53  ;;  %v1594_v51 = vadd.f32 %v1593_v52, %v1592_v31 }
 0x2b8   : > { %v1754_v33 = vadd.f32 %v1753_v19, %v1752_v9  ;;  %v1595_v54 = vrot.slane %v1594_v51, 2  ;;  %v1907_v9 = vadd.f32 1e-07, %v3841_v50 }
 0x2ba   : > { %v1755_v26 = vrot.slane %v1754_v33, 4  ;;  %v1596_v22 = vadd.f32 %v1595_v54, %v1594_v51 }
 0x2bc   : > { %v1756_v49 = vadd.f32 %v1755_v26, %v1754_v33  ;;  %v1597_v32 = vrot.slane %v1596_v22, 1 }
 0x2bd   : > { %v2631_v55 = vpop.eup %2630 }
 0x2be   : > { %v1741_v14 = vmul.f32 %v2631_v55, %v1736_v8  ;;  %v1757_v58 = vrot.slane %v1756_v49, 2  ;;  %v1598_v19 = vadd.f32 %v1597_v32, %v1596_v22 }
 0x2bf   : > { %v2633_v63 = vpop.eup %2632 }
 0x2c0   : > { %2634 = vlog2.f32 %v1741_v14  ;;  %v1743_v10 = vmul.f32 %v2633_v63, %v1737_v56  ;;  %v1758_v15 = vadd.f32 %v1757_v58, %v1756_v49 }
 0x2c2   : > { %2636 = vlog2.f32 %v1743_v10  ;;  %v1759_v18 = vrot.slane %v1758_v15, 1  ;;  %v2064_v10 = vadd.s32 3, %v3856_v1 }
 0x2c4   : > { %v1760_v28 = vadd.f32 %v1759_v18, %v1758_v15  ;;  %v2065_v18 = vadd.s32 3, %v3858_v2  ;;  %vm2066_vm8 = vcmp.lt.s32.totalorder %v2064_v10, 33 }
 0x2c6   : > { %v1761_v29 = vadd.f32 %v1760_v28, %v1590_v27  ;;  %vm2067_vm9 = vcmp.lt.s32.totalorder %v2065_v18, 33 }
 0x2ca   : > { %v2635_v34 = vpop.eup %2634 }
 0x2cb   : > { %v1745_v35 = vmul.f32 0.6931472, %v2635_v34 }
 0x2cc   : > { %v2637_v43 = vpop.eup %2636 }
 0x2cd   : > { %v1748_v42 = vand.u32 2147483647, %v1745_v35  ;;  %v1747_v45 = vmul.f32 0.6931472, %v2637_v43 }
 0x2cf   : > { %v1749_v21 = vand.u32 2147483647, %v1747_v45  ;;  %v1750_v59 = vsel %vm1726_vm4, %v1748_v42, 0.0 }
 0x2d0   : > { %v1887_v7 = vpop.f32.mrb[24].mxu1 }
 0x2d1   : > { %v1751_v47 = vsel %vm1727_vm5, %v1749_v21, 0.0  ;;  %v1898_v20 = vsub.f32 %v3839_v62, %v1887_v7  ;;  %v1908_v36 = vadd.f32 1e-07, %v1887_v7  ;;  %v2524_v5 = vpop.f32.mrb[25].mxu1 }
 0x2d2   : > { %v1762_v3 = vadd.f32 %v1751_v47, %v1750_v59  ;;  %v1890_v6 = vpop.f32.mrb[26].mxu1 }
 0x2d3   : > { %v1904_v11 = vsel %vm1896_vm6, %v1898_v20, 0.0  ;;  %2638 = vrcp.f32 %v1908_v36  ;;  %v1899_v13 = vsub.f32 %v3841_v50, %v1890_v6  ;;  %v1909_v16 = vadd.f32 1e-07, %v1890_v6  ;;  %v2525_v17 = vpop.f32.mrb[27].mxu1 }
 0x2d4   : > { %v1763_v4 = vrot.slane %v1762_v3, 4  ;;  %v1922_v24 = vmul.f32 %v1904_v11, %v1904_v11 }
 0x2d5   : > { %v1905_v12 = vsel %vm1897_vm7, %v1899_v13, 0.0  ;;  %2640 = vrcp.f32 %v1909_v16  ;;  %v2077_v16 = vadd.f32 1e-07, %v3845_v57 }
 0x2d6   : > { %v1764_v23 = vadd.f32 %v1763_v4, %v1762_v3  ;;  %v1923_v25 = vmul.f32 %v1905_v12, %v1905_v12  ;;  %v2076_v3 = vadd.f32 1e-07, %v3843_v46 }
 0x2d8   : > { %v1765_v30 = vrot.slane %v1764_v23, 2  ;;  %v1924_v31 = vadd.f32 %v1923_v25, %v1922_v24 }
 0x2da   : > { %v1766_v38 = vadd.f32 %v1765_v30, %v1764_v23  ;;  %v1925_v39 = vrot.slane %v1924_v31, 4 }
 0x2dc   : > { %v1767_v41 = vrot.slane %v1766_v38, 1  ;;  %v1926_v37 = vadd.f32 %v1925_v39, %v1924_v31 }
 0x2dd   : > { %v2639_v53 = vpop.eup %2638 }
 0x2de   : > { %v1768_v61 = vadd.f32 %v1767_v41, %v1766_v38  ;;  %v1911_v33 = vmul.f32 %v2639_v53, %v1906_v40  ;;  %v1927_v26 = vrot.slane %v1926_v37, 2 }
 0x2df   : > { %v2641_v8 = vpop.eup %2640 }
 0x2e0   : > { %v1769_v48 = vadd.f32 %v1768_v61, %v1598_v19  ;;  %2642 = vlog2.f32 %v1911_v33  ;;  %v1913_v49 = vmul.f32 %v2641_v8, %v1907_v9  ;;  %v1928_v55 = vadd.f32 %v1927_v26, %v1926_v37 }
 0x2e2   : > { %2644 = vlog2.f32 %v1913_v49  ;;  %v1929_v56 = vrot.slane %v1928_v55, 1 }
 0x2e4   : > { %v1930_v14 = vadd.f32 %v1929_v56, %v1928_v55 }
 0x2e6   : > { %v1931_v58 = vadd.f32 %v1930_v14, %v1761_v29 }
 0x2ea   : > { %v2643_v63 = vpop.eup %2642 }
 0x2eb   : > { %v1915_v62 = vmul.f32 0.6931472, %v2643_v63 }
 0x2ec   : > { %v2645_v0 = vpop.eup %2644 }
 0x2ed   : > { %v1918_v15 = vand.u32 2147483647, %v1915_v62  ;;  %v1917_v50 = vmul.f32 0.6931472, %v2645_v0 }
 0x2ef   : > { %v1919_v27 = vand.u32 2147483647, %v1917_v50  ;;  %v1920_v34 = vsel %vm1896_vm6, %v1918_v15, 0.0 }
 0x2f0   : > { %v2057_v28 = vpop.f32.mrb[28].mxu1 }
 0x2f1   : > { %v1921_v52 = vsel %vm1897_vm7, %v1919_v27, 0.0  ;;  %v2068_v35 = vsub.f32 %v3843_v46, %v2057_v28  ;;  %v2078_v29 = vadd.f32 1e-07, %v2057_v28  ;;  %v2564_v43 = vpop.f32.mrb[29].mxu1 }
 0x2f2   : > { %v1932_v42 = vadd.f32 %v1921_v52, %v1920_v34  ;;  %v2060_v45 = vpop.f32.mrb[30].mxu1 }
 0x2f3   : > { %v2074_v1 = vsel %vm2066_vm8, %v2068_v35, 0.0  ;;  %2646 = vrcp.f32 %v2078_v29  ;;  %v2069_v2 = vsub.f32 %v3845_v57, %v2060_v45  ;;  %v2079_v51 = vadd.f32 1e-07, %v2060_v45  ;;  %v2565_v21 = vpop.f32.mrb[31].mxu1 }
 0x2f4   : > { %v1933_v7 = vrot.slane %v1932_v42, 4  ;;  %v2092_v59 = vmul.f32 %v2074_v1, %v2074_v1 }
 0x2f5   : > { %v2075_v44 = vsel %vm2067_vm9, %v2069_v2, 0.0  ;;  %2648 = vrcp.f32 %v2079_v51 }
 0x2f6   : > { %v1934_v60 = vadd.f32 %v1933_v7, %v1932_v42  ;;  %v2093_v47 = vmul.f32 %v2075_v44, %v2075_v44 }
 0x2f8   : > { %v1935_v20 = vrot.slane %v1934_v60, 2  ;;  %v2094_v36 = vadd.f32 %v2093_v47, %v2092_v59 }
 0x2fa   : > { %v1936_v5 = vadd.f32 %v1935_v20, %v1934_v60  ;;  %v2095_v54 = vrot.slane %v2094_v36, 4 }
 0x2fc   : > { %v1937_v6 = vrot.slane %v1936_v5, 1  ;;  %v2096_v11 = vadd.f32 %v2095_v54, %v2094_v36 }
 0x2fd   : > { %v2647_v13 = vpop.eup %2646 }
 0x2fe   : > { %v1938_v17 = vadd.f32 %v1937_v6, %v1936_v5  ;;  %v2081_v4 = vmul.f32 %v2647_v13, %v2076_v3  ;;  %v2097_v12 = vrot.slane %v2096_v11, 2 }
 0x2ff   : > { %v2649_v22 = vpop.eup %2648 }
 0x300   : > { %v1939_v23 = vadd.f32 %v1938_v17, %v1769_v48  ;;  %2650 = vlog2.f32 %v2081_v4  ;;  %v2083_v24 = vmul.f32 %v2649_v22, %v2077_v16  ;;  %v2098_v25 = vadd.f32 %v2097_v12, %v2096_v11 }
 0x302   : > { %2652 = vlog2.f32 %v2083_v24  ;;  %v2099_v30 = vrot.slane %v2098_v25, 1 }
 0x304   : > { %v2100_v31 = vadd.f32 %v2099_v30, %v2098_v25 }
 0x306   : > { %v2101_v32 = vadd.f32 %v2100_v31, %v1931_v58 }
 0x308   : > { %2111 = vst [vmem:[%s3852_s30] sm:$0x1] %v2101_v32 }
 0x30a   : > { %v2651_v46 = vpop.eup %2650 }
 0x30b   : > { %v2085_v38 = vmul.f32 0.6931472, %v2651_v46 }
 0x30c   : > { %v2653_v39 = vpop.eup %2652 }
 0x30d   : > { %v2088_v40 = vand.u32 2147483647, %v2085_v38  ;;  %v2087_v41 = vmul.f32 0.6931472, %v2653_v39 }
 0x30f   : > { %v2089_v57 = vand.u32 2147483647, %v2087_v41  ;;  %v2090_v37 = vsel %vm2066_vm8, %v2088_v40, 0.0 }
 0x311   : > { %v2091_v53 = vsel %vm2067_vm9, %v2089_v57, 0.0 }
 0x312   : > { %v2102_v9 = vadd.f32 %v2091_v53, %v2090_v37 }
 0x314   : > { %v2103_v19 = vrot.slane %v2102_v9, 4 }
 0x316   : > { %v2104_v61 = vadd.f32 %v2103_v19, %v2102_v9 }
 0x318   : > { %v2105_v33 = vrot.slane %v2104_v61, 2 }
 0x31a   : > { %v2106_v26 = vadd.f32 %v2105_v33, %v2104_v61 }
 0x31c   : > { %v2107_v8 = vrot.slane %v2106_v26, 1 }
 0x31e   : > { %v2108_v48 = vadd.f32 %v2107_v8, %v2106_v26 }
 0x320   : > { %v2109_v49 = vadd.f32 %v2108_v48, %v1939_v23 }
 0x322   : > { %2112 = vst [vmem:[%s3852_s30 + $0x1] sm:$0x1] %v2109_v49 }
 0x323 PF: > { %s14_s15 = sadd.s32 1, %s2660_s15  }
 0x324   : > { %p11_p5 = scmp.ge.s32.totalorder %s14_s15, 6  }
 0x326   :  { %13 = sbr.rel (!%p11_p5) target bundleno = 1 (0x1), region = 69 }

</bundles_post_ra>
